<compile_context>
chip_gen: v6e
topology: v6e:2x2x1
jax: 0.10.0
libtpu: 0.0.40
codegen_flags: <defaults>
</compile_context>

<pallas_src>
import functools

import jax
import jax.numpy as jnp
from jax.experimental import pallas as pl
from jax.experimental.pallas import tpu as pltpu


def _round_up(n, m):
    return ((n + m - 1) // m) * m


def _cnn_v_head_kernel(x_ref, w1_ref, b1_ref, w2_ref, b2_ref, o_ref):
    """One grid step per hidden-dim shard.

    x_ref  : (B_pad, F_pad)   bf16   (zero-padded activations, VMEM resident)
    w1_ref : (F_pad, H_shard) bf16   (zero-padded first-layer weight shard)
    b1_ref : (1, H_shard)     f32
    w2_ref : (1, H_shard)     f32    (second Linear's weight as a row)
    b2_ref : (1, 1)           f32
    o_ref  : (1, B_pad, 1)    f32    (per-shard partial output)
    """
    h_id = pl.program_id(0)

    # Layer 1: bf16 x bf16 -> f32 on the MXU, + bias, ReLU.  The zero padding
    # on the F axis contributes nothing to the contraction.
    hidden = jnp.dot(x_ref[...], w1_ref[...], preferred_element_type=jnp.float32)
    hidden = jnp.maximum(hidden + b1_ref[...], 0.0)

    # Layer 2 (H -> 1): VPU multiply + XLU lane reduction instead of an N=1
    # MXU matmul (the (H, 1) operand would waste the array / be lane-sparse).
    part = jnp.sum(hidden * w2_ref[...], axis=-1, keepdims=True)

    # Add the output bias exactly once (shard 0 only); the wrapper sums shards.
    part = part + b2_ref[...] * (h_id == 0).astype(jnp.float32)
    o_ref[0] = part.astype(o_ref.dtype)


def prepare_cnn_v_params(w1, b1, w2, b2):
    """One-time parameter prep (hoisted out of the per-call path).

    Casts the big weight to bf16 and pads its reduction axis to a lane
    multiple, so the forward call does no per-call weight conversion/padding.
    """
    F, H = w1.shape
    F_pad = _round_up(F, 128)                                  # 3136 -> 3200
    w1_p = jnp.pad(jnp.asarray(w1, jnp.bfloat16), ((0, F_pad - F), (0, 0)))
    b1_row = jnp.asarray(b1, jnp.float32).reshape(1, H)
    w2_row = jnp.asarray(w2, jnp.float32).reshape(1, H)        # (H,1) -> (1,H)
    b2_11 = jnp.asarray(b2, jnp.float32).reshape(1, 1)
    return w1_p, b1_row, w2_row, b2_11


def default_num_h_shards():
    # Shard the hidden dim across TensorCores only on 2-TC chips (v7x);
    # on single-TC chips (v5e/v6e) the split is pure per-step overhead.
    try:
        kind = jax.devices()[0].device_kind.lower()
    except Exception:
        return 1
    return 2 if ("v7" in kind or "7x" in kind) else 1


@functools.partial(jax.jit, static_argnames=("num_h_shards",))
def cnn_v_forward(x, w1_p, b1_row, w2_row, b2_11, *, num_h_shards=1):
    """Fused Linear(F,H) -> ReLU -> Linear(H,1) value head.

    x: (B, F) f32.  Params come from prepare_cnn_v_params.  Returns (B, 1) f32.
    """
    B, F = x.shape
    F_pad, H = w1_p.shape
    assert F_pad >= F and F_pad - F < 128
    assert b1_row.shape == (1, H) and w2_row.shape == (1, H)
    assert b2_11.shape == (1, 1)

    n_h = num_h_shards
    if H % (128 * n_h) != 0:
        n_h = 1
    H_sh = H // n_h

    # Tiny per-call prep (<= ~100 KB): cast activations to bf16 and align the
    # (sublane, lane) dims.  The dominant per-call weight cast/pad is gone.
    # TODO(synk): drop this pad/cast too if the caller can supply bf16,
    # lane-aligned activations (or fuse this head into the preceding CNN).
    B_pad = _round_up(B, 16)  # bf16 sublane tile
    x_p = jnp.pad(jnp.asarray(x, jnp.bfloat16),
                  ((0, B_pad - B), (0, F_pad - F)))

    parts = pl.pallas_call(
        _cnn_v_head_kernel,
        out_shape=jax.ShapeDtypeStruct((n_h, B_pad, 1), jnp.float32),
        grid_spec=pltpu.PrefetchScalarGridSpec(
            num_scalar_prefetch=0,
            grid=(n_h,),                                  # 1 (v5e/v6e) or 2 (v7x)
            in_specs=[
                pl.BlockSpec((B_pad, F_pad), lambda h: (0, 0)),   # x (resident)
                pl.BlockSpec((F_pad, H_sh), lambda h: (0, h)),    # w1 shard
                pl.BlockSpec((1, H_sh), lambda h: (0, h)),        # b1 shard
                pl.BlockSpec((1, H_sh), lambda h: (0, h)),        # w2 row shard
                pl.BlockSpec((1, 1), lambda h: (0, 0)),           # b2
            ],
            out_specs=pl.BlockSpec((1, B_pad, 1), lambda h: (h, 0, 0)),
        ),
        compiler_params=pltpu.CompilerParams(
            dimension_semantics=("parallel",),
            vmem_limit_bytes=16 << 20,
        ),
    )(x_p, w1_p, b1_row, w2_row, b2_11)

    out = parts[0] if n_h == 1 else parts[0] + parts[1]
    return out[:B]


def _reference_f32(x, w1, b1, w2, b2):
    # True PyTorch CnnV semantics (f32 throughout).
    h = jnp.maximum(x @ w1 + b1.reshape(1, -1), 0.0)
    return h @ w2 + b2.reshape(1, -1)


def _reference_bf16(x, w1, b1, w2, b2):
    # Mirrors the kernel's numerics: bf16 layer-1 operands, f32 accumulation,
    # f32 second layer and biases.
    h = jnp.dot(x.astype(jnp.bfloat16), w1.astype(jnp.bfloat16),
                preferred_element_type=jnp.float32)
    h = jnp.maximum(h + b1.reshape(1, -1), 0.0)
    return jnp.dot(h, w2.astype(jnp.float32),
                   preferred_element_type=jnp.float32) + b2.reshape(1, -1)


if __name__ == "__main__":
    # Module defaults: input_size = 7*7*64 = 3136, hidden_size = 512, out = 1.
    batch = 8
    input_size = 7 * 7 * 64   # 3136
    hidden_size = 512
    out_size = 1              # CnnV is a value head: Linear(hidden, 1)

    key = jax.random.PRNGKey(0)
    k_x, k_w1, k_b1, k_w2, k_b2 = jax.random.split(key, 5)

    # PyTorch-Linear-style uniform(-1/sqrt(fan_in), 1/sqrt(fan_in)) init.
    bound1 = 1.0 / jnp.sqrt(jnp.float32(input_size))
    bound2 = 1.0 / jnp.sqrt(jnp.float32(hidden_size))

    x = jax.random.normal(k_x, (batch, input_size), dtype=jnp.float32)
    w1 = jax.random.uniform(k_w1, (input_size, hidden_size), jnp.float32,
                            -bound1, bound1)
    b1 = jax.random.uniform(k_b1, (hidden_size,), jnp.float32, -bound1, bound1)
    w2 = jax.random.uniform(k_w2, (hidden_size, out_size), jnp.float32,
                            -bound2, bound2)
    b2 = jax.random.uniform(k_b2, (out_size,), jnp.float32, -bound2, bound2)

    params = prepare_cnn_v_params(w1, b1, w2, b2)   # one-time (hoisted) prep
    n_h = default_num_h_shards()                    # 2 on v7x, else 1

    value = cnn_v_forward(x, *params, num_h_shards=n_h)
    value = jax.block_until_ready(value)
    assert value.shape == (batch, out_size)

    # Kernel-matched (bf16) reference: tight tolerance.
    ref_bf16 = _reference_bf16(x, w1, b1, w2, b2)
    assert jnp.allclose(value, ref_bf16, atol=2e-4, rtol=2e-4), \
        "mismatch vs bf16-matched reference"

    # True f32 module semantics: loose tolerance covers bf16 quantization of
    # x/w1 over F=3136.
    ref_f32 = _reference_f32(x, w1, b1, w2, b2)
    assert jnp.allclose(value, ref_f32, atol=2e-2, rtol=2e-2), \
        "mismatch vs f32 reference"

    print("KERNEL_OK")
</pallas_src>

<mosaic_0001>
module attributes {stable_mosaic.version = 11 : i64} {
  func.func @_cnn_v_head_kernel(%arg0: i32, %arg1: memref<16x3200xbf16, #tpu.memory_space<vmem>>, %arg2: memref<3200x512xbf16, #tpu.memory_space<vmem>>, %arg3: memref<1x512xf32, #tpu.memory_space<vmem>>, %arg4: memref<1x512xf32, #tpu.memory_space<vmem>>, %arg5: memref<1x1xf32, #tpu.memory_space<vmem>>, %arg6: memref<1x16x1xf32, #tpu.memory_space<vmem>>) attributes {dimension_semantics = [#tpu.dimension_semantics<parallel>], iteration_bounds = array<i64: 1>, scalar_prefetch = 0 : i64, scratch_operands = 0 : i64, tpu.core_type = #tpu.core_type<tc>, window_params = [{pipeline_mode = #tpu.pipeline_mode<synchronous>, transform_indices = @transform_0, window_bounds = array<i64: 16, 3200>}, {transform_indices = @transform_1, window_bounds = array<i64: 3200, 512>}, {transform_indices = @transform_2, window_bounds = array<i64: 1, 512>}, {transform_indices = @transform_3, window_bounds = array<i64: 1, 512>}, {pipeline_mode = #tpu.pipeline_mode<synchronous>, transform_indices = @transform_4, window_bounds = array<i64: 1, 1>}, {transform_indices = @transform_5, window_bounds = array<i64: 1, 16, 1>}]} {
    %c0 = arith.constant 0 : index
    %c0_0 = arith.constant 0 : index
    %0 = vector.load %arg1[%c0, %c0_0] : memref<16x3200xbf16, #tpu.memory_space<vmem>>, vector<16x3200xbf16>
    %c0_1 = arith.constant 0 : index
    %c0_2 = arith.constant 0 : index
    %1 = vector.load %arg2[%c0_1, %c0_2] : memref<3200x512xbf16, #tpu.memory_space<vmem>>, vector<3200x512xbf16>
    %cst = arith.constant dense<0.000000e+00> : vector<16x512xf32>
    %2 = tpu.matmul %0, %1, %cst {dimension_numbers = #tpu.dot_dimension_numbers<[1], [0], [0], [1], [0, 0, 1, 1], [], []>} : vector<16x3200xbf16>, vector<3200x512xbf16>, vector<16x512xf32> -> vector<16x512xf32>
    %c0_3 = arith.constant 0 : index
    %c0_4 = arith.constant 0 : index
    %3 = vector.load %arg3[%c0_3, %c0_4] : memref<1x512xf32, #tpu.memory_space<vmem>>, vector<1x512xf32>
    %4 = vector.broadcast %3 : vector<1x512xf32> to vector<16x512xf32>
    %5 = arith.addf %2, %4 : vector<16x512xf32>
    %cst_5 = arith.constant 0.000000e+00 : f32
    %6 = vector.broadcast %cst_5 : f32 to vector<16x512xf32>
    %7 = arith.maximumf %5, %6 : vector<16x512xf32>
    %c0_6 = arith.constant 0 : index
    %c0_7 = arith.constant 0 : index
    %8 = vector.load %arg4[%c0_6, %c0_7] : memref<1x512xf32, #tpu.memory_space<vmem>>, vector<1x512xf32>
    %9 = vector.broadcast %8 : vector<1x512xf32> to vector<16x512xf32>
    %10 = arith.mulf %7, %9 : vector<16x512xf32>
    %cst_8 = arith.constant dense<0.000000e+00> : vector<16xf32>
    %11 = vector.multi_reduction <add>, %10, %cst_8 [1] : vector<16x512xf32> to vector<16xf32>
    %12 = vector.shape_cast %11 : vector<16xf32> to vector<16x1xf32>
    %c0_9 = arith.constant 0 : index
    %c0_10 = arith.constant 0 : index
    %13 = vector.load %arg5[%c0_9, %c0_10] : memref<1x1xf32, #tpu.memory_space<vmem>>, vector<1x1xf32>
    %c0_i32 = arith.constant 0 : i32
    %14 = arith.cmpi eq, %arg0, %c0_i32 : i32
    %15 = arith.extui %14 : i1 to i32
    %16 = arith.sitofp %15 : i32 to f32
    %17 = vector.broadcast %16 : f32 to vector<1x1xf32>
    %18 = arith.mulf %13, %17 : vector<1x1xf32>
    %19 = vector.broadcast %18 : vector<1x1xf32> to vector<16x1xf32>
    %20 = arith.addf %12, %19 : vector<16x1xf32>
    %c0_11 = arith.constant 0 : index
    %c0_12 = arith.constant 0 : index
    %c0_13 = arith.constant 0 : index
    %21 = vector.load %arg6[%c0_11, %c0_12, %c0_13] : memref<1x16x1xf32, #tpu.memory_space<vmem>>, vector<1x16x1xf32>
    %22 = vector.shape_cast %21 : vector<1x16x1xf32> to vector<16x1xf32>
    %23 = vector.shape_cast %20 : vector<16x1xf32> to vector<1x16x1xf32>
    tpu.vector_store %arg6[%c0_11, %c0_12, %c0_13], %23 {strides = array<i32>} : memref<1x16x1xf32, #tpu.memory_space<vmem>>, vector<1x16x1xf32>,
    return
  }
  func.func @transform_0(%arg0: i32) -> (i32, i32) {
    %c0_i32 = arith.constant 0 : i32
    %c0_i32_0 = arith.constant 0 : i32
    %c0_i32_1 = arith.constant 0 : i32
    return %c0_i32, %c0_i32_0 : i32, i32
  }
  func.func @transform_1(%arg0: i32) -> (i32, i32) {
    %c0_i32 = arith.constant 0 : i32
    %c0_i32_0 = arith.constant 0 : i32
    return %c0_i32, %arg0 : i32, i32
  }
  func.func @transform_2(%arg0: i32) -> (i32, i32) {
    %c0_i32 = arith.constant 0 : i32
    %c0_i32_0 = arith.constant 0 : i32
    return %c0_i32, %arg0 : i32, i32
  }
  func.func @transform_3(%arg0: i32) -> (i32, i32) {
    %c0_i32 = arith.constant 0 : i32
    %c0_i32_0 = arith.constant 0 : i32
    return %c0_i32, %arg0 : i32, i32
  }
  func.func @transform_4(%arg0: i32) -> (i32, i32) {
    %c0_i32 = arith.constant 0 : i32
    %c0_i32_0 = arith.constant 0 : i32
    %c0_i32_1 = arith.constant 0 : i32
    return %c0_i32, %c0_i32_0 : i32, i32
  }
  func.func @transform_5(%arg0: i32) -> (i32, i32, i32) {
    %c0_i32 = arith.constant 0 : i32
    %c0_i32_0 = arith.constant 0 : i32
    %c0_i32_1 = arith.constant 0 : i32
    return %arg0, %c0_i32, %c0_i32_0 : i32, i32, i32
  }
}

</mosaic_0001>

<bundles_post_ra>
// kernel: cnn_v_forward.1
= control target key start
LH: loop header
LB: loop body
LE: loop exit
PB: predicated region body
PF: predicated region fallthrough
CT: control target
= control target key end

     0   :  { %s8682_s0 = inlined_call_operand.vmem [shape: bf16[16,3200], index: 0, kind: input, shape index: {}]   ;;  %s8683_s1 = inlined_call_operand.hbm [shape: bf16[3200,512], index: 1, kind: input, shape index: {}]   ;;  %s8684_s2 = inlined_call_operand.hbm [shape: f32[1,512], index: 2, kind: input, shape index: {}]   ;;  %s8685_s3 = inlined_call_operand.hbm [shape: f32[1,512], index: 3, kind: input, shape index: {}]   ;;  %s8686_s4 = inlined_call_operand.<no memory space> [shape: f32[1,1], index: 4, kind: input, shape index: {}]   ;;  %s8687_s5 = inlined_call_operand.vmem [shape: f32[1,16,1], index: 5, kind: output, shape index: {}]  }
   0x1   :  { %v10_v0 = vstv %s8686_s4 }
   0x2   :  { %11 = vst [vmem:[#allocation2] sm:$0x1] %v10_v0 }
   0x3   :  { %12 = vsyncpa [#allocation4], 0 }
   0x4   :  { %13 = vsyncpa [#allocation6], 0  ;;  %s8383_s20 = smov [#allocation5]   ;;  %s8384_s22 = smov [#allocation3]  }
   0x5   :  { %s34_s21 = sshll.u32 %s8383_s20, 4  ;;  %s21_s23 = sshll.u32 %s8384_s22, 4  ;;  %s35_s21 = int_to_ptr.vmem [resolvable:$true] %s34_s21  ;;  %s22_s23 = int_to_ptr.vmem [resolvable:$true] %s21_s23 }
   0x6   :  { %s8327_s24 = scalar_lea.vmem %s35_s21, 64  ;;  %p8332_p1 = scmp.lt.s32.totalorder %s35_s21, %s35_s21 }
   0x7   :  { %p8328_p0 = scmp.ne.s32.totalorder %s35_s21, %s8327_s24  ;;  %p8333_p2 = scmp.lt.s32.totalorder %s8327_s24, %s8327_s24 }
   0x9   :  { %p8334_p3 = por %p8333_p2, %p8332_p1 }
   0xb   :  { %p8335_p4 = pnand %p8334_p3, %p8328_p0 }
   0xd   :  { %8338 = shalt.err (!%p8335_p4)
}
   0xe   :  { %37 = dma.hbm_to_vmem [thread:$0]  %s8684_s2, 64, %s35_s21, [#allocation6]  }
   0xf   :  { %s8347_s4 = scalar_lea.vmem %s22_s23, 102400  ;;  %p8352_p6 = scmp.lt.s32.totalorder %s22_s23, %s22_s23 }
  0x10   :  { %p8348_p5 = scmp.ne.s32.totalorder %s22_s23, %s8347_s4  ;;  %p8353_p7 = scmp.lt.s32.totalorder %s8347_s4, %s8347_s4 }
  0x12   :  { %p8354_p8 = por %p8353_p7, %p8352_p6 }
  0x14   :  { %p8355_p9 = pnand %p8354_p8, %p8348_p5 }
  0x16   :  { %8358 = shalt.err (!%p8355_p9)
}
  0x17   :  { %s8385_s27 = smov 256   ;;  %s8386_s28 = smov 16  }
  0x18   :  { %27 = dma.hbm_to_vmem [thread:$0]  %s8683_s1, 102400, %s22_s23, [#allocation4], %s8385_s27, %s8385_s27, %s8386_s28  }
  0x19   :  { %s8387_s6 = smov [#allocation7]  }
  0x1a   :  { %s44_s7 = sshll.u32 %s8387_s6, 4  ;;  %s45_s7 = int_to_ptr.vmem [resolvable:$true] %s44_s7 }
  0x1b   :  { %s8367_s8 = scalar_lea.vmem %s45_s7, 64  ;;  %p8372_p11 = scmp.lt.s32.totalorder %s45_s7, %s45_s7 }
  0x1c   :  { %p8368_p10 = scmp.ne.s32.totalorder %s45_s7, %s8367_s8  ;;  %p8373_p12 = scmp.lt.s32.totalorder %s8367_s8, %s8367_s8 }
  0x1e   :  { %p8374_p13 = por %p8373_p12, %p8372_p11 }
  0x20   :  { %p8375_p0 = pnand %p8374_p13, %p8368_p10 }
  0x22   :  { %8378 = shalt.err (!%p8375_p0)
}
  0x23   :  { %47 = dma.hbm_to_vmem [thread:$0]  %s8685_s3, 64, %s45_s7, [#allocation6]  }
  0x24   :  { %8379 = dma.done.wait [#allocation4], 102400  }
  0x25   :  { %8380 = vsyncadd [#allocation4], 4294864896 }
  0x26   :  { %8381 = dma.done.wait [#allocation6], 128  }
  0x27   :  { %8382 = vsyncadd [#allocation6], 4294967168  ;;  %v7055_v1 = vld [vmem:[#allocation3 + $0xe4] ss:$16 sps:$4 sm:$0xff]   ;;  %v7059_v3 = vld [vmem:[#allocation3 + $0xe0] ss:$16 sps:$4 sm:$0xff]  }
  0x28   :  { %v7057_v2 = vld [vmem:[#allocation3 + $0x2e4] ss:$16 sps:$4 sm:$0xff]   ;;  %5034 = vmatprep.subr.bf16.mxu0 %v7055_v1  ;;  %v7060_v4 = vld [vmem:[#allocation3 + $0x2e0] ss:$16 sps:$4 sm:$0xff]   ;;  %vm6214_vm0 = vcmask 7168  }
  0x29   :  { %5077 = vmatprep.subr.bf16.mxu1 %v7057_v2  ;;  %v7061_v5 = vld [vmem:[#allocation3 + $0xc4] ss:$16 sps:$4 sm:$0xff]   ;;  %5035 = vmatpush1.bf16.msra.mxu0 %v7059_v3  ;;  %v7065_v7 = vld [vmem:[#allocation3 + $0xc0] ss:$16 sps:$4 sm:$0xff]  }
  0x2a   :  { %5078 = vmatpush1.bf16.msra.mxu1 %v7060_v4  ;;  %v7063_v6 = vld [vmem:[#allocation3 + $0x2c4] ss:$16 sps:$4 sm:$0xff]   ;;  %5036 = vmatprep.subr.bf16.mxu0 %v7061_v5  ;;  %v7066_v8 = vld [vmem:[#allocation3 + $0x2c0] ss:$16 sps:$4 sm:$0xff]  }
  0x2b   :  { %5079 = vmatprep.subr.bf16.mxu1 %v7063_v6  ;;  %v7067_v9 = vld [vmem:[#allocation3 + $0xa4] ss:$16 sps:$4 sm:$0xff]   ;;  %v7071_v11 = vld [vmem:[#allocation3 + $0xa0] ss:$16 sps:$4 sm:$0xff]  }
  0x2c   :  { %v7069_v10 = vld [vmem:[#allocation3 + $0x2a4] ss:$16 sps:$4 sm:$0xff]   ;;  %v7072_v12 = vld [vmem:[#allocation3 + $0x2a0] ss:$16 sps:$4 sm:$0xff]  }
  0x2d   :  { %5037 = vmatpush1.bf16.msra.mxu0 %v7065_v7  ;;  %v7073_v13 = vld [vmem:[#allocation3 + $0x84] ss:$16 sps:$4 sm:$0xff]   ;;  %v7077_v15 = vld [vmem:[#allocation3 + $0x80] ss:$16 sps:$4 sm:$0xff]  }
  0x2e   :  { %5080 = vmatpush1.bf16.msra.mxu1 %v7066_v8  ;;  %5038 = vmatprep.subr.bf16.mxu0 %v7067_v9  ;;  %v7075_v14 = vld [vmem:[#allocation3 + $0x284] ss:$16 sps:$4 sm:$0xff]   ;;  %v7078_v16 = vld [vmem:[#allocation3 + $0x280] ss:$16 sps:$4 sm:$0xff]  }
  0x2f   :  { %5081 = vmatprep.subr.bf16.mxu1 %v7069_v10  ;;  %v7079_v17 = vld [vmem:[#allocation3 + $0x64] ss:$16 sps:$4 sm:$0xff]   ;;  %v7083_v19 = vld [vmem:[#allocation3 + $0x60] ss:$16 sps:$4 sm:$0xff]  }
  0x30   :  { %v7081_v18 = vld [vmem:[#allocation3 + $0x264] ss:$16 sps:$4 sm:$0xff]   ;;  %v7084_v20 = vld [vmem:[#allocation3 + $0x260] ss:$16 sps:$4 sm:$0xff]  }
  0x31   :  { %5039 = vmatpush1.bf16.msra.mxu0 %v7071_v11  ;;  %v7085_v21 = vld [vmem:[#allocation3 + $0x44] ss:$16 sps:$4 sm:$0xff]   ;;  %v7089_v23 = vld [vmem:[#allocation3 + $0x40] ss:$16 sps:$4 sm:$0xff]  }
  0x32   :  { %5082 = vmatpush1.bf16.msra.mxu1 %v7072_v12  ;;  %5040 = vmatprep.subr.bf16.mxu0 %v7073_v13  ;;  %v7087_v22 = vld [vmem:[#allocation3 + $0x244] ss:$16 sps:$4 sm:$0xff]   ;;  %v7090_v24 = vld [vmem:[#allocation3 + $0x240] ss:$16 sps:$4 sm:$0xff]  }
  0x33   :  { %5083 = vmatprep.subr.bf16.mxu1 %v7075_v14  ;;  %v7091_v25 = vld [vmem:[#allocation3 + $0x24] ss:$16 sps:$4 sm:$0xff]   ;;  %v7095_v27 = vld [vmem:[#allocation3 + $0x20] ss:$16 sps:$4 sm:$0xff]  }
  0x34   :  { %v7093_v26 = vld [vmem:[#allocation3 + $0x224] ss:$16 sps:$4 sm:$0xff]   ;;  %v7096_v28 = vld [vmem:[#allocation3 + $0x220] ss:$16 sps:$4 sm:$0xff]  }
  0x35   :  { %5041 = vmatpush1.bf16.msra.mxu0 %v7077_v15  ;;  %v7097_v29 = vld [vmem:[#allocation3 + $0x4] ss:$16 sps:$4 sm:$0xff]   ;;  %v7101_v31 = vld [vmem:[#allocation3] ss:$16 sps:$4 sm:$0xff]  }
  0x36   :  { %5084 = vmatpush1.bf16.msra.mxu1 %v7078_v16  ;;  %5042 = vmatprep.subr.bf16.mxu0 %v7079_v17  ;;  %v7099_v30 = vld [vmem:[#allocation3 + $0x204] ss:$16 sps:$4 sm:$0xff]   ;;  %v7102_v32 = vld [vmem:[#allocation3 + $0x200] ss:$16 sps:$4 sm:$0xff]  }
  0x37   :  { %5085 = vmatprep.subr.bf16.mxu1 %v7081_v18  ;;  %v7103_v33 = vld [vmem:[#allocation3 + $0x1e4] ss:$16 sps:$4 sm:$0xff]   ;;  %v7107_v35 = vld [vmem:[#allocation3 + $0x1e0] ss:$16 sps:$4 sm:$0xff]  }
  0x38   :  { %v7105_v34 = vld [vmem:[#allocation3 + $0x3e4] ss:$16 sps:$4 sm:$0xff]   ;;  %v7108_v36 = vld [vmem:[#allocation3 + $0x3e0] ss:$16 sps:$4 sm:$0xff]  }
  0x39   :  { %5043 = vmatpush1.bf16.msra.mxu0 %v7083_v19  ;;  %v7109_v37 = vld [vmem:[#allocation3 + $0x1c4] ss:$16 sps:$4 sm:$0xff]   ;;  %v7113_v39 = vld [vmem:[#allocation3 + $0x1c0] ss:$16 sps:$4 sm:$0xff]  }
  0x3a   :  { %5086 = vmatpush1.bf16.msra.mxu1 %v7084_v20  ;;  %5044 = vmatprep.subr.bf16.mxu0 %v7085_v21  ;;  %v7111_v38 = vld [vmem:[#allocation3 + $0x3c4] ss:$16 sps:$4 sm:$0xff]   ;;  %v7114_v40 = vld [vmem:[#allocation3 + $0x3c0] ss:$16 sps:$4 sm:$0xff]  }
  0x3b   :  { %5087 = vmatprep.subr.bf16.mxu1 %v7087_v22  ;;  %v7115_v41 = vld [vmem:[#allocation3 + $0x1a4] ss:$16 sps:$4 sm:$0xff]   ;;  %v7119_v43 = vld [vmem:[#allocation3 + $0x1a0] ss:$16 sps:$4 sm:$0xff]  }
  0x3c   :  { %v7117_v42 = vld [vmem:[#allocation3 + $0x3a4] ss:$16 sps:$4 sm:$0xff]   ;;  %v7120_v44 = vld [vmem:[#allocation3 + $0x3a0] ss:$16 sps:$4 sm:$0xff]  }
  0x3d   :  { %5045 = vmatpush1.bf16.msra.mxu0 %v7089_v23  ;;  %v7121_v45 = vld [vmem:[#allocation3 + $0x184] ss:$16 sps:$4 sm:$0xff]   ;;  %v7125_v47 = vld [vmem:[#allocation3 + $0x180] ss:$16 sps:$4 sm:$0xff]  }
  0x3e   :  { %5088 = vmatpush1.bf16.msra.mxu1 %v7090_v24  ;;  %5046 = vmatprep.subr.bf16.mxu0 %v7091_v25  ;;  %v7123_v46 = vld [vmem:[#allocation3 + $0x384] ss:$16 sps:$4 sm:$0xff]   ;;  %v7126_v48 = vld [vmem:[#allocation3 + $0x380] ss:$16 sps:$4 sm:$0xff]  }
  0x3f   :  { %5089 = vmatprep.subr.bf16.mxu1 %v7093_v26  ;;  %v7127_v49 = vld [vmem:[#allocation3 + $0x164] ss:$16 sps:$4 sm:$0xff]   ;;  %v7156_v52 = vld [vmem:[%s8682_s0 + $0xc] ss:$100 sps:$4 sm:$0xff]  }
  0x40   :  { %v7153_v50 = vld [vmem:[%s8682_s0 + $0x4] ss:$100 sps:$4 sm:$0xff]   ;;  %5109 = vmatprep.mubr.bf16.mxu1 %v7156_v52 }
  0x41   :  { %5047 = vmatpush1.bf16.msra.mxu0 %v7095_v27  ;;  %v7129_v51 = vld [vmem:[#allocation3 + $0x364] ss:$16 sps:$4 sm:$0xff]   ;;  %5066 = vmatprep.mubr.bf16.mxu0 %v7153_v50  ;;  %v7131_v53 = vld [vmem:[#allocation3 + $0x160] ss:$16 sps:$4 sm:$0xff]  }
  0x42   :  { %5090 = vmatpush1.bf16.msra.mxu1 %v7096_v28  ;;  %5048 = vmatprep.subr.bf16.mxu0 %v7097_v29  ;;  %v7132_v54 = vld [vmem:[#allocation3 + $0x360] ss:$16 sps:$4 sm:$0xff]   ;;  %v7133_v55 = vld [vmem:[#allocation3 + $0x144] ss:$16 sps:$4 sm:$0xff]  }
  0x43   :  { %5091 = vmatprep.subr.bf16.mxu1 %v7099_v30  ;;  %v7135_v56 = vld [vmem:[#allocation3 + $0x344] ss:$16 sps:$4 sm:$0xff]   ;;  %v7137_v57 = vld [vmem:[#allocation3 + $0x140] ss:$16 sps:$4 sm:$0xff]  }
  0x44   :  { %v7138_v58 = vld [vmem:[#allocation3 + $0x340] ss:$16 sps:$4 sm:$0xff]   ;;  %v7139_v59 = vld [vmem:[#allocation3 + $0x124] ss:$16 sps:$4 sm:$0xff]  }
  0x45   :  { %5049 = vmatpush1.bf16.msra.mxu0 %v7101_v31  ;;  %v7141_v60 = vld [vmem:[#allocation3 + $0x324] ss:$16 sps:$4 sm:$0xff]   ;;  %v7143_v61 = vld [vmem:[#allocation3 + $0x120] ss:$16 sps:$4 sm:$0xff]  }
  0x46   :  { %5092 = vmatpush1.bf16.msra.mxu1 %v7102_v32  ;;  %5050 = vmatprep.subr.bf16.mxu0 %v7103_v33  ;;  %v7144_v62 = vld [vmem:[#allocation3 + $0x320] ss:$16 sps:$4 sm:$0xff]   ;;  %v7145_v63 = vld [vmem:[#allocation3 + $0x104] ss:$16 sps:$4 sm:$0xff]  }
  0x47   :  { %5093 = vmatprep.subr.bf16.mxu1 %v7105_v34  ;;  %v7147_v0 = vld [vmem:[#allocation3 + $0x304] ss:$16 sps:$4 sm:$0xff]   ;;  %v7149_v1 = vld [vmem:[#allocation3 + $0x100] ss:$16 sps:$4 sm:$0xff]  }
  0x48   :  { %v7150_v2 = vld [vmem:[#allocation3 + $0x300] ss:$16 sps:$4 sm:$0xff]   ;;  %v7159_v3 = vld [vmem:[#allocation3 + $0x4e4] ss:$16 sps:$4 sm:$0xff]  }
  0x49   :  { %5051 = vmatpush2.bf16.msra.mxu0 %v7107_v35  ;;  %v7162_v4 = vld [vmem:[#allocation3 + $0x6e4] ss:$16 sps:$4 sm:$0xff]   ;;  %v7157_v7 = vld [vmem:[#allocation3 + $0x4e0] ss:$16 sps:$4 sm:$0xff]  }
  0x4a   :  { %5094 = vmatpush2.bf16.msra.mxu1 %v7108_v36  ;;  %5052 = vmatprep.subr.bf16.mxu0 %v7109_v37  ;;  %v7151_v5 = vld [vmem:[%s8682_s0] ss:$100 sps:$4 sm:$0xff]   ;;  %v7154_v6 = vld [vmem:[%s8682_s0 + $0x8] ss:$100 sps:$4 sm:$0xff]   ;;  %v7255_v35 = vld [vmem:[%s8682_s0 + $0x14] ss:$100 sps:$4 sm:$0xff]  }
  0x4b   :  { %5095 = vmatprep.subr.bf16.mxu1 %v7111_v38  ;;  %v7160_v8 = vld [vmem:[#allocation3 + $0x6e0] ss:$16 sps:$4 sm:$0xff]   ;;  %v7165_v9 = vld [vmem:[#allocation3 + $0x4c4] ss:$16 sps:$4 sm:$0xff]  }
  0x4c   :  { %v7168_v10 = vld [vmem:[#allocation3 + $0x6c4] ss:$16 sps:$4 sm:$0xff]   ;;  %v7163_v11 = vld [vmem:[#allocation3 + $0x4c0] ss:$16 sps:$4 sm:$0xff]  }
  0x4d   :  { %5053 = vmatpush2.bf16.msra.mxu0 %v7113_v39  ;;  %v7166_v12 = vld [vmem:[#allocation3 + $0x6c0] ss:$16 sps:$4 sm:$0xff]   ;;  %v7171_v13 = vld [vmem:[#allocation3 + $0x4a4] ss:$16 sps:$4 sm:$0xff]  }
  0x4e   :  { %5096 = vmatpush2.bf16.msra.mxu1 %v7114_v40  ;;  %5054 = vmatprep.subr.bf16.mxu0 %v7115_v41  ;;  %v7174_v14 = vld [vmem:[#allocation3 + $0x6a4] ss:$16 sps:$4 sm:$0xff]   ;;  %v7169_v15 = vld [vmem:[#allocation3 + $0x4a0] ss:$16 sps:$4 sm:$0xff]  }
  0x4f   :  { %5097 = vmatprep.subr.bf16.mxu1 %v7117_v42  ;;  %v7172_v16 = vld [vmem:[#allocation3 + $0x6a0] ss:$16 sps:$4 sm:$0xff]   ;;  %v7177_v17 = vld [vmem:[#allocation3 + $0x484] ss:$16 sps:$4 sm:$0xff]  }
  0x50   :  { %v7180_v18 = vld [vmem:[#allocation3 + $0x684] ss:$16 sps:$4 sm:$0xff]   ;;  %v7175_v19 = vld [vmem:[#allocation3 + $0x480] ss:$16 sps:$4 sm:$0xff]  }
  0x51   :  { %5055 = vmatpush2.bf16.msra.mxu0 %v7119_v43  ;;  %v7178_v20 = vld [vmem:[#allocation3 + $0x680] ss:$16 sps:$4 sm:$0xff]   ;;  %v7183_v21 = vld [vmem:[#allocation3 + $0x464] ss:$16 sps:$4 sm:$0xff]  }
  0x52   :  { %5098 = vmatpush2.bf16.msra.mxu1 %v7120_v44  ;;  %5056 = vmatprep.subr.bf16.mxu0 %v7121_v45  ;;  %v7186_v22 = vld [vmem:[#allocation3 + $0x664] ss:$16 sps:$4 sm:$0xff]   ;;  %v7181_v23 = vld [vmem:[#allocation3 + $0x460] ss:$16 sps:$4 sm:$0xff]  }
  0x53   :  { %5099 = vmatprep.subr.bf16.mxu1 %v7123_v46  ;;  %v7184_v24 = vld [vmem:[#allocation3 + $0x660] ss:$16 sps:$4 sm:$0xff]   ;;  %v7189_v25 = vld [vmem:[#allocation3 + $0x444] ss:$16 sps:$4 sm:$0xff]  }
  0x54   :  { %v7192_v26 = vld [vmem:[#allocation3 + $0x644] ss:$16 sps:$4 sm:$0xff]   ;;  %v7187_v27 = vld [vmem:[#allocation3 + $0x440] ss:$16 sps:$4 sm:$0xff]  }
  0x55   :  { %5057 = vmatpush2.bf16.msra.mxu0 %v7125_v47  ;;  %v7190_v28 = vld [vmem:[#allocation3 + $0x640] ss:$16 sps:$4 sm:$0xff]   ;;  %v7195_v29 = vld [vmem:[#allocation3 + $0x424] ss:$16 sps:$4 sm:$0xff]  }
  0x56   :  { %5100 = vmatpush2.bf16.msra.mxu1 %v7126_v48  ;;  %5058 = vmatprep.subr.bf16.mxu0 %v7127_v49  ;;  %v7198_v30 = vld [vmem:[#allocation3 + $0x624] ss:$16 sps:$4 sm:$0xff]   ;;  %v7193_v31 = vld [vmem:[#allocation3 + $0x420] ss:$16 sps:$4 sm:$0xff]  }
  0x57   :  { %5101 = vmatprep.subr.bf16.mxu1 %v7129_v51  ;;  %v7196_v32 = vld [vmem:[#allocation3 + $0x620] ss:$16 sps:$4 sm:$0xff]   ;;  %v7201_v33 = vld [vmem:[#allocation3 + $0x404] ss:$16 sps:$4 sm:$0xff]  }
  0x58   :  { %v7204_v34 = vld [vmem:[#allocation3 + $0x604] ss:$16 sps:$4 sm:$0xff]   ;;  %v7258_v36 = vld [vmem:[%s8682_s0 + $0x1c] ss:$100 sps:$4 sm:$0xff]  }
  0x59   :  { %5059 = vmatpush2.bf16.msra.mxu0 %v7131_v53  ;;  %v7199_v37 = vld [vmem:[#allocation3 + $0x400] ss:$16 sps:$4 sm:$0xff]   ;;  %v7207_v39 = vld [vmem:[#allocation3 + $0x5e4] ss:$16 sps:$4 sm:$0xff]  }
  0x5a   :  { %5102 = vmatpush2.bf16.msra.mxu1 %v7132_v54  ;;  %5060 = vmatprep.subr.bf16.mxu0 %v7133_v55  ;;  %v7202_v38 = vld [vmem:[#allocation3 + $0x600] ss:$16 sps:$4 sm:$0xff]   ;;  %v7210_v40 = vld [vmem:[#allocation3 + $0x7e4] ss:$16 sps:$4 sm:$0xff]  }
  0x5b   :  { %5103 = vmatprep.subr.bf16.mxu1 %v7135_v56  ;;  %v7205_v41 = vld [vmem:[#allocation3 + $0x5e0] ss:$16 sps:$4 sm:$0xff]   ;;  %v7213_v43 = vld [vmem:[#allocation3 + $0x5c4] ss:$16 sps:$4 sm:$0xff]  }
  0x5c   :  { %v7208_v42 = vld [vmem:[#allocation3 + $0x7e0] ss:$16 sps:$4 sm:$0xff]   ;;  %v7216_v44 = vld [vmem:[#allocation3 + $0x7c4] ss:$16 sps:$4 sm:$0xff]  }
  0x5d   :  { %5061 = vmatpush2.bf16.msra.mxu0 %v7137_v57  ;;  %v7211_v45 = vld [vmem:[#allocation3 + $0x5c0] ss:$16 sps:$4 sm:$0xff]   ;;  %v7219_v47 = vld [vmem:[#allocation3 + $0x5a4] ss:$16 sps:$4 sm:$0xff]  }
  0x5e   :  { %5104 = vmatpush2.bf16.msra.mxu1 %v7138_v58  ;;  %5062 = vmatprep.subr.bf16.mxu0 %v7139_v59  ;;  %v7214_v46 = vld [vmem:[#allocation3 + $0x7c0] ss:$16 sps:$4 sm:$0xff]   ;;  %v7222_v48 = vld [vmem:[#allocation3 + $0x7a4] ss:$16 sps:$4 sm:$0xff]  }
  0x5f   :  { %5105 = vmatprep.subr.bf16.mxu1 %v7141_v60  ;;  %v7217_v49 = vld [vmem:[#allocation3 + $0x5a0] ss:$16 sps:$4 sm:$0xff]   ;;  %v7225_v51 = vld [vmem:[#allocation3 + $0x584] ss:$16 sps:$4 sm:$0xff]  }
  0x60   :  { %v7220_v50 = vld [vmem:[#allocation3 + $0x7a0] ss:$16 sps:$4 sm:$0xff]   ;;  %v7228_v52 = vld [vmem:[#allocation3 + $0x784] ss:$16 sps:$4 sm:$0xff]  }
  0x61   :  { %5063 = vmatpush2.bf16.msra.mxu0 %v7143_v61  ;;  %v7223_v53 = vld [vmem:[#allocation3 + $0x580] ss:$16 sps:$4 sm:$0xff]   ;;  %v7231_v55 = vld [vmem:[#allocation3 + $0x564] ss:$16 sps:$4 sm:$0xff]  }
  0x62   :  { %5106 = vmatpush2.bf16.msra.mxu1 %v7144_v62  ;;  %5064 = vmatprep.subr.bf16.mxu0 %v7145_v63  ;;  %v7226_v54 = vld [vmem:[#allocation3 + $0x780] ss:$16 sps:$4 sm:$0xff]   ;;  %v7234_v56 = vld [vmem:[#allocation3 + $0x764] ss:$16 sps:$4 sm:$0xff]  }
  0x63   :  { %5107 = vmatprep.subr.bf16.mxu1 %v7147_v0  ;;  %v7229_v57 = vld [vmem:[#allocation3 + $0x560] ss:$16 sps:$4 sm:$0xff]   ;;  %v7237_v59 = vld [vmem:[#allocation3 + $0x544] ss:$16 sps:$4 sm:$0xff]  }
  0x64   :  { %v7232_v58 = vld [vmem:[#allocation3 + $0x760] ss:$16 sps:$4 sm:$0xff]   ;;  %v7240_v60 = vld [vmem:[#allocation3 + $0x744] ss:$16 sps:$4 sm:$0xff]  }
  0x65   :  { %5065 = vmatpush2.bf16.msra.mxu0 %v7149_v1  ;;  %v7235_v61 = vld [vmem:[#allocation3 + $0x540] ss:$16 sps:$4 sm:$0xff]   ;;  %v7243_v63 = vld [vmem:[#allocation3 + $0x524] ss:$16 sps:$4 sm:$0xff]  }
  0x66   :  { %5108 = vmatpush2.bf16.msra.mxu1 %v7150_v2  ;;  %5120 = vmatprep.subr.bf16.mxu0 %v7159_v3  ;;  %v7238_v62 = vld [vmem:[#allocation3 + $0x740] ss:$16 sps:$4 sm:$0xff]   ;;  %v7246_v0 = vld [vmem:[#allocation3 + $0x724] ss:$16 sps:$4 sm:$0xff]  }
  0x67   :  { %5163 = vmatprep.subr.bf16.mxu1 %v7162_v4  ;;  %v7241_v1 = vld [vmem:[#allocation3 + $0x520] ss:$16 sps:$4 sm:$0xff]   ;;  %v7249_v3 = vld [vmem:[#allocation3 + $0x504] ss:$16 sps:$4 sm:$0xff]  }
  0x68   :  { %5067 = vmatmul.mubr.bf16.vlgmr.msra.gmra.mxu0 %v7151_v5  ;;  %v7244_v2 = vld [vmem:[#allocation3 + $0x720] ss:$16 sps:$4 sm:$0xff]   ;;  %v7252_v4 = vld [vmem:[#allocation3 + $0x704] ss:$16 sps:$4 sm:$0xff]  }
  0x69   :  { %5110 = vmatmul.mubr.bf16.vlgmr.msra.gmra.mxu1 %v7154_v6  ;;  %5121 = vmatpush1.bf16.msra.mxu0 %v7157_v7  ;;  %v7247_v5 = vld [vmem:[#allocation3 + $0x500] ss:$16 sps:$4 sm:$0xff]   ;;  %v7261_v7 = vld [vmem:[#allocation3 + $0x8e4] ss:$16 sps:$4 sm:$0xff]  }
  0x6a   :  { %5164 = vmatpush1.bf16.msra.mxu1 %v7160_v8  ;;  %5122 = vmatprep.subr.bf16.mxu0 %v7165_v9  ;;  %v7250_v6 = vld [vmem:[#allocation3 + $0x700] ss:$16 sps:$4 sm:$0xff]   ;;  %v7264_v8 = vld [vmem:[#allocation3 + $0xae4] ss:$16 sps:$4 sm:$0xff]  }
  0x6b   :  { %5165 = vmatprep.subr.bf16.mxu1 %v7168_v10  ;;  %5152 = vmatprep.mubr.bf16.mxu0 %v7255_v35  ;;  %v7253_v9 = vld [vmem:[%s8682_s0 + $0x10] ss:$100 sps:$4 sm:$0xff]   ;;  %v7256_v10 = vld [vmem:[%s8682_s0 + $0x18] ss:$100 sps:$4 sm:$0xff]  }
  0x6c   :  { %5195 = vmatprep.mubr.bf16.mxu1 %v7258_v36  ;;  %v7297_v35 = vld [vmem:[#allocation3 + $0x824] ss:$16 sps:$4 sm:$0xff]  }
  0x6d   :  { %5123 = vmatpush1.bf16.msra.mxu0 %v7163_v11  ;;  %v7259_v11 = vld [vmem:[#allocation3 + $0x8e0] ss:$16 sps:$4 sm:$0xff]   ;;  %v7300_v36 = vld [vmem:[#allocation3 + $0xa24] ss:$16 sps:$4 sm:$0xff]  }
  0x6e   :  { %5166 = vmatpush1.bf16.msra.mxu1 %v7166_v12  ;;  %5124 = vmatprep.subr.bf16.mxu0 %v7171_v13  ;;  %v7262_v12 = vld [vmem:[#allocation3 + $0xae0] ss:$16 sps:$4 sm:$0xff]   ;;  %v7267_v13 = vld [vmem:[#allocation3 + $0x8c4] ss:$16 sps:$4 sm:$0xff]  }
  0x6f   :  { %5167 = vmatprep.subr.bf16.mxu1 %v7174_v14  ;;  %v7270_v14 = vld [vmem:[#allocation3 + $0xac4] ss:$16 sps:$4 sm:$0xff]  }
  0x71   :  { %5125 = vmatpush1.bf16.msra.mxu0 %v7169_v15  ;;  %v7265_v15 = vld [vmem:[#allocation3 + $0x8c0] ss:$16 sps:$4 sm:$0xff]  }
  0x72   :  { %5168 = vmatpush1.bf16.msra.mxu1 %v7172_v16  ;;  %5126 = vmatprep.subr.bf16.mxu0 %v7177_v17  ;;  %v7268_v16 = vld [vmem:[#allocation3 + $0xac0] ss:$16 sps:$4 sm:$0xff]   ;;  %v7273_v17 = vld [vmem:[#allocation3 + $0x8a4] ss:$16 sps:$4 sm:$0xff]  }
  0x73   :  { %5169 = vmatprep.subr.bf16.mxu1 %v7180_v18  ;;  %v7276_v18 = vld [vmem:[#allocation3 + $0xaa4] ss:$16 sps:$4 sm:$0xff]  }
  0x75   :  { %5127 = vmatpush1.bf16.msra.mxu0 %v7175_v19  ;;  %v7271_v19 = vld [vmem:[#allocation3 + $0x8a0] ss:$16 sps:$4 sm:$0xff]  }
  0x76   :  { %5170 = vmatpush1.bf16.msra.mxu1 %v7178_v20  ;;  %5128 = vmatprep.subr.bf16.mxu0 %v7183_v21  ;;  %v7357_v20 = vld [vmem:[%s8682_s0 + $0x24] ss:$100 sps:$4 sm:$0xff]  }
  0x77   :  { %5171 = vmatprep.subr.bf16.mxu1 %v7186_v22  ;;  %v7274_v21 = vld [vmem:[#allocation3 + $0xaa0] ss:$16 sps:$4 sm:$0xff]  }
  0x78   :  { %v7360_v22 = vld [vmem:[%s8682_s0 + $0x2c] ss:$100 sps:$4 sm:$0xff]  }
  0x79   :  { %5129 = vmatpush1.bf16.msra.mxu0 %v7181_v23  ;;  %v7279_v23 = vld [vmem:[#allocation3 + $0x884] ss:$16 sps:$4 sm:$0xff]  }
  0x7a   :  { %5172 = vmatpush1.bf16.msra.mxu1 %v7184_v24  ;;  %5130 = vmatprep.subr.bf16.mxu0 %v7189_v25  ;;  %v7282_v24 = vld [vmem:[#allocation3 + $0xa84] ss:$16 sps:$4 sm:$0xff]   ;;  %v7277_v25 = vld [vmem:[#allocation3 + $0x880] ss:$16 sps:$4 sm:$0xff]  }
  0x7b   :  { %5173 = vmatprep.subr.bf16.mxu1 %v7192_v26  ;;  %v7280_v26 = vld [vmem:[#allocation3 + $0xa80] ss:$16 sps:$4 sm:$0xff]  }
  0x7d   :  { %5131 = vmatpush1.bf16.msra.mxu0 %v7187_v27  ;;  %v7285_v27 = vld [vmem:[#allocation3 + $0x864] ss:$16 sps:$4 sm:$0xff]  }
  0x7e   :  { %5174 = vmatpush1.bf16.msra.mxu1 %v7190_v28  ;;  %5132 = vmatprep.subr.bf16.mxu0 %v7195_v29  ;;  %v7288_v28 = vld [vmem:[#allocation3 + $0xa64] ss:$16 sps:$4 sm:$0xff]   ;;  %v7283_v29 = vld [vmem:[#allocation3 + $0x860] ss:$16 sps:$4 sm:$0xff]  }
  0x7f   :  { %5175 = vmatprep.subr.bf16.mxu1 %v7198_v30  ;;  %v7286_v30 = vld [vmem:[#allocation3 + $0xa60] ss:$16 sps:$4 sm:$0xff]  }
  0x81   :  { %5133 = vmatpush1.bf16.msra.mxu0 %v7193_v31  ;;  %v7291_v31 = vld [vmem:[#allocation3 + $0x844] ss:$16 sps:$4 sm:$0xff]  }
  0x82   :  { %5176 = vmatpush1.bf16.msra.mxu1 %v7196_v32  ;;  %5134 = vmatprep.subr.bf16.mxu0 %v7201_v33  ;;  %v7294_v32 = vld [vmem:[#allocation3 + $0xa44] ss:$16 sps:$4 sm:$0xff]   ;;  %v7289_v33 = vld [vmem:[#allocation3 + $0x840] ss:$16 sps:$4 sm:$0xff]  }
  0x83   :  { %5177 = vmatprep.subr.bf16.mxu1 %v7204_v34  ;;  %v7292_v34 = vld [vmem:[#allocation3 + $0xa40] ss:$16 sps:$4 sm:$0xff]  }
  0x85   :  { %5135 = vmatpush1.bf16.msra.mxu0 %v7199_v37  ;;  %v7295_v37 = vld [vmem:[#allocation3 + $0x820] ss:$16 sps:$4 sm:$0xff]  }
  0x86   :  { %5178 = vmatpush1.bf16.msra.mxu1 %v7202_v38  ;;  %5136 = vmatprep.subr.bf16.mxu0 %v7207_v39  ;;  %v7298_v38 = vld [vmem:[#allocation3 + $0xa20] ss:$16 sps:$4 sm:$0xff]   ;;  %v7303_v39 = vld [vmem:[#allocation3 + $0x804] ss:$16 sps:$4 sm:$0xff]  }
  0x87   :  { %5179 = vmatprep.subr.bf16.mxu1 %v7210_v40  ;;  %v7306_v40 = vld [vmem:[#allocation3 + $0xa04] ss:$16 sps:$4 sm:$0xff]  }
  0x89   :  { %5137 = vmatpush2.bf16.msra.mxu0 %v7205_v41  ;;  %v7301_v41 = vld [vmem:[#allocation3 + $0x800] ss:$16 sps:$4 sm:$0xff]  }
  0x8a   :  { %5180 = vmatpush2.bf16.msra.mxu1 %v7208_v42  ;;  %5138 = vmatprep.subr.bf16.mxu0 %v7213_v43  ;;  %v7304_v42 = vld [vmem:[#allocation3 + $0xa00] ss:$16 sps:$4 sm:$0xff]   ;;  %v7309_v43 = vld [vmem:[#allocation3 + $0x9e4] ss:$16 sps:$4 sm:$0xff]  }
  0x8b   :  { %5181 = vmatprep.subr.bf16.mxu1 %v7216_v44  ;;  %v7312_v44 = vld [vmem:[#allocation3 + $0xbe4] ss:$16 sps:$4 sm:$0xff]  }
  0x8d   :  { %5139 = vmatpush2.bf16.msra.mxu0 %v7211_v45  ;;  %v7307_v45 = vld [vmem:[#allocation3 + $0x9e0] ss:$16 sps:$4 sm:$0xff]  }
  0x8e   :  { %5182 = vmatpush2.bf16.msra.mxu1 %v7214_v46  ;;  %5140 = vmatprep.subr.bf16.mxu0 %v7219_v47  ;;  %v7310_v46 = vld [vmem:[#allocation3 + $0xbe0] ss:$16 sps:$4 sm:$0xff]   ;;  %v7315_v47 = vld [vmem:[#allocation3 + $0x9c4] ss:$16 sps:$4 sm:$0xff]  }
  0x8f   :  { %5183 = vmatprep.subr.bf16.mxu1 %v7222_v48  ;;  %v7318_v48 = vld [vmem:[#allocation3 + $0xbc4] ss:$16 sps:$4 sm:$0xff]  }
  0x91   :  { %5141 = vmatpush2.bf16.msra.mxu0 %v7217_v49  ;;  %v7313_v49 = vld [vmem:[#allocation3 + $0x9c0] ss:$16 sps:$4 sm:$0xff]  }
  0x92   :  { %5184 = vmatpush2.bf16.msra.mxu1 %v7220_v50  ;;  %5142 = vmatprep.subr.bf16.mxu0 %v7225_v51  ;;  %v7316_v50 = vld [vmem:[#allocation3 + $0xbc0] ss:$16 sps:$4 sm:$0xff]   ;;  %v7321_v51 = vld [vmem:[#allocation3 + $0x9a4] ss:$16 sps:$4 sm:$0xff]  }
  0x93   :  { %5185 = vmatprep.subr.bf16.mxu1 %v7228_v52  ;;  %v7324_v52 = vld [vmem:[#allocation3 + $0xba4] ss:$16 sps:$4 sm:$0xff]  }
  0x95   :  { %5143 = vmatpush2.bf16.msra.mxu0 %v7223_v53  ;;  %v7319_v53 = vld [vmem:[#allocation3 + $0x9a0] ss:$16 sps:$4 sm:$0xff]  }
  0x96   :  { %5186 = vmatpush2.bf16.msra.mxu1 %v7226_v54  ;;  %5144 = vmatprep.subr.bf16.mxu0 %v7231_v55  ;;  %v7322_v54 = vld [vmem:[#allocation3 + $0xba0] ss:$16 sps:$4 sm:$0xff]   ;;  %v7327_v55 = vld [vmem:[#allocation3 + $0x984] ss:$16 sps:$4 sm:$0xff]  }
  0x97   :  { %5187 = vmatprep.subr.bf16.mxu1 %v7234_v56  ;;  %v7330_v56 = vld [vmem:[#allocation3 + $0xb84] ss:$16 sps:$4 sm:$0xff]  }
  0x99   :  { %5145 = vmatpush2.bf16.msra.mxu0 %v7229_v57  ;;  %v7325_v57 = vld [vmem:[#allocation3 + $0x980] ss:$16 sps:$4 sm:$0xff]  }
  0x9a   :  { %5188 = vmatpush2.bf16.msra.mxu1 %v7232_v58  ;;  %5146 = vmatprep.subr.bf16.mxu0 %v7237_v59  ;;  %v7328_v58 = vld [vmem:[#allocation3 + $0xb80] ss:$16 sps:$4 sm:$0xff]   ;;  %v7333_v59 = vld [vmem:[#allocation3 + $0x964] ss:$16 sps:$4 sm:$0xff]  }
  0x9b   :  { %5189 = vmatprep.subr.bf16.mxu1 %v7240_v60  ;;  %v7336_v60 = vld [vmem:[#allocation3 + $0xb64] ss:$16 sps:$4 sm:$0xff]  }
  0x9d   :  { %5147 = vmatpush2.bf16.msra.mxu0 %v7235_v61  ;;  %v7331_v61 = vld [vmem:[#allocation3 + $0x960] ss:$16 sps:$4 sm:$0xff]  }
  0x9e   :  { %5190 = vmatpush2.bf16.msra.mxu1 %v7238_v62  ;;  %5148 = vmatprep.subr.bf16.mxu0 %v7243_v63  ;;  %v7334_v62 = vld [vmem:[#allocation3 + $0xb60] ss:$16 sps:$4 sm:$0xff]   ;;  %v7339_v63 = vld [vmem:[#allocation3 + $0x944] ss:$16 sps:$4 sm:$0xff]  }
  0x9f   :  { %5191 = vmatprep.subr.bf16.mxu1 %v7246_v0  ;;  %v7342_v0 = vld [vmem:[#allocation3 + $0xb44] ss:$16 sps:$4 sm:$0xff]  }
  0xa1   :  { %5149 = vmatpush2.bf16.msra.mxu0 %v7241_v1  ;;  %v7337_v1 = vld [vmem:[#allocation3 + $0x940] ss:$16 sps:$4 sm:$0xff]  }
  0xa2   :  { %5192 = vmatpush2.bf16.msra.mxu1 %v7244_v2  ;;  %5150 = vmatprep.subr.bf16.mxu0 %v7249_v3  ;;  %v7340_v2 = vld [vmem:[#allocation3 + $0xb40] ss:$16 sps:$4 sm:$0xff]   ;;  %v7345_v3 = vld [vmem:[#allocation3 + $0x924] ss:$16 sps:$4 sm:$0xff]  }
  0xa3   :  { %5193 = vmatprep.subr.bf16.mxu1 %v7252_v4  ;;  %v7348_v4 = vld [vmem:[#allocation3 + $0xb24] ss:$16 sps:$4 sm:$0xff]  }
  0xa5   :  { %5151 = vmatpush2.bf16.msra.mxu0 %v7247_v5  ;;  %v7343_v5 = vld [vmem:[#allocation3 + $0x920] ss:$16 sps:$4 sm:$0xff]  }
  0xa6   :  { %5194 = vmatpush2.bf16.msra.mxu1 %v7250_v6  ;;  %5206 = vmatprep.subr.bf16.mxu0 %v7261_v7  ;;  %v7346_v6 = vld [vmem:[#allocation3 + $0xb20] ss:$16 sps:$4 sm:$0xff]   ;;  %v7351_v7 = vld [vmem:[#allocation3 + $0x904] ss:$16 sps:$4 sm:$0xff]  }
  0xa7   :  { %5249 = vmatprep.subr.bf16.mxu1 %v7264_v8  ;;  %v7354_v8 = vld [vmem:[#allocation3 + $0xb04] ss:$16 sps:$4 sm:$0xff]  }
  0xa8   :  { %5153 = vmatmul.mubr.bf16.vlgmr.msra.gmra.mxu0 %v7253_v9  ;;  %v7349_v9 = vld [vmem:[#allocation3 + $0x900] ss:$16 sps:$4 sm:$0xff]  }
  0xa9   :  { %5196 = vmatmul.mubr.bf16.vlgmr.msra.gmra.mxu1 %v7256_v10  ;;  %5207 = vmatpush1.bf16.msra.mxu0 %v7259_v11  ;;  %v7352_v10 = vld [vmem:[#allocation3 + $0xb00] ss:$16 sps:$4 sm:$0xff]   ;;  %v7363_v11 = vld [vmem:[#allocation3 + $0xce4] ss:$16 sps:$4 sm:$0xff]  }
  0xaa   :  { %5250 = vmatpush1.bf16.msra.mxu1 %v7262_v12  ;;  %5208 = vmatprep.subr.bf16.mxu0 %v7267_v13  ;;  %v7366_v12 = vld [vmem:[#allocation3 + $0xee4] ss:$16 sps:$4 sm:$0xff]  }
  0xab   :  { %5251 = vmatprep.subr.bf16.mxu1 %v7270_v14  ;;  %5238 = vmatprep.mubr.bf16.mxu0 %v7357_v20  ;;  %v7355_v13 = vld [vmem:[%s8682_s0 + $0x20] ss:$100 sps:$4 sm:$0xff]   ;;  %v7358_v14 = vld [vmem:[%s8682_s0 + $0x28] ss:$100 sps:$4 sm:$0xff]  }
  0xac   :  { %5281 = vmatprep.mubr.bf16.mxu1 %v7360_v22  ;;  %v7462_v20 = vld [vmem:[%s8682_s0 + $0x3c] ss:$100 sps:$4 sm:$0xff]  }
  0xad   :  { %5209 = vmatpush1.bf16.msra.mxu0 %v7265_v15  ;;  %v7361_v15 = vld [vmem:[#allocation3 + $0xce0] ss:$16 sps:$4 sm:$0xff]  }
  0xae   :  { %5252 = vmatpush1.bf16.msra.mxu1 %v7268_v16  ;;  %5210 = vmatprep.subr.bf16.mxu0 %v7273_v17  ;;  %v7364_v16 = vld [vmem:[#allocation3 + $0xee0] ss:$16 sps:$4 sm:$0xff]   ;;  %v7369_v17 = vld [vmem:[#allocation3 + $0xcc4] ss:$16 sps:$4 sm:$0xff]  }
  0xaf   :  { %5253 = vmatprep.subr.bf16.mxu1 %v7276_v18  ;;  %v7372_v18 = vld [vmem:[#allocation3 + $0xec4] ss:$16 sps:$4 sm:$0xff]   ;;  %v7370_v22 = vld [vmem:[#allocation3 + $0xec0] ss:$16 sps:$4 sm:$0xff]  }
  0xb1   :  { %5211 = vmatpush1.bf16.msra.mxu0 %v7271_v19  ;;  %v7459_v19 = vld [vmem:[%s8682_s0 + $0x34] ss:$100 sps:$4 sm:$0xff]  }
  0xb2   :  { %5254 = vmatpush1.bf16.msra.mxu1 %v7274_v21  ;;  %5212 = vmatprep.subr.bf16.mxu0 %v7279_v23  ;;  %v7367_v21 = vld [vmem:[#allocation3 + $0xcc0] ss:$16 sps:$4 sm:$0xff]   ;;  %v7375_v23 = vld [vmem:[#allocation3 + $0xca4] ss:$16 sps:$4 sm:$0xff]  }
  0xb3   :  { %5255 = vmatprep.subr.bf16.mxu1 %v7282_v24  ;;  %v7378_v24 = vld [vmem:[#allocation3 + $0xea4] ss:$16 sps:$4 sm:$0xff]  }
  0xb5   :  { %5213 = vmatpush1.bf16.msra.mxu0 %v7277_v25  ;;  %v7373_v25 = vld [vmem:[#allocation3 + $0xca0] ss:$16 sps:$4 sm:$0xff]  }
  0xb6   :  { %5256 = vmatpush1.bf16.msra.mxu1 %v7280_v26  ;;  %5214 = vmatprep.subr.bf16.mxu0 %v7285_v27  ;;  %v7376_v26 = vld [vmem:[#allocation3 + $0xea0] ss:$16 sps:$4 sm:$0xff]   ;;  %v7381_v27 = vld [vmem:[#allocation3 + $0xc84] ss:$16 sps:$4 sm:$0xff]  }
  0xb7   :  { %5257 = vmatprep.subr.bf16.mxu1 %v7288_v28  ;;  %v7384_v28 = vld [vmem:[#allocation3 + $0xe84] ss:$16 sps:$4 sm:$0xff]  }
  0xb9   :  { %5215 = vmatpush1.bf16.msra.mxu0 %v7283_v29  ;;  %v7379_v29 = vld [vmem:[#allocation3 + $0xc80] ss:$16 sps:$4 sm:$0xff]  }
  0xba   :  { %5258 = vmatpush1.bf16.msra.mxu1 %v7286_v30  ;;  %5216 = vmatprep.subr.bf16.mxu0 %v7291_v31  ;;  %v7382_v30 = vld [vmem:[#allocation3 + $0xe80] ss:$16 sps:$4 sm:$0xff]   ;;  %v7387_v31 = vld [vmem:[#allocation3 + $0xc64] ss:$16 sps:$4 sm:$0xff]  }
  0xbb   :  { %5259 = vmatprep.subr.bf16.mxu1 %v7294_v32  ;;  %v7390_v32 = vld [vmem:[#allocation3 + $0xe64] ss:$16 sps:$4 sm:$0xff]  }
  0xbd   :  { %5217 = vmatpush1.bf16.msra.mxu0 %v7289_v33  ;;  %v7385_v33 = vld [vmem:[#allocation3 + $0xc60] ss:$16 sps:$4 sm:$0xff]  }
  0xbe   :  { %5260 = vmatpush1.bf16.msra.mxu1 %v7292_v34  ;;  %5218 = vmatprep.subr.bf16.mxu0 %v7297_v35  ;;  %v7388_v34 = vld [vmem:[#allocation3 + $0xe60] ss:$16 sps:$4 sm:$0xff]   ;;  %v7393_v35 = vld [vmem:[#allocation3 + $0xc44] ss:$16 sps:$4 sm:$0xff]  }
  0xbf   :  { %5261 = vmatprep.subr.bf16.mxu1 %v7300_v36  ;;  %v7396_v36 = vld [vmem:[#allocation3 + $0xe44] ss:$16 sps:$4 sm:$0xff]  }
  0xc1   :  { %5219 = vmatpush1.bf16.msra.mxu0 %v7295_v37  ;;  %v7391_v37 = vld [vmem:[#allocation3 + $0xc40] ss:$16 sps:$4 sm:$0xff]  }
  0xc2   :  { %5262 = vmatpush1.bf16.msra.mxu1 %v7298_v38  ;;  %5220 = vmatprep.subr.bf16.mxu0 %v7303_v39  ;;  %v7394_v38 = vld [vmem:[#allocation3 + $0xe40] ss:$16 sps:$4 sm:$0xff]   ;;  %v7399_v39 = vld [vmem:[#allocation3 + $0xc24] ss:$16 sps:$4 sm:$0xff]  }
  0xc3   :  { %5263 = vmatprep.subr.bf16.mxu1 %v7306_v40  ;;  %v7402_v40 = vld [vmem:[#allocation3 + $0xe24] ss:$16 sps:$4 sm:$0xff]  }
  0xc5   :  { %5221 = vmatpush1.bf16.msra.mxu0 %v7301_v41  ;;  %v7397_v41 = vld [vmem:[#allocation3 + $0xc20] ss:$16 sps:$4 sm:$0xff]  }
  0xc6   :  { %5264 = vmatpush1.bf16.msra.mxu1 %v7304_v42  ;;  %5222 = vmatprep.subr.bf16.mxu0 %v7309_v43  ;;  %v7400_v42 = vld [vmem:[#allocation3 + $0xe20] ss:$16 sps:$4 sm:$0xff]   ;;  %v7405_v43 = vld [vmem:[#allocation3 + $0xc04] ss:$16 sps:$4 sm:$0xff]  }
  0xc7   :  { %5265 = vmatprep.subr.bf16.mxu1 %v7312_v44  ;;  %v7408_v44 = vld [vmem:[#allocation3 + $0xe04] ss:$16 sps:$4 sm:$0xff]  }
  0xc9   :  { %5223 = vmatpush2.bf16.msra.mxu0 %v7307_v45  ;;  %v7403_v45 = vld [vmem:[#allocation3 + $0xc00] ss:$16 sps:$4 sm:$0xff]  }
  0xca   :  { %5266 = vmatpush2.bf16.msra.mxu1 %v7310_v46  ;;  %5224 = vmatprep.subr.bf16.mxu0 %v7315_v47  ;;  %v7406_v46 = vld [vmem:[#allocation3 + $0xe00] ss:$16 sps:$4 sm:$0xff]   ;;  %v7411_v47 = vld [vmem:[#allocation3 + $0xde4] ss:$16 sps:$4 sm:$0xff]  }
  0xcb   :  { %5267 = vmatprep.subr.bf16.mxu1 %v7318_v48  ;;  %v7414_v48 = vld [vmem:[#allocation3 + $0xfe4] ss:$16 sps:$4 sm:$0xff]  }
  0xcd   :  { %5225 = vmatpush2.bf16.msra.mxu0 %v7313_v49  ;;  %v7409_v49 = vld [vmem:[#allocation3 + $0xde0] ss:$16 sps:$4 sm:$0xff]  }
  0xce   :  { %5268 = vmatpush2.bf16.msra.mxu1 %v7316_v50  ;;  %5226 = vmatprep.subr.bf16.mxu0 %v7321_v51  ;;  %v7412_v50 = vld [vmem:[#allocation3 + $0xfe0] ss:$16 sps:$4 sm:$0xff]   ;;  %v7417_v51 = vld [vmem:[#allocation3 + $0xdc4] ss:$16 sps:$4 sm:$0xff]  }
  0xcf   :  { %5269 = vmatprep.subr.bf16.mxu1 %v7324_v52  ;;  %v7420_v52 = vld [vmem:[#allocation3 + $0xfc4] ss:$16 sps:$4 sm:$0xff]  }
  0xd1   :  { %5227 = vmatpush2.bf16.msra.mxu0 %v7319_v53  ;;  %v7415_v53 = vld [vmem:[#allocation3 + $0xdc0] ss:$16 sps:$4 sm:$0xff]  }
  0xd2   :  { %5270 = vmatpush2.bf16.msra.mxu1 %v7322_v54  ;;  %5228 = vmatprep.subr.bf16.mxu0 %v7327_v55  ;;  %v7418_v54 = vld [vmem:[#allocation3 + $0xfc0] ss:$16 sps:$4 sm:$0xff]   ;;  %v7423_v55 = vld [vmem:[#allocation3 + $0xda4] ss:$16 sps:$4 sm:$0xff]  }
  0xd3   :  { %5271 = vmatprep.subr.bf16.mxu1 %v7330_v56  ;;  %v7426_v56 = vld [vmem:[#allocation3 + $0xfa4] ss:$16 sps:$4 sm:$0xff]  }
  0xd5   :  { %5229 = vmatpush2.bf16.msra.mxu0 %v7325_v57  ;;  %v7421_v57 = vld [vmem:[#allocation3 + $0xda0] ss:$16 sps:$4 sm:$0xff]  }
  0xd6   :  { %5272 = vmatpush2.bf16.msra.mxu1 %v7328_v58  ;;  %5230 = vmatprep.subr.bf16.mxu0 %v7333_v59  ;;  %v7424_v58 = vld [vmem:[#allocation3 + $0xfa0] ss:$16 sps:$4 sm:$0xff]   ;;  %v7429_v59 = vld [vmem:[#allocation3 + $0xd84] ss:$16 sps:$4 sm:$0xff]  }
  0xd7   :  { %5273 = vmatprep.subr.bf16.mxu1 %v7336_v60  ;;  %v7432_v60 = vld [vmem:[#allocation3 + $0xf84] ss:$16 sps:$4 sm:$0xff]  }
  0xd9   :  { %5231 = vmatpush2.bf16.msra.mxu0 %v7331_v61  ;;  %v7427_v61 = vld [vmem:[#allocation3 + $0xd80] ss:$16 sps:$4 sm:$0xff]  }
  0xda   :  { %5274 = vmatpush2.bf16.msra.mxu1 %v7334_v62  ;;  %5232 = vmatprep.subr.bf16.mxu0 %v7339_v63  ;;  %v7430_v62 = vld [vmem:[#allocation3 + $0xf80] ss:$16 sps:$4 sm:$0xff]   ;;  %v7435_v63 = vld [vmem:[#allocation3 + $0xd64] ss:$16 sps:$4 sm:$0xff]  }
  0xdb   :  { %5275 = vmatprep.subr.bf16.mxu1 %v7342_v0  ;;  %v7438_v0 = vld [vmem:[#allocation3 + $0xf64] ss:$16 sps:$4 sm:$0xff]  }
  0xdd   :  { %5233 = vmatpush2.bf16.msra.mxu0 %v7337_v1  ;;  %v7433_v1 = vld [vmem:[#allocation3 + $0xd60] ss:$16 sps:$4 sm:$0xff]  }
  0xde   :  { %5276 = vmatpush2.bf16.msra.mxu1 %v7340_v2  ;;  %5234 = vmatprep.subr.bf16.mxu0 %v7345_v3  ;;  %v7436_v2 = vld [vmem:[#allocation3 + $0xf60] ss:$16 sps:$4 sm:$0xff]   ;;  %v7441_v3 = vld [vmem:[#allocation3 + $0xd44] ss:$16 sps:$4 sm:$0xff]  }
  0xdf   :  { %5277 = vmatprep.subr.bf16.mxu1 %v7348_v4  ;;  %v7444_v4 = vld [vmem:[#allocation3 + $0xf44] ss:$16 sps:$4 sm:$0xff]  }
  0xe1   :  { %5235 = vmatpush2.bf16.msra.mxu0 %v7343_v5  ;;  %v7439_v5 = vld [vmem:[#allocation3 + $0xd40] ss:$16 sps:$4 sm:$0xff]  }
  0xe2   :  { %5278 = vmatpush2.bf16.msra.mxu1 %v7346_v6  ;;  %5236 = vmatprep.subr.bf16.mxu0 %v7351_v7  ;;  %v7442_v6 = vld [vmem:[#allocation3 + $0xf40] ss:$16 sps:$4 sm:$0xff]   ;;  %v888_v7 = vlaneseq }
  0xe3   :  { %5279 = vmatprep.subr.bf16.mxu1 %v7354_v8  ;;  %v7447_v8 = vld [vmem:[#allocation3 + $0xd24] ss:$16 sps:$4 sm:$0xff]  }
  0xe5   :  { %5237 = vmatpush2.bf16.msra.mxu0 %v7349_v9  ;;  %v7450_v9 = vld [vmem:[#allocation3 + $0xf24] ss:$16 sps:$4 sm:$0xff]  }
  0xe6   :  { %5280 = vmatpush2.bf16.msra.mxu1 %v7352_v10  ;;  %5292 = vmatprep.subr.bf16.mxu0 %v7363_v11  ;;  %v7445_v10 = vld [vmem:[#allocation3 + $0xd20] ss:$16 sps:$4 sm:$0xff]  }
  0xe7   :  { %5335 = vmatprep.subr.bf16.mxu1 %v7366_v12  ;;  %v7448_v11 = vld [vmem:[#allocation3 + $0xf20] ss:$16 sps:$4 sm:$0xff]   ;;  %v8473_v12 = vshrl.u32 %v888_v7, 7  ;;  %v7510_v7 = vld [vmem:[#allocation3 + $0x1204] ss:$16 sps:$4 sm:$0xff]  }
  0xe8   :  { %5239 = vmatmul.mubr.bf16.vlgmr.msra.gmra.mxu0 %v7355_v13  ;;  %v7453_v13 = vld [vmem:[#allocation3 + $0xd04] ss:$16 sps:$4 sm:$0xff]  }
  0xe9   :  { %5282 = vmatmul.mubr.bf16.vlgmr.msra.gmra.mxu1 %v7358_v14  ;;  %5293 = vmatpush1.bf16.msra.mxu0 %v7361_v15  ;;  %v7456_v14 = vld [vmem:[#allocation3 + $0xf04] ss:$16 sps:$4 sm:$0xff]   ;;  %v7451_v15 = vld [vmem:[#allocation3 + $0xd00] ss:$16 sps:$4 sm:$0xff]  }
  0xea   :  { %5336 = vmatpush1.bf16.msra.mxu1 %v7364_v16  ;;  %5294 = vmatprep.subr.bf16.mxu0 %v7369_v17  ;;  %v7454_v16 = vld [vmem:[#allocation3 + $0xf00] ss:$16 sps:$4 sm:$0xff]  }
  0xeb   :  { %5337 = vmatprep.subr.bf16.mxu1 %v7372_v18  ;;  %5324 = vmatprep.mubr.bf16.mxu0 %v7459_v19  ;;  %v886_v17 = vld [vmem:[#allocation5] sm:$0xf]  ;;  %v890_v18 = vsub.s32 0, %v8473_v12  ;;  %v7465_v19 = vld [vmem:[#allocation3 + $0x10e4] ss:$16 sps:$4 sm:$0xff]  }
  0xec   :  { %5367 = vmatprep.mubr.bf16.mxu1 %v7462_v20  ;;  %v7468_v20 = vld [vmem:[#allocation3 + $0x12e4] ss:$16 sps:$4 sm:$0xff]  }
  0xed   :  { %5295 = vmatpush1.bf16.msra.mxu0 %v7367_v21  ;;  %v7457_v21 = vld [vmem:[%s8682_s0 + $0x30] ss:$100 sps:$4 sm:$0xff]  }
  0xee   :  { %5338 = vmatpush1.bf16.msra.mxu1 %v7370_v22  ;;  %5296 = vmatprep.subr.bf16.mxu0 %v7375_v23  ;;  %v7460_v22 = vld [vmem:[%s8682_s0 + $0x38] ss:$100 sps:$4 sm:$0xff]   ;;  %v894_v23 = vsub.s32 1, %v8473_v12 }
  0xef   :  { %5339 = vmatprep.subr.bf16.mxu1 %v7378_v24  ;;  %v7463_v24 = vld [vmem:[#allocation3 + $0x10e0] ss:$16 sps:$4 sm:$0xff]  }
  0xf1   :  { %5297 = vmatpush1.bf16.msra.mxu0 %v7373_v25  ;;  %v891_v25 = vrot.slane %v886_v17, %v890_v18 }
  0xf2   :  { %5340 = vmatpush1.bf16.msra.mxu1 %v7376_v26  ;;  %5298 = vmatprep.subr.bf16.mxu0 %v7381_v27  ;;  %v7466_v26 = vld [vmem:[#allocation3 + $0x12e0] ss:$16 sps:$4 sm:$0xff]   ;;  %v7471_v27 = vld [vmem:[#allocation3 + $0x10c4] ss:$16 sps:$4 sm:$0xff]  }
  0xf3   :  { %5341 = vmatprep.subr.bf16.mxu1 %v7384_v28  ;;  %v7474_v28 = vld [vmem:[#allocation3 + $0x12c4] ss:$16 sps:$4 sm:$0xff]  }
  0xf5   :  { %5299 = vmatpush1.bf16.msra.mxu0 %v7379_v29  ;;  %v895_v29 = vrot.slane %v886_v17, %v894_v23  ;;  %v7517_v17 = vld [vmem:[#allocation3 + $0x11c0] ss:$16 sps:$4 sm:$0xff]  }
  0xf6   :  { %5342 = vmatpush1.bf16.msra.mxu1 %v7382_v30  ;;  %5300 = vmatprep.subr.bf16.mxu0 %v7387_v31  ;;  %v7561_v30 = vld [vmem:[%s8682_s0 + $0x44] ss:$100 sps:$4 sm:$0xff]   ;;  %v7564_v31 = vld [vmem:[%s8682_s0 + $0x4c] ss:$100 sps:$4 sm:$0xff]  }
  0xf7   :  { %5343 = vmatprep.subr.bf16.mxu1 %v7390_v32 }
  0xf9   :  { %5301 = vmatpush1.bf16.msra.mxu0 %v7385_v33 }
  0xfa   :  { %5344 = vmatpush1.bf16.msra.mxu1 %v7388_v34  ;;  %5302 = vmatprep.subr.bf16.mxu0 %v7393_v35  ;;  %v7469_v34 = vld [vmem:[#allocation3 + $0x10c0] ss:$16 sps:$4 sm:$0xff]  }
  0xfb   :  { %5345 = vmatprep.subr.bf16.mxu1 %v7396_v36  ;;  %v7472_v36 = vld [vmem:[#allocation3 + $0x12c0] ss:$16 sps:$4 sm:$0xff]  }
  0xfd   :  { %5303 = vmatpush1.bf16.msra.mxu0 %v7391_v37 }
  0xfe   :  { %5346 = vmatpush1.bf16.msra.mxu1 %v7394_v38  ;;  %5304 = vmatprep.subr.bf16.mxu0 %v7399_v39  ;;  %v7477_v39 = vld [vmem:[#allocation3 + $0x10a4] ss:$16 sps:$4 sm:$0xff]  }
  0xff   :  { %5347 = vmatprep.subr.bf16.mxu1 %v7402_v40  ;;  %v7480_v40 = vld [vmem:[#allocation3 + $0x12a4] ss:$16 sps:$4 sm:$0xff]  }
 0x101   :  { %5305 = vmatpush1.bf16.msra.mxu0 %v7397_v41 }
 0x102   :  { %5348 = vmatpush1.bf16.msra.mxu1 %v7400_v42  ;;  %5306 = vmatprep.subr.bf16.mxu0 %v7405_v43 }
 0x103   :  { %5349 = vmatprep.subr.bf16.mxu1 %v7408_v44 }
 0x105   :  { %5307 = vmatpush1.bf16.msra.mxu0 %v7403_v45  ;;  %v7475_v45 = vld [vmem:[#allocation3 + $0x10a0] ss:$16 sps:$4 sm:$0xff]  }
 0x106   :  { %5350 = vmatpush1.bf16.msra.mxu1 %v7406_v46  ;;  %5308 = vmatprep.subr.bf16.mxu0 %v7411_v47 }
 0x107   :  { %5351 = vmatprep.subr.bf16.mxu1 %v7414_v48  ;;  %v7478_v48 = vld [vmem:[#allocation3 + $0x12a0] ss:$16 sps:$4 sm:$0xff]  }
 0x109   :  { %5309 = vmatpush2.bf16.msra.mxu0 %v7409_v49 }
 0x10a   :  { %5352 = vmatpush2.bf16.msra.mxu1 %v7412_v50  ;;  %5310 = vmatprep.subr.bf16.mxu0 %v7417_v51  ;;  %v7483_v50 = vld [vmem:[#allocation3 + $0x1084] ss:$16 sps:$4 sm:$0xff]  }
 0x10b   :  { %5353 = vmatprep.subr.bf16.mxu1 %v7420_v52  ;;  %v7486_v51 = vld [vmem:[#allocation3 + $0x1284] ss:$16 sps:$4 sm:$0xff]  }
 0x10d   :  { %5311 = vmatpush2.bf16.msra.mxu0 %v7415_v53 }
 0x10e   :  { %5354 = vmatpush2.bf16.msra.mxu1 %v7418_v54  ;;  %5312 = vmatprep.subr.bf16.mxu0 %v7423_v55  ;;  %v7481_v55 = vld [vmem:[#allocation3 + $0x1080] ss:$16 sps:$4 sm:$0xff]  }
 0x10f   :  { %5355 = vmatprep.subr.bf16.mxu1 %v7426_v56 }
 0x111   :  { %5313 = vmatpush2.bf16.msra.mxu0 %v7421_v57  ;;  %v7484_v57 = vld [vmem:[#allocation3 + $0x1280] ss:$16 sps:$4 sm:$0xff]  }
 0x112   :  { %5356 = vmatpush2.bf16.msra.mxu1 %v7424_v58  ;;  %5314 = vmatprep.subr.bf16.mxu0 %v7429_v59  ;;  %v7489_v58 = vld [vmem:[#allocation3 + $0x1064] ss:$16 sps:$4 sm:$0xff]  }
 0x113   :  { %5357 = vmatprep.subr.bf16.mxu1 %v7432_v60  ;;  %v7492_v59 = vld [vmem:[#allocation3 + $0x1264] ss:$16 sps:$4 sm:$0xff]   ;;  %v7487_v60 = vld [vmem:[#allocation3 + $0x1060] ss:$16 sps:$4 sm:$0xff]  }
 0x115   :  { %5315 = vmatpush2.bf16.msra.mxu0 %v7427_v61  ;;  %v7490_v61 = vld [vmem:[#allocation3 + $0x1260] ss:$16 sps:$4 sm:$0xff]  }
 0x116   :  { %5358 = vmatpush2.bf16.msra.mxu1 %v7430_v62  ;;  %5316 = vmatprep.subr.bf16.mxu0 %v7435_v63  ;;  %v7495_v62 = vld [vmem:[#allocation3 + $0x1044] ss:$16 sps:$4 sm:$0xff]  }
 0x117   :  { %5359 = vmatprep.subr.bf16.mxu1 %v7438_v0  ;;  %v7498_v63 = vld [vmem:[#allocation3 + $0x1244] ss:$16 sps:$4 sm:$0xff]   ;;  %v7493_v0 = vld [vmem:[#allocation3 + $0x1040] ss:$16 sps:$4 sm:$0xff]  }
 0x119   :  { %5317 = vmatpush2.bf16.msra.mxu0 %v7433_v1  ;;  %v7496_v1 = vld [vmem:[#allocation3 + $0x1240] ss:$16 sps:$4 sm:$0xff]  }
 0x11a   :  { %5360 = vmatpush2.bf16.msra.mxu1 %v7436_v2  ;;  %5318 = vmatprep.subr.bf16.mxu0 %v7441_v3  ;;  %v7501_v2 = vld [vmem:[#allocation3 + $0x1024] ss:$16 sps:$4 sm:$0xff]  }
 0x11b   :  { %5361 = vmatprep.subr.bf16.mxu1 %v7444_v4  ;;  %v7504_v3 = vld [vmem:[#allocation3 + $0x1224] ss:$16 sps:$4 sm:$0xff]   ;;  %v7499_v4 = vld [vmem:[#allocation3 + $0x1020] ss:$16 sps:$4 sm:$0xff]  }
 0x11d   :  { %5319 = vmatpush2.bf16.msra.mxu0 %v7439_v5  ;;  %v7502_v5 = vld [vmem:[#allocation3 + $0x1220] ss:$16 sps:$4 sm:$0xff]  }
 0x11e   :  { %5362 = vmatpush2.bf16.msra.mxu1 %v7442_v6  ;;  %5320 = vmatprep.subr.bf16.mxu0 %v7447_v8  ;;  %v7507_v6 = vld [vmem:[#allocation3 + $0x1004] ss:$16 sps:$4 sm:$0xff]   ;;  %v7505_v8 = vld [vmem:[#allocation3 + $0x1000] ss:$16 sps:$4 sm:$0xff]  }
 0x11f   :  { %5363 = vmatprep.subr.bf16.mxu1 %v7450_v9  ;;  %v7508_v9 = vld [vmem:[#allocation3 + $0x1200] ss:$16 sps:$4 sm:$0xff]  }
 0x121   :  { %5321 = vmatpush2.bf16.msra.mxu0 %v7445_v10  ;;  %v7513_v10 = vld [vmem:[#allocation3 + $0x11e4] ss:$16 sps:$4 sm:$0xff]  }
 0x122   :  { %5364 = vmatpush2.bf16.msra.mxu1 %v7448_v11  ;;  %5322 = vmatprep.subr.bf16.mxu0 %v7453_v13  ;;  %v7516_v11 = vld [vmem:[#allocation3 + $0x13e4] ss:$16 sps:$4 sm:$0xff]   ;;  %v7511_v13 = vld [vmem:[#allocation3 + $0x11e0] ss:$16 sps:$4 sm:$0xff]  }
 0x123   :  { %5365 = vmatprep.subr.bf16.mxu1 %v7456_v14  ;;  %v7514_v14 = vld [vmem:[#allocation3 + $0x13e0] ss:$16 sps:$4 sm:$0xff]  }
 0x125   :  { %5323 = vmatpush2.bf16.msra.mxu0 %v7451_v15  ;;  %v7519_v15 = vld [vmem:[#allocation3 + $0x11c4] ss:$16 sps:$4 sm:$0xff]  }
 0x126   :  { %5366 = vmatpush2.bf16.msra.mxu1 %v7454_v16  ;;  %5378 = vmatprep.subr.bf16.mxu0 %v7465_v19  ;;  %v7522_v16 = vld [vmem:[#allocation3 + $0x13c4] ss:$16 sps:$4 sm:$0xff]   ;;  %v7520_v19 = vld [vmem:[#allocation3 + $0x13c0] ss:$16 sps:$4 sm:$0xff]  }
 0x127   :  { %5421 = vmatprep.subr.bf16.mxu1 %v7468_v20  ;;  %v7525_v20 = vld [vmem:[#allocation3 + $0x11a4] ss:$16 sps:$4 sm:$0xff]  }
 0x128   :  { %v5068_v32 = vpop.f32.mrf.mxu0  ;;  %5325 = vmatmul.mubr.bf16.vlgmr.msra.gmra.mxu0 %v7457_v21  ;;  %v7528_v21 = vld [vmem:[#allocation3 + $0x13a4] ss:$16 sps:$4 sm:$0xff]  }
 0x129   :  { %v5111_v33 = vpop.f32.mrf.mxu1  ;;  %5368 = vmatmul.mubr.bf16.vlgmr.msra.gmra.mxu1 %v7460_v22  ;;  %v5069_v35 = vadd.f32 %v5068_v32, %v891_v25  ;;  %5379 = vmatpush1.bf16.msra.mxu0 %v7463_v24  ;;  %v7523_v22 = vld [vmem:[#allocation3 + $0x11a0] ss:$16 sps:$4 sm:$0xff]  }
 0x12a   :  { %5422 = vmatpush1.bf16.msra.mxu1 %v7466_v26  ;;  %v5070_v37 = vpop.f32.mrf.mxu0  ;;  %5380 = vmatprep.subr.bf16.mxu0 %v7471_v27  ;;  %v7526_v24 = vld [vmem:[#allocation3 + $0x13a0] ss:$16 sps:$4 sm:$0xff]   ;;  %v7534_v26 = vld [vmem:[#allocation3 + $0x1384] ss:$16 sps:$4 sm:$0xff]  }
 0x12b   :  { %v5113_v38 = vpop.f32.mrf.mxu1  ;;  %5423 = vmatprep.subr.bf16.mxu1 %v7474_v28  ;;  %v8493_v41 = vadd.f32 %v5111_v33, %v5069_v35  ;;  %v5071_v42 = vadd.f32 %v5070_v37, %v895_v29  ;;  %5410 = vmatprep.mubr.bf16.mxu0 %v7561_v30  ;;  %v7529_v27 = vld [vmem:[#allocation3 + $0x1180] ss:$16 sps:$4 sm:$0xff]   ;;  %v7540_v30 = vld [vmem:[#allocation3 + $0x1364] ss:$16 sps:$4 sm:$0xff]  }
 0x12c   :  { %5453 = vmatprep.mubr.bf16.mxu1 %v7564_v31  ;;  %v5072_v43 = vpop.f32.mrf.mxu0  ;;  %v7532_v28 = vld [vmem:[#allocation3 + $0x1380] ss:$16 sps:$4 sm:$0xff]   ;;  %v7543_v33 = vld [vmem:[#allocation3 + $0x1144] ss:$16 sps:$4 sm:$0xff]  }
 0x12d   :  { %v5115_v44 = vpop.f32.mrf.mxu1  ;;  %v8495_v46 = vadd.f32 %v5113_v38, %v5071_v42  ;;  %v5073_v47 = vadd.f32 %v5072_v43, %v891_v25  ;;  %5381 = vmatpush1.bf16.msra.mxu0 %v7469_v34  ;;  %v7531_v25 = vld [vmem:[#allocation3 + $0x1184] ss:$16 sps:$4 sm:$0xff]   ;;  %v7535_v31 = vld [vmem:[#allocation3 + $0x1160] ss:$16 sps:$4 sm:$0xff]  }
 0x12e   :  { %5424 = vmatpush1.bf16.msra.mxu1 %v7472_v36  ;;  %v5074_v49 = vpop.f32.mrf.mxu0  ;;  %5382 = vmatprep.subr.bf16.mxu0 %v7477_v39  ;;  %v7538_v32 = vld [vmem:[#allocation3 + $0x1360] ss:$16 sps:$4 sm:$0xff]   ;;  %v7546_v34 = vld [vmem:[#allocation3 + $0x1344] ss:$16 sps:$4 sm:$0xff]  }
 0x12f   :  { %5425 = vmatprep.subr.bf16.mxu1 %v7480_v40  ;;  %v8497_v52 = vadd.f32 %v5115_v44, %v5073_v47  ;;  %v5075_v53 = vadd.f32 %v5074_v49, %v895_v29  ;;  %v5117_v54 = vpop.f32.mrf.mxu1  ;;  %v7537_v29 = vld [vmem:[#allocation3 + $0x1164] ss:$16 sps:$4 sm:$0xff]   ;;  %v7541_v35 = vld [vmem:[#allocation3 + $0x1140] ss:$16 sps:$4 sm:$0xff]  }
 0x130   :  { %v7544_v36 = vld [vmem:[#allocation3 + $0x1340] ss:$16 sps:$4 sm:$0xff]   ;;  %v7549_v37 = vld [vmem:[#allocation3 + $0x1124] ss:$16 sps:$4 sm:$0xff]  }
 0x131   :  { %v8499_v56 = vadd.f32 %v5117_v54, %v5075_v53  ;;  %5383 = vmatpush1.bf16.msra.mxu0 %v7475_v45  ;;  %v7552_v38 = vld [vmem:[#allocation3 + $0x1324] ss:$16 sps:$4 sm:$0xff]   ;;  %v7547_v39 = vld [vmem:[#allocation3 + $0x1120] ss:$16 sps:$4 sm:$0xff]  }
 0x132   :  { %5426 = vmatpush1.bf16.msra.mxu1 %v7478_v48  ;;  %5384 = vmatprep.subr.bf16.mxu0 %v7483_v50  ;;  %v7550_v40 = vld [vmem:[#allocation3 + $0x1320] ss:$16 sps:$4 sm:$0xff]   ;;  %v7555_v42 = vld [vmem:[#allocation3 + $0x1104] ss:$16 sps:$4 sm:$0xff]  }
 0x133   :  { %5427 = vmatprep.subr.bf16.mxu1 %v7486_v51  ;;  %v7558_v43 = vld [vmem:[#allocation3 + $0x1304] ss:$16 sps:$4 sm:$0xff]   ;;  %v7553_v44 = vld [vmem:[#allocation3 + $0x1100] ss:$16 sps:$4 sm:$0xff]  }
 0x134   :  { %v7556_v45 = vld [vmem:[#allocation3 + $0x1300] ss:$16 sps:$4 sm:$0xff]   ;;  %v7562_v48 = vld [vmem:[%s8682_s0 + $0x48] ss:$100 sps:$4 sm:$0xff]  }
 0x135   :  { %5385 = vmatpush1.bf16.msra.mxu0 %v7481_v55  ;;  %v7559_v47 = vld [vmem:[%s8682_s0 + $0x40] ss:$100 sps:$4 sm:$0xff]  }
 0x136   :  { %5428 = vmatpush1.bf16.msra.mxu1 %v7484_v57  ;;  %5386 = vmatprep.subr.bf16.mxu0 %v7489_v58  ;;  %v7567_v49 = vld [vmem:[#allocation3 + $0x14e4] ss:$16 sps:$4 sm:$0xff]   ;;  %v7565_v51 = vld [vmem:[#allocation3 + $0x14e0] ss:$16 sps:$4 sm:$0xff]  }
 0x137   :  { %5429 = vmatprep.subr.bf16.mxu1 %v7492_v59  ;;  %v7570_v50 = vld [vmem:[#allocation3 + $0x16e4] ss:$16 sps:$4 sm:$0xff]   ;;  %v7568_v53 = vld [vmem:[#allocation3 + $0x16e0] ss:$16 sps:$4 sm:$0xff]  }
 0x138   :  { %v7573_v54 = vld [vmem:[#allocation3 + $0x14c4] ss:$16 sps:$4 sm:$0xff]   ;;  %v7571_v57 = vld [vmem:[#allocation3 + $0x14c0] ss:$16 sps:$4 sm:$0xff]  }
 0x139   :  { %5387 = vmatpush1.bf16.msra.mxu0 %v7487_v60  ;;  %v7576_v55 = vld [vmem:[#allocation3 + $0x16c4] ss:$16 sps:$4 sm:$0xff]   ;;  %v7574_v58 = vld [vmem:[#allocation3 + $0x16c0] ss:$16 sps:$4 sm:$0xff]  }
 0x13a   :  { %5430 = vmatpush1.bf16.msra.mxu1 %v7490_v61  ;;  %5388 = vmatprep.subr.bf16.mxu0 %v7495_v62  ;;  %v7663_v59 = vld [vmem:[%s8682_s0 + $0x54] ss:$100 sps:$4 sm:$0xff]   ;;  %v7666_v60 = vld [vmem:[%s8682_s0 + $0x5c] ss:$100 sps:$4 sm:$0xff]  }
 0x13b   :  { %5431 = vmatprep.subr.bf16.mxu1 %v7498_v63 }
 0x13d   :  { %5389 = vmatpush1.bf16.msra.mxu0 %v7493_v0 }
 0x13e   :  { %5432 = vmatpush1.bf16.msra.mxu1 %v7496_v1  ;;  %5390 = vmatprep.subr.bf16.mxu0 %v7501_v2  ;;  %v7579_v2 = vld [vmem:[#allocation3 + $0x14a4] ss:$16 sps:$4 sm:$0xff]  }
 0x13f   :  { %5433 = vmatprep.subr.bf16.mxu1 %v7504_v3  ;;  %v7582_v3 = vld [vmem:[#allocation3 + $0x16a4] ss:$16 sps:$4 sm:$0xff]  }
 0x141   :  { %5391 = vmatpush1.bf16.msra.mxu0 %v7499_v4 }
 0x142   :  { %5434 = vmatpush1.bf16.msra.mxu1 %v7502_v5  ;;  %5392 = vmatprep.subr.bf16.mxu0 %v7507_v6  ;;  %v7577_v6 = vld [vmem:[#allocation3 + $0x14a0] ss:$16 sps:$4 sm:$0xff]  }
 0x143   :  { %5435 = vmatprep.subr.bf16.mxu1 %v7510_v7  ;;  %v7580_v7 = vld [vmem:[#allocation3 + $0x16a0] ss:$16 sps:$4 sm:$0xff]  }
 0x145   :  { %5393 = vmatpush1.bf16.msra.mxu0 %v7505_v8 }
 0x146   :  { %5436 = vmatpush1.bf16.msra.mxu1 %v7508_v9  ;;  %5394 = vmatprep.subr.bf16.mxu0 %v7513_v10 }
 0x147   :  { %5437 = vmatprep.subr.bf16.mxu1 %v7516_v11 }
 0x149   :  { %5395 = vmatpush2.bf16.msra.mxu0 %v7511_v13  ;;  %v7585_v13 = vld [vmem:[#allocation3 + $0x1484] ss:$16 sps:$4 sm:$0xff]  }
 0x14a   :  { %5438 = vmatpush2.bf16.msra.mxu1 %v7514_v14  ;;  %5396 = vmatprep.subr.bf16.mxu0 %v7519_v15  ;;  %v7588_v14 = vld [vmem:[#allocation3 + $0x1684] ss:$16 sps:$4 sm:$0xff]  }
 0x14b   :  { %5439 = vmatprep.subr.bf16.mxu1 %v7522_v16 }
 0x14d   :  { %5397 = vmatpush2.bf16.msra.mxu0 %v7517_v17 }
 0x14e   :  { %5440 = vmatpush2.bf16.msra.mxu1 %v7520_v19  ;;  %5398 = vmatprep.subr.bf16.mxu0 %v7525_v20  ;;  %v7583_v19 = vld [vmem:[#allocation3 + $0x1480] ss:$16 sps:$4 sm:$0xff]  }
 0x14f   :  { %5441 = vmatprep.subr.bf16.mxu1 %v7528_v21  ;;  %v7586_v20 = vld [vmem:[#allocation3 + $0x1680] ss:$16 sps:$4 sm:$0xff]   ;;  %v7594_v21 = vld [vmem:[#allocation3 + $0x1664] ss:$16 sps:$4 sm:$0xff]  }
 0x151   :  { %5399 = vmatpush2.bf16.msra.mxu0 %v7523_v22  ;;  %v7589_v22 = vld [vmem:[#allocation3 + $0x1460] ss:$16 sps:$4 sm:$0xff]  }
 0x152   :  { %5442 = vmatpush2.bf16.msra.mxu1 %v7526_v24  ;;  %5400 = vmatprep.subr.bf16.mxu0 %v7531_v25  ;;  %v7592_v24 = vld [vmem:[#allocation3 + $0x1660] ss:$16 sps:$4 sm:$0xff]   ;;  %v7597_v25 = vld [vmem:[#allocation3 + $0x1444] ss:$16 sps:$4 sm:$0xff]  }
 0x153   :  { %5443 = vmatprep.subr.bf16.mxu1 %v7534_v26  ;;  %v7600_v26 = vld [vmem:[#allocation3 + $0x1644] ss:$16 sps:$4 sm:$0xff]  }
 0x155   :  { %5401 = vmatpush2.bf16.msra.mxu0 %v7529_v27  ;;  %v7598_v27 = vld [vmem:[#allocation3 + $0x1640] ss:$16 sps:$4 sm:$0xff]  }
 0x156   :  { %5444 = vmatpush2.bf16.msra.mxu1 %v7532_v28  ;;  %5402 = vmatprep.subr.bf16.mxu0 %v7537_v29  ;;  %v7603_v28 = vld [vmem:[#allocation3 + $0x1424] ss:$16 sps:$4 sm:$0xff]  }
 0x157   :  { %5445 = vmatprep.subr.bf16.mxu1 %v7540_v30  ;;  %v7606_v29 = vld [vmem:[#allocation3 + $0x1624] ss:$16 sps:$4 sm:$0xff]   ;;  %v7601_v30 = vld [vmem:[#allocation3 + $0x1420] ss:$16 sps:$4 sm:$0xff]  }
 0x159   :  { %5403 = vmatpush2.bf16.msra.mxu0 %v7535_v31  ;;  %v7604_v31 = vld [vmem:[#allocation3 + $0x1620] ss:$16 sps:$4 sm:$0xff]  }
 0x15a   :  { %5446 = vmatpush2.bf16.msra.mxu1 %v7538_v32  ;;  %5404 = vmatprep.subr.bf16.mxu0 %v7543_v33  ;;  %v7609_v32 = vld [vmem:[#allocation3 + $0x1404] ss:$16 sps:$4 sm:$0xff]  }
 0x15b   :  { %5447 = vmatprep.subr.bf16.mxu1 %v7546_v34  ;;  %v7612_v33 = vld [vmem:[#allocation3 + $0x1604] ss:$16 sps:$4 sm:$0xff]   ;;  %v7607_v34 = vld [vmem:[#allocation3 + $0x1400] ss:$16 sps:$4 sm:$0xff]  }
 0x15d   :  { %5405 = vmatpush2.bf16.msra.mxu0 %v7541_v35  ;;  %v7610_v35 = vld [vmem:[#allocation3 + $0x1600] ss:$16 sps:$4 sm:$0xff]  }
 0x15e   :  { %5448 = vmatpush2.bf16.msra.mxu1 %v7544_v36  ;;  %5406 = vmatprep.subr.bf16.mxu0 %v7549_v37  ;;  %v7615_v36 = vld [vmem:[#allocation3 + $0x15e4] ss:$16 sps:$4 sm:$0xff]  }
 0x15f   :  { %5449 = vmatprep.subr.bf16.mxu1 %v7552_v38  ;;  %v7618_v37 = vld [vmem:[#allocation3 + $0x17e4] ss:$16 sps:$4 sm:$0xff]   ;;  %v7613_v38 = vld [vmem:[#allocation3 + $0x15e0] ss:$16 sps:$4 sm:$0xff]  }
 0x161   :  { %5407 = vmatpush2.bf16.msra.mxu0 %v7547_v39  ;;  %v7616_v39 = vld [vmem:[#allocation3 + $0x17e0] ss:$16 sps:$4 sm:$0xff]  }
 0x162   :  { %5450 = vmatpush2.bf16.msra.mxu1 %v7550_v40  ;;  %5408 = vmatprep.subr.bf16.mxu0 %v7555_v42  ;;  %v7621_v40 = vld [vmem:[#allocation3 + $0x15c4] ss:$16 sps:$4 sm:$0xff]  }
 0x163   :  { %5451 = vmatprep.subr.bf16.mxu1 %v7558_v43  ;;  %v7624_v42 = vld [vmem:[#allocation3 + $0x17c4] ss:$16 sps:$4 sm:$0xff]   ;;  %v7619_v43 = vld [vmem:[#allocation3 + $0x15c0] ss:$16 sps:$4 sm:$0xff]  }
 0x165   :  { %5409 = vmatpush2.bf16.msra.mxu0 %v7553_v44  ;;  %v7622_v44 = vld [vmem:[#allocation3 + $0x17c0] ss:$16 sps:$4 sm:$0xff]  }
 0x166   :  { %5452 = vmatpush2.bf16.msra.mxu1 %v7556_v45  ;;  %5464 = vmatprep.subr.bf16.mxu0 %v7567_v49  ;;  %v7627_v45 = vld [vmem:[#allocation3 + $0x15a4] ss:$16 sps:$4 sm:$0xff]   ;;  %v7628_v49 = vld [vmem:[#allocation3 + $0x17a0] ss:$16 sps:$4 sm:$0xff]  }
 0x167   :  { %5507 = vmatprep.subr.bf16.mxu1 %v7570_v50  ;;  %v7633_v50 = vld [vmem:[#allocation3 + $0x1584] ss:$16 sps:$4 sm:$0xff]  }
 0x168   :  { %v5154_v61 = vpop.f32.mrf.mxu0  ;;  %5411 = vmatmul.mubr.bf16.vlgmr.msra.gmra.mxu0 %v7559_v47  ;;  %v7630_v47 = vld [vmem:[#allocation3 + $0x17a4] ss:$16 sps:$4 sm:$0xff]  }
 0x169   :  { %v5197_v62 = vpop.f32.mrf.mxu1  ;;  %5454 = vmatmul.mubr.bf16.vlgmr.msra.gmra.mxu1 %v7562_v48  ;;  %v5155_v63 = vadd.f32 %v5154_v61, %v8493_v41  ;;  %5465 = vmatpush1.bf16.msra.mxu0 %v7565_v51  ;;  %v7625_v48 = vld [vmem:[#allocation3 + $0x15a0] ss:$16 sps:$4 sm:$0xff]   ;;  %v7636_v51 = vld [vmem:[#allocation3 + $0x1784] ss:$16 sps:$4 sm:$0xff]  }
 0x16a   :  { %5508 = vmatpush1.bf16.msra.mxu1 %v7568_v53  ;;  %v5156_v0 = vpop.f32.mrf.mxu0  ;;  %5466 = vmatprep.subr.bf16.mxu0 %v7573_v54  ;;  %v7631_v53 = vld [vmem:[#allocation3 + $0x1580] ss:$16 sps:$4 sm:$0xff]   ;;  %v7648_v61 = vld [vmem:[#allocation3 + $0x1744] ss:$16 sps:$4 sm:$0xff]  }
 0x16b   :  { %v5199_v1 = vpop.f32.mrf.mxu1  ;;  %5509 = vmatprep.subr.bf16.mxu1 %v7576_v55  ;;  %v8514_v4 = vadd.f32 %v5197_v62, %v5155_v63  ;;  %v5157_v5 = vadd.f32 %v5156_v0, %v8495_v46  ;;  %5496 = vmatprep.mubr.bf16.mxu0 %v7663_v59  ;;  %v7634_v54 = vld [vmem:[#allocation3 + $0x1780] ss:$16 sps:$4 sm:$0xff]   ;;  %v7639_v55 = vld [vmem:[#allocation3 + $0x1564] ss:$16 sps:$4 sm:$0xff]  }
 0x16c   :  { %5539 = vmatprep.mubr.bf16.mxu1 %v7666_v60  ;;  %v5158_v8 = vpop.f32.mrf.mxu0  ;;  %v7640_v59 = vld [vmem:[#allocation3 + $0x1760] ss:$16 sps:$4 sm:$0xff]   ;;  %v7645_v60 = vld [vmem:[#allocation3 + $0x1544] ss:$16 sps:$4 sm:$0xff]  }
 0x16d   :  { %v5201_v9 = vpop.f32.mrf.mxu1  ;;  %v8517_v10 = vadd.f32 %v5199_v1, %v5157_v5  ;;  %v5159_v41 = vadd.f32 %v5158_v8, %v8497_v52  ;;  %5467 = vmatpush1.bf16.msra.mxu0 %v7571_v57  ;;  %v7591_v52 = vld [vmem:[#allocation3 + $0x1464] ss:$16 sps:$4 sm:$0xff]   ;;  %v7643_v62 = vld [vmem:[#allocation3 + $0x1540] ss:$16 sps:$4 sm:$0xff]  }
 0x16e   :  { %5510 = vmatpush1.bf16.msra.mxu1 %v7574_v58  ;;  %v5160_v11 = vpop.f32.mrf.mxu0  ;;  %5468 = vmatprep.subr.bf16.mxu0 %v7579_v2  ;;  %v7642_v57 = vld [vmem:[#allocation3 + $0x1764] ss:$16 sps:$4 sm:$0xff]   ;;  %v7637_v58 = vld [vmem:[#allocation3 + $0x1560] ss:$16 sps:$4 sm:$0xff]  }
 0x16f   :  { %5511 = vmatprep.subr.bf16.mxu1 %v7582_v3  ;;  %v8520_v15 = vadd.f32 %v5201_v9, %v5159_v41  ;;  %v5161_v46 = vadd.f32 %v5160_v11, %v8499_v56  ;;  %v5203_v16 = vpop.f32.mrf.mxu1  ;;  %v7595_v56 = vld [vmem:[#allocation3 + $0x1440] ss:$16 sps:$4 sm:$0xff]   ;;  %v7651_v0 = vld [vmem:[#allocation3 + $0x1524] ss:$16 sps:$4 sm:$0xff]  }
 0x170   :  { %v7646_v63 = vld [vmem:[#allocation3 + $0x1740] ss:$16 sps:$4 sm:$0xff]   ;;  %v7654_v1 = vld [vmem:[#allocation3 + $0x1724] ss:$16 sps:$4 sm:$0xff]  }
 0x171   :  { %v8523_v17 = vadd.f32 %v5203_v16, %v5161_v46  ;;  %5469 = vmatpush1.bf16.msra.mxu0 %v7577_v6  ;;  %v7649_v2 = vld [vmem:[#allocation3 + $0x1520] ss:$16 sps:$4 sm:$0xff]   ;;  %v7657_v5 = vld [vmem:[#allocation3 + $0x1504] ss:$16 sps:$4 sm:$0xff]   ;;  %v7670_v46 = vld [vmem:[#allocation3 + $0xe8] ss:$16 sps:$4 sm:$0xff]  }
 0x172   :  { %5512 = vmatpush1.bf16.msra.mxu1 %v7580_v7  ;;  %5470 = vmatprep.subr.bf16.mxu0 %v7585_v13  ;;  %v7652_v3 = vld [vmem:[#allocation3 + $0x1720] ss:$16 sps:$4 sm:$0xff]   ;;  %v7660_v6 = vld [vmem:[#allocation3 + $0x1704] ss:$16 sps:$4 sm:$0xff]   ;;  %v7672_v13 = vld [vmem:[#allocation3 + $0xec] ss:$16 sps:$4 sm:$0xff]  }
 0x173   :  { %5513 = vmatprep.subr.bf16.mxu1 %v7588_v14  ;;  %v7655_v7 = vld [vmem:[#allocation3 + $0x1500] ss:$16 sps:$4 sm:$0xff]   ;;  %v7664_v41 = vld [vmem:[%s8682_s0 + $0x58] ss:$100 sps:$4 sm:$0xff]  }
 0x174   :  { %v7658_v8 = vld [vmem:[#allocation3 + $0x1700] ss:$16 sps:$4 sm:$0xff]   ;;  %v7669_v11 = vld [vmem:[#allocation3 + $0x18e4] ss:$16 sps:$4 sm:$0xff]  }
 0x175   :  { %5471 = vmatpush1.bf16.msra.mxu0 %v7583_v19  ;;  %v7661_v9 = vld [vmem:[%s8682_s0 + $0x50] ss:$100 sps:$4 sm:$0xff]  }
 0x176   :  { %5514 = vmatpush1.bf16.msra.mxu1 %v7586_v20  ;;  %5472 = vmatprep.subr.bf16.mxu0 %v7591_v52  ;;  %v7667_v14 = vld [vmem:[#allocation3 + $0x18e0] ss:$16 sps:$4 sm:$0xff]   ;;  %v7675_v16 = vld [vmem:[#allocation3 + $0x18c4] ss:$16 sps:$4 sm:$0xff]   ;;  %v7678_v19 = vld [vmem:[#allocation3 + $0xcc] ss:$16 sps:$4 sm:$0xff]  }
 0x177   :  { %5515 = vmatprep.subr.bf16.mxu1 %v7594_v21  ;;  %v7673_v20 = vld [vmem:[#allocation3 + $0x18c0] ss:$16 sps:$4 sm:$0xff]   ;;  %v7676_v52 = vld [vmem:[#allocation3 + $0xc8] ss:$16 sps:$4 sm:$0xff]  }
 0x179   :  { %5473 = vmatpush1.bf16.msra.mxu0 %v7589_v22 }
 0x17a   :  { %5516 = vmatpush1.bf16.msra.mxu1 %v7592_v24  ;;  %5474 = vmatprep.subr.bf16.mxu0 %v7597_v25 }
 0x17b   :  { %5517 = vmatprep.subr.bf16.mxu1 %v7600_v26 }
 0x17d   :  { %5475 = vmatpush1.bf16.msra.mxu0 %v7595_v56  ;;  %v7681_v56 = vld [vmem:[#allocation3 + $0x18a4] ss:$16 sps:$4 sm:$0xff]  }
 0x17e   :  { %5518 = vmatpush1.bf16.msra.mxu1 %v7598_v27  ;;  %5476 = vmatprep.subr.bf16.mxu0 %v7603_v28  ;;  %v7684_v27 = vld [vmem:[#allocation3 + $0xac] ss:$16 sps:$4 sm:$0xff]  }
 0x17f   :  { %5519 = vmatprep.subr.bf16.mxu1 %v7606_v29  ;;  %v7679_v29 = vld [vmem:[#allocation3 + $0x18a0] ss:$16 sps:$4 sm:$0xff]  }
 0x181   :  { %5477 = vmatpush1.bf16.msra.mxu0 %v7601_v30  ;;  %v7682_v30 = vld [vmem:[#allocation3 + $0xa8] ss:$16 sps:$4 sm:$0xff]  }
 0x182   :  { %5520 = vmatpush1.bf16.msra.mxu1 %v7604_v31  ;;  %5478 = vmatprep.subr.bf16.mxu0 %v7609_v32  ;;  %v8388_v31 = vmov 0  }
 0x183   :  { %5521 = vmatprep.subr.bf16.mxu1 %v7612_v33 }
 0x185   :  { %5479 = vmatpush1.bf16.msra.mxu0 %v7607_v34 }
 0x186   :  { %5522 = vmatpush1.bf16.msra.mxu1 %v7610_v35  ;;  %5480 = vmatprep.subr.bf16.mxu0 %v7615_v36  ;;  %v7687_v35 = vld [vmem:[#allocation3 + $0x1884] ss:$16 sps:$4 sm:$0xff]   ;;  %v7690_v36 = vld [vmem:[#allocation3 + $0x8c] ss:$16 sps:$4 sm:$0xff]  }
 0x187   :  { %5523 = vmatprep.subr.bf16.mxu1 %v7618_v37 }
 0x189   :  { %5481 = vmatpush2.bf16.msra.mxu0 %v7613_v38  ;;  %v7685_v38 = vld [vmem:[#allocation3 + $0x1880] ss:$16 sps:$4 sm:$0xff]  }
 0x18a   :  { %5524 = vmatpush2.bf16.msra.mxu1 %v7616_v39  ;;  %5482 = vmatprep.subr.bf16.mxu0 %v7621_v40  ;;  %v7688_v39 = vld [vmem:[#allocation3 + $0x88] ss:$16 sps:$4 sm:$0xff]   ;;  %v7693_v40 = vld [vmem:[#allocation3 + $0x1864] ss:$16 sps:$4 sm:$0xff]  }
 0x18b   :  { %5525 = vmatprep.subr.bf16.mxu1 %v7624_v42  ;;  %v7696_v42 = vld [vmem:[#allocation3 + $0x6c] ss:$16 sps:$4 sm:$0xff]  }
 0x18d   :  { %5483 = vmatpush2.bf16.msra.mxu0 %v7619_v43  ;;  %v7694_v43 = vld [vmem:[#allocation3 + $0x68] ss:$16 sps:$4 sm:$0xff]  }
 0x18e   :  { %5526 = vmatpush2.bf16.msra.mxu1 %v7622_v44  ;;  %5484 = vmatprep.subr.bf16.mxu0 %v7627_v45  ;;  %v7699_v44 = vld [vmem:[#allocation3 + $0x1844] ss:$16 sps:$4 sm:$0xff]   ;;  %v7702_v45 = vld [vmem:[#allocation3 + $0x4c] ss:$16 sps:$4 sm:$0xff]  }
 0x18f   :  { %5527 = vmatprep.subr.bf16.mxu1 %v7630_v47  ;;  %v7697_v47 = vld [vmem:[#allocation3 + $0x1840] ss:$16 sps:$4 sm:$0xff]  }
 0x191   :  { %5485 = vmatpush2.bf16.msra.mxu0 %v7625_v48  ;;  %v7700_v48 = vld [vmem:[#allocation3 + $0x48] ss:$16 sps:$4 sm:$0xff]  }
 0x192   :  { %5528 = vmatpush2.bf16.msra.mxu1 %v7628_v49  ;;  %5486 = vmatprep.subr.bf16.mxu0 %v7633_v50  ;;  %v7705_v49 = vld [vmem:[#allocation3 + $0x1824] ss:$16 sps:$4 sm:$0xff]   ;;  %v7708_v50 = vld [vmem:[#allocation3 + $0x2c] ss:$16 sps:$4 sm:$0xff]  }
 0x193   :  { %5529 = vmatprep.subr.bf16.mxu1 %v7636_v51  ;;  %v7703_v51 = vld [vmem:[#allocation3 + $0x1820] ss:$16 sps:$4 sm:$0xff]  }
 0x195   :  { %5487 = vmatpush2.bf16.msra.mxu0 %v7631_v53  ;;  %v7706_v53 = vld [vmem:[#allocation3 + $0x28] ss:$16 sps:$4 sm:$0xff]  }
 0x196   :  { %5530 = vmatpush2.bf16.msra.mxu1 %v7634_v54  ;;  %5488 = vmatprep.subr.bf16.mxu0 %v7639_v55  ;;  %v7711_v54 = vld [vmem:[#allocation3 + $0x1804] ss:$16 sps:$4 sm:$0xff]   ;;  %v7714_v55 = vld [vmem:[#allocation3 + $0xc] ss:$16 sps:$4 sm:$0xff]  }
 0x197   :  { %5531 = vmatprep.subr.bf16.mxu1 %v7642_v57  ;;  %v7709_v57 = vld [vmem:[#allocation3 + $0x1800] ss:$16 sps:$4 sm:$0xff]  }
 0x199   :  { %5489 = vmatpush2.bf16.msra.mxu0 %v7637_v58  ;;  %v7712_v58 = vld [vmem:[#allocation3 + $0x8] ss:$16 sps:$4 sm:$0xff]  }
 0x19a   :  { %5532 = vmatpush2.bf16.msra.mxu1 %v7640_v59  ;;  %5490 = vmatprep.subr.bf16.mxu0 %v7645_v60  ;;  %v7715_v59 = vld [vmem:[%s8682_s0 + $0x60] ss:$100 sps:$4 sm:$0xff]  }
 0x19b   :  { %5533 = vmatprep.subr.bf16.mxu1 %v7648_v61  ;;  %v7718_v60 = vld [vmem:[#allocation3 + $0x1ec] ss:$16 sps:$4 sm:$0xff]  }
 0x19c   :  { %v7721_v61 = vld [vmem:[#allocation3 + $0x2ec] ss:$16 sps:$4 sm:$0xff]  }
 0x19d   :  { %5491 = vmatpush2.bf16.msra.mxu0 %v7643_v62  ;;  %v7716_v62 = vld [vmem:[#allocation3 + $0x1e8] ss:$16 sps:$4 sm:$0xff]  }
 0x19e   :  { %5534 = vmatpush2.bf16.msra.mxu1 %v7646_v63  ;;  %5492 = vmatprep.subr.bf16.mxu0 %v7651_v0  ;;  %v7719_v63 = vld [vmem:[#allocation3 + $0x2e8] ss:$16 sps:$4 sm:$0xff]   ;;  %v7724_v0 = vld [vmem:[#allocation3 + $0x1cc] ss:$16 sps:$4 sm:$0xff]  }
 0x19f   :  { %5535 = vmatprep.subr.bf16.mxu1 %v7654_v1  ;;  %v7727_v1 = vld [vmem:[#allocation3 + $0x2cc] ss:$16 sps:$4 sm:$0xff]  }
 0x1a1   :  { %5493 = vmatpush2.bf16.msra.mxu0 %v7649_v2  ;;  %v7722_v2 = vld [vmem:[#allocation3 + $0x1c8] ss:$16 sps:$4 sm:$0xff]  }
 0x1a2   :  { %5536 = vmatpush2.bf16.msra.mxu1 %v7652_v3  ;;  %5494 = vmatprep.subr.bf16.mxu0 %v7657_v5  ;;  %v7725_v3 = vld [vmem:[#allocation3 + $0x2c8] ss:$16 sps:$4 sm:$0xff]   ;;  %v7730_v5 = vld [vmem:[#allocation3 + $0x1ac] ss:$16 sps:$4 sm:$0xff]  }
 0x1a3   :  { %5537 = vmatprep.subr.bf16.mxu1 %v7660_v6  ;;  %v7733_v6 = vld [vmem:[#allocation3 + $0x2ac] ss:$16 sps:$4 sm:$0xff]  }
 0x1a5   :  { %5495 = vmatpush2.bf16.msra.mxu0 %v7655_v7  ;;  %v8293_v7 = vld [vmem:[%s8682_s0 + $0xc] ss:$100 sps:$4 sm:$0xff]  }
 0x1a6   :  { %5538 = vmatpush2.bf16.msra.mxu1 %v7658_v8  ;;  %5550 = vmatprep.subr.bf16.mxu0 %v7669_v11  ;;  %v7728_v8 = vld [vmem:[#allocation3 + $0x1a8] ss:$16 sps:$4 sm:$0xff]   ;;  %v7739_v11 = vld [vmem:[#allocation3 + $0x28c] ss:$16 sps:$4 sm:$0xff]  }
 0x1a7   :  { %5593 = vmatprep.subr.bf16.mxu1 %v7672_v13  ;;  %v7734_v13 = vld [vmem:[#allocation3 + $0x188] ss:$16 sps:$4 sm:$0xff]  }
 0x1a8   :  { %v5240_v21 = vpop.f32.mrf.mxu0  ;;  %5497 = vmatmul.mubr.bf16.vlgmr.msra.gmra.mxu0 %v7661_v9  ;;  %v7731_v9 = vld [vmem:[#allocation3 + $0x2a8] ss:$16 sps:$4 sm:$0xff]  }
 0x1a9   :  { %v5283_v22 = vpop.f32.mrf.mxu1  ;;  %5540 = vmatmul.mubr.bf16.vlgmr.msra.gmra.mxu1 %v7664_v41  ;;  %v5241_v24 = vadd.f32 %v5240_v21, %v8514_v4  ;;  %5551 = vmatpush1.bf16.msra.mxu0 %v7667_v14  ;;  %v8292_v4 = vld [vmem:[%s8682_s0 + $0x4] ss:$100 sps:$4 sm:$0xff]   ;;  %v7736_v41 = vld [vmem:[#allocation3 + $0x18c] ss:$16 sps:$4 sm:$0xff]  }
 0x1aa   :  { %5594 = vmatpush1.bf16.msra.mxu1 %v7670_v46  ;;  %v8532_v25 = vpop.f32.mrf.mxu0  ;;  %5552 = vmatprep.subr.bf16.mxu0 %v7675_v16  ;;  %v7737_v14 = vld [vmem:[#allocation3 + $0x288] ss:$16 sps:$4 sm:$0xff]   ;;  %v7742_v46 = vld [vmem:[#allocation3 + $0x16c] ss:$16 sps:$4 sm:$0xff]  }
 0x1ab   :  { %v8534_v26 = vpop.f32.mrf.mxu1  ;;  %5595 = vmatprep.subr.bf16.mxu1 %v7678_v19  ;;  %v8536_v28 = vadd.f32 %v5283_v22, %v5241_v24  ;;  %5582 = vmatprep.mubr.bf16.mxu0 %v8388_v31  ;;  %v7745_v16 = vld [vmem:[#allocation3 + $0x26c] ss:$16 sps:$4 sm:$0xff]   ;;  %v7740_v19 = vld [vmem:[#allocation3 + $0x168] ss:$16 sps:$4 sm:$0xff]  }
 0x1ac   :  { %5625 = vmatprep.mubr.bf16.mxu1 %v8292_v4  ;;  %v5244_v32 = vpop.f32.mrf.mxu0  ;;  %v7751_v21 = vld [vmem:[#allocation3 + $0x24c] ss:$16 sps:$4 sm:$0xff]   ;;  %v7746_v22 = vld [vmem:[#allocation3 + $0x148] ss:$16 sps:$4 sm:$0xff]  }
 0x1ad   :  { %v5245_v33 = vadd.f32 %v5244_v32, %v8520_v15  ;;  %5553 = vmatpush1.bf16.msra.mxu0 %v7673_v20  ;;  %v5287_v34 = vpop.f32.mrf.mxu1  ;;  %v7691_v15 = vld [vmem:[#allocation3 + $0x1860] ss:$16 sps:$4 sm:$0xff]   ;;  %v7743_v20 = vld [vmem:[#allocation3 + $0x268] ss:$16 sps:$4 sm:$0xff]   ;;  %v7760_v4 = vld [vmem:[#allocation3 + $0x10c] ss:$16 sps:$4 sm:$0xff]  }
 0x1ae   :  { %5596 = vmatpush1.bf16.msra.mxu1 %v7676_v52  ;;  %5554 = vmatprep.subr.bf16.mxu0 %v7681_v56  ;;  %v7748_v52 = vld [vmem:[#allocation3 + $0x14c] ss:$16 sps:$4 sm:$0xff]   ;;  %v7749_v24 = vld [vmem:[#allocation3 + $0x248] ss:$16 sps:$4 sm:$0xff]  }
 0x1af   :  { %5597 = vmatprep.subr.bf16.mxu1 %v7684_v27  ;;  %v8543_v37 = vadd.f32 %v5287_v34, %v5245_v33  ;;  %v7754_v56 = vld [vmem:[#allocation3 + $0x12c] ss:$16 sps:$4 sm:$0xff]   ;;  %v7758_v33 = vld [vmem:[#allocation3 + $0x108] ss:$16 sps:$4 sm:$0xff]  }
 0x1b0   :  { %v7757_v27 = vld [vmem:[#allocation3 + $0x22c] ss:$16 sps:$4 sm:$0xff]   ;;  %v7761_v34 = vld [vmem:[#allocation3 + $0x208] ss:$16 sps:$4 sm:$0xff]  }
 0x1b1   :  { %5555 = vmatpush1.bf16.msra.mxu0 %v7679_v29  ;;  %v7752_v29 = vld [vmem:[#allocation3 + $0x128] ss:$16 sps:$4 sm:$0xff]   ;;  %v7763_v32 = vld [vmem:[#allocation3 + $0x20c] ss:$16 sps:$4 sm:$0xff]  }
 0x1b2   :  { %5598 = vmatpush1.bf16.msra.mxu1 %v7682_v30  ;;  %5556 = vmatprep.subr.bf16.mxu0 %v7687_v35  ;;  %v7755_v30 = vld [vmem:[#allocation3 + $0x228] ss:$16 sps:$4 sm:$0xff]   ;;  %v7766_v35 = vld [vmem:[#allocation3 + $0x3ec] ss:$16 sps:$4 sm:$0xff]  }
 0x1b3   :  { %5599 = vmatprep.subr.bf16.mxu1 %v7690_v36  ;;  %v7769_v36 = vld [vmem:[#allocation3 + $0x4ec] ss:$16 sps:$4 sm:$0xff]  }
 0x1b5   :  { %5557 = vmatpush1.bf16.msra.mxu0 %v7685_v38  ;;  %v7764_v38 = vld [vmem:[#allocation3 + $0x3e8] ss:$16 sps:$4 sm:$0xff]  }
 0x1b6   :  { %5600 = vmatpush1.bf16.msra.mxu1 %v7688_v39  ;;  %5558 = vmatprep.subr.bf16.mxu0 %v7693_v40  ;;  %v7767_v39 = vld [vmem:[#allocation3 + $0x4e8] ss:$16 sps:$4 sm:$0xff]   ;;  %v7772_v40 = vld [vmem:[#allocation3 + $0x3cc] ss:$16 sps:$4 sm:$0xff]  }
 0x1b7   :  { %5601 = vmatprep.subr.bf16.mxu1 %v7696_v42  ;;  %v7775_v42 = vld [vmem:[#allocation3 + $0x4cc] ss:$16 sps:$4 sm:$0xff]  }
 0x1b9   :  { %5559 = vmatpush1.bf16.msra.mxu0 %v7691_v15  ;;  %v7770_v15 = vld [vmem:[#allocation3 + $0x3c8] ss:$16 sps:$4 sm:$0xff]  }
 0x1ba   :  { %5602 = vmatpush1.bf16.msra.mxu1 %v7694_v43  ;;  %5560 = vmatprep.subr.bf16.mxu0 %v7699_v44  ;;  %v7773_v43 = vld [vmem:[#allocation3 + $0x4c8] ss:$16 sps:$4 sm:$0xff]   ;;  %v8294_v44 = vld [vmem:[%s8682_s0] ss:$100 sps:$4 sm:$0xff]  }
 0x1bb   :  { %5603 = vmatprep.subr.bf16.mxu1 %v7702_v45  ;;  %v7778_v45 = vld [vmem:[#allocation3 + $0x3ac] ss:$16 sps:$4 sm:$0xff]  }
 0x1bd   :  { %5561 = vmatpush1.bf16.msra.mxu0 %v7697_v47  ;;  %v7781_v47 = vld [vmem:[#allocation3 + $0x4ac] ss:$16 sps:$4 sm:$0xff]  }
 0x1be   :  { %5604 = vmatpush1.bf16.msra.mxu1 %v7700_v48  ;;  %5562 = vmatprep.subr.bf16.mxu0 %v7705_v49  ;;  %v7776_v48 = vld [vmem:[#allocation3 + $0x3a8] ss:$16 sps:$4 sm:$0xff]  }
 0x1bf   :  { %5605 = vmatprep.subr.bf16.mxu1 %v7708_v50  ;;  %v7779_v49 = vld [vmem:[#allocation3 + $0x4a8] ss:$16 sps:$4 sm:$0xff]  }
 0x1c0   :  { %v8295_v50 = vld [vmem:[%s8682_s0 + $0x14] ss:$100 sps:$4 sm:$0xff]  }
 0x1c1   :  { %5563 = vmatpush1.bf16.msra.mxu0 %v7703_v51  ;;  %v7784_v51 = vld [vmem:[#allocation3 + $0x38c] ss:$16 sps:$4 sm:$0xff]  }
 0x1c2   :  { %5606 = vmatpush1.bf16.msra.mxu1 %v7706_v53  ;;  %5564 = vmatprep.subr.bf16.mxu0 %v7711_v54  ;;  %v7787_v53 = vld [vmem:[#allocation3 + $0x48c] ss:$16 sps:$4 sm:$0xff]   ;;  %v7782_v54 = vld [vmem:[#allocation3 + $0x388] ss:$16 sps:$4 sm:$0xff]  }
 0x1c3   :  { %5607 = vmatprep.subr.bf16.mxu1 %v7714_v55  ;;  %v7785_v55 = vld [vmem:[#allocation3 + $0x488] ss:$16 sps:$4 sm:$0xff]  }
 0x1c5   :  { %5565 = vmatpush1.bf16.msra.mxu0 %v7709_v57  ;;  %v7790_v57 = vld [vmem:[#allocation3 + $0x36c] ss:$16 sps:$4 sm:$0xff]  }
 0x1c6   :  { %5608 = vmatpush1.bf16.msra.mxu1 %v7712_v58  ;;  %5636 = vmatprep.subr.bf16.mxu0 %v7721_v61  ;;  %v7793_v58 = vld [vmem:[#allocation3 + $0x46c] ss:$16 sps:$4 sm:$0xff]  }
 0x1c7   :  { %5609 = vmatprep.subr.bf16.mxu1 %v7718_v60  ;;  %v7791_v60 = vld [vmem:[#allocation3 + $0x468] ss:$16 sps:$4 sm:$0xff]   ;;  %v7796_v61 = vld [vmem:[#allocation3 + $0x34c] ss:$16 sps:$4 sm:$0xff]  }
 0x1c8   :  { %5583 = vmatmul.mubr.bf16.vlgmr.msra.gmra.mxu0 %v7715_v59  ;;  %v7788_v59 = vld [vmem:[#allocation3 + $0x368] ss:$16 sps:$4 sm:$0xff]  }
 0x1c9   :  { %5637 = vmatpush1.bf16.msra.mxu0 %v7719_v63  ;;  %5668 = vmatprep.mubr.bf16.mxu0 %v8293_v7  ;;  %v7794_v63 = vld [vmem:[#allocation3 + $0x348] ss:$16 sps:$4 sm:$0xff]   ;;  %v7811_v7 = vld [vmem:[#allocation3 + $0x40c] ss:$16 sps:$4 sm:$0xff]  }
 0x1ca   :  { %5610 = vmatpush2.bf16.msra.mxu1 %v7716_v62  ;;  %5638 = vmatprep.subr.bf16.mxu0 %v7727_v1  ;;  %v7799_v62 = vld [vmem:[#allocation3 + $0x44c] ss:$16 sps:$4 sm:$0xff]  }
 0x1cb   :  { %5611 = vmatprep.subr.bf16.mxu1 %v7724_v0  ;;  %v7797_v0 = vld [vmem:[#allocation3 + $0x448] ss:$16 sps:$4 sm:$0xff]   ;;  %v7802_v1 = vld [vmem:[#allocation3 + $0x32c] ss:$16 sps:$4 sm:$0xff]  }
 0x1cd   :  { %5639 = vmatpush1.bf16.msra.mxu0 %v7725_v3  ;;  %v7800_v3 = vld [vmem:[#allocation3 + $0x328] ss:$16 sps:$4 sm:$0xff]  }
 0x1ce   :  { %5612 = vmatpush2.bf16.msra.mxu1 %v7722_v2  ;;  %5640 = vmatprep.subr.bf16.mxu0 %v7733_v6  ;;  %v7805_v2 = vld [vmem:[#allocation3 + $0x42c] ss:$16 sps:$4 sm:$0xff]  }
 0x1cf   :  { %5613 = vmatprep.subr.bf16.mxu1 %v7730_v5  ;;  %v7803_v5 = vld [vmem:[#allocation3 + $0x428] ss:$16 sps:$4 sm:$0xff]   ;;  %v7808_v6 = vld [vmem:[#allocation3 + $0x30c] ss:$16 sps:$4 sm:$0xff]  }
 0x1d1   :  { %5641 = vmatpush1.bf16.msra.mxu0 %v7731_v9  ;;  %v7809_v9 = vld [vmem:[#allocation3 + $0x408] ss:$16 sps:$4 sm:$0xff]  }
 0x1d2   :  { %5614 = vmatpush2.bf16.msra.mxu1 %v7728_v8  ;;  %5642 = vmatprep.subr.bf16.mxu0 %v7739_v11  ;;  %v7806_v8 = vld [vmem:[#allocation3 + $0x308] ss:$16 sps:$4 sm:$0xff]   ;;  %v7817_v11 = vld [vmem:[#allocation3 + $0x6ec] ss:$16 sps:$4 sm:$0xff]  }
 0x1d3   :  { %5615 = vmatprep.subr.bf16.mxu1 %v7736_v41  ;;  %v7814_v41 = vld [vmem:[#allocation3 + $0x5ec] ss:$16 sps:$4 sm:$0xff]  }
 0x1d5   :  { %5643 = vmatpush1.bf16.msra.mxu0 %v7737_v14  ;;  %v7815_v14 = vld [vmem:[#allocation3 + $0x6e8] ss:$16 sps:$4 sm:$0xff]  }
 0x1d6   :  { %5616 = vmatpush2.bf16.msra.mxu1 %v7734_v13  ;;  %5644 = vmatprep.subr.bf16.mxu0 %v7745_v16  ;;  %v7812_v13 = vld [vmem:[#allocation3 + $0x5e8] ss:$16 sps:$4 sm:$0xff]   ;;  %v7823_v16 = vld [vmem:[#allocation3 + $0x6cc] ss:$16 sps:$4 sm:$0xff]  }
 0x1d7   :  { %5617 = vmatprep.subr.bf16.mxu1 %v7742_v46  ;;  %v7820_v46 = vld [vmem:[#allocation3 + $0x5cc] ss:$16 sps:$4 sm:$0xff]  }
 0x1d9   :  { %5645 = vmatpush1.bf16.msra.mxu0 %v7743_v20  ;;  %v7821_v20 = vld [vmem:[#allocation3 + $0x6c8] ss:$16 sps:$4 sm:$0xff]  }
 0x1da   :  { %5618 = vmatpush2.bf16.msra.mxu1 %v7740_v19  ;;  %5646 = vmatprep.subr.bf16.mxu0 %v7751_v21  ;;  %v7818_v19 = vld [vmem:[#allocation3 + $0x5c8] ss:$16 sps:$4 sm:$0xff]   ;;  %v7826_v21 = vld [vmem:[#allocation3 + $0x5ac] ss:$16 sps:$4 sm:$0xff]  }
 0x1db   :  { %5619 = vmatprep.subr.bf16.mxu1 %v7748_v52  ;;  %v8296_v52 = vld [vmem:[%s8682_s0 + $0x8] ss:$100 sps:$4 sm:$0xff]  }
 0x1dd   :  { %5647 = vmatpush1.bf16.msra.mxu0 %v7749_v24  ;;  %v7824_v24 = vld [vmem:[#allocation3 + $0x5a8] ss:$16 sps:$4 sm:$0xff]  }
 0x1de   :  { %5620 = vmatpush2.bf16.msra.mxu1 %v7746_v22  ;;  %5648 = vmatprep.subr.bf16.mxu0 %v7757_v27  ;;  %v7829_v22 = vld [vmem:[#allocation3 + $0x6ac] ss:$16 sps:$4 sm:$0xff]  }
 0x1df   :  { %5621 = vmatprep.subr.bf16.mxu1 %v7754_v56  ;;  %v7827_v56 = vld [vmem:[#allocation3 + $0x6a8] ss:$16 sps:$4 sm:$0xff]  }
 0x1e0   :  { %v8297_v27 = vld [vmem:[%s8682_s0 + $0x1c] ss:$100 sps:$4 sm:$0xff]  }
 0x1e1   :  { %5649 = vmatpush1.bf16.msra.mxu0 %v7755_v30  ;;  %v7835_v30 = vld [vmem:[#allocation3 + $0x68c] ss:$16 sps:$4 sm:$0xff]  }
 0x1e2   :  { %5622 = vmatpush2.bf16.msra.mxu1 %v7752_v29  ;;  %5650 = vmatprep.subr.bf16.mxu0 %v7763_v32  ;;  %v7832_v29 = vld [vmem:[#allocation3 + $0x58c] ss:$16 sps:$4 sm:$0xff]   ;;  %v7833_v32 = vld [vmem:[#allocation3 + $0x688] ss:$16 sps:$4 sm:$0xff]  }
 0x1e3   :  { %5623 = vmatprep.subr.bf16.mxu1 %v7760_v4  ;;  %v7830_v4 = vld [vmem:[#allocation3 + $0x588] ss:$16 sps:$4 sm:$0xff]  }
 0x1e5   :  { %5651 = vmatpush1.bf16.msra.mxu0 %v7761_v34  ;;  %v7841_v34 = vld [vmem:[#allocation3 + $0x66c] ss:$16 sps:$4 sm:$0xff]  }
 0x1e6   :  { %5624 = vmatpush2.bf16.msra.mxu1 %v7758_v33  ;;  %5652 = vmatprep.subr.bf16.mxu0 %v7766_v35  ;;  %v7838_v33 = vld [vmem:[#allocation3 + $0x56c] ss:$16 sps:$4 sm:$0xff]   ;;  %v7836_v35 = vld [vmem:[#allocation3 + $0x568] ss:$16 sps:$4 sm:$0xff]  }
 0x1e7   :  { %5679 = vmatprep.subr.bf16.mxu1 %v7769_v36  ;;  %v7839_v36 = vld [vmem:[#allocation3 + $0x668] ss:$16 sps:$4 sm:$0xff]  }
 0x1e9   :  { %5626 = vmatmul.mubr.bf16.vlgmr.msra.gmra.mxu1 %v8294_v44  ;;  %5653 = vmatpush2.bf16.msra.mxu0 %v7764_v38  ;;  %v7844_v38 = vld [vmem:[#allocation3 + $0x54c] ss:$16 sps:$4 sm:$0xff]   ;;  %v7848_v44 = vld [vmem:[#allocation3 + $0x528] ss:$16 sps:$4 sm:$0xff]  }
 0x1ea   :  { %5680 = vmatpush1.bf16.msra.mxu1 %v7767_v39  ;;  %5654 = vmatprep.subr.bf16.mxu0 %v7772_v40  ;;  %v7847_v39 = vld [vmem:[#allocation3 + $0x64c] ss:$16 sps:$4 sm:$0xff]   ;;  %v7842_v40 = vld [vmem:[#allocation3 + $0x548] ss:$16 sps:$4 sm:$0xff]  }
 0x1eb   :  { %5681 = vmatprep.subr.bf16.mxu1 %v7775_v42  ;;  %5711 = vmatprep.mubr.bf16.mxu1 %v8295_v50  ;;  %v7845_v42 = vld [vmem:[#allocation3 + $0x648] ss:$16 sps:$4 sm:$0xff]  }
 0x1ec   :  { %v7857_v50 = vld [vmem:[#allocation3 + $0x608] ss:$16 sps:$4 sm:$0xff]  }
 0x1ed   :  { %5655 = vmatpush2.bf16.msra.mxu0 %v7770_v15  ;;  %v7850_v15 = vld [vmem:[#allocation3 + $0x52c] ss:$16 sps:$4 sm:$0xff]  }
 0x1ee   :  { %5682 = vmatpush1.bf16.msra.mxu1 %v7773_v43  ;;  %5656 = vmatprep.subr.bf16.mxu0 %v7778_v45  ;;  %v7853_v43 = vld [vmem:[#allocation3 + $0x62c] ss:$16 sps:$4 sm:$0xff]   ;;  %v7851_v45 = vld [vmem:[#allocation3 + $0x628] ss:$16 sps:$4 sm:$0xff]  }
 0x1ef   :  { %5683 = vmatprep.subr.bf16.mxu1 %v7781_v47  ;;  %v7856_v47 = vld [vmem:[#allocation3 + $0x50c] ss:$16 sps:$4 sm:$0xff]  }
 0x1f1   :  { %5657 = vmatpush2.bf16.msra.mxu0 %v7776_v48  ;;  %v7859_v48 = vld [vmem:[#allocation3 + $0x60c] ss:$16 sps:$4 sm:$0xff]  }
 0x1f2   :  { %5684 = vmatpush1.bf16.msra.mxu1 %v7779_v49  ;;  %5658 = vmatprep.subr.bf16.mxu0 %v7784_v51  ;;  %v7854_v49 = vld [vmem:[#allocation3 + $0x508] ss:$16 sps:$4 sm:$0xff]   ;;  %v7862_v51 = vld [vmem:[#allocation3 + $0x7ec] ss:$16 sps:$4 sm:$0xff]  }
 0x1f3   :  { %5685 = vmatprep.subr.bf16.mxu1 %v7787_v53  ;;  %v7865_v53 = vld [vmem:[#allocation3 + $0x8ec] ss:$16 sps:$4 sm:$0xff]  }
 0x1f5   :  { %5659 = vmatpush2.bf16.msra.mxu0 %v7782_v54  ;;  %v7860_v54 = vld [vmem:[#allocation3 + $0x7e8] ss:$16 sps:$4 sm:$0xff]  }
 0x1f6   :  { %5686 = vmatpush1.bf16.msra.mxu1 %v7785_v55  ;;  %5660 = vmatprep.subr.bf16.mxu0 %v7790_v57  ;;  %v7863_v55 = vld [vmem:[#allocation3 + $0x8e8] ss:$16 sps:$4 sm:$0xff]   ;;  %v7868_v57 = vld [vmem:[#allocation3 + $0x7cc] ss:$16 sps:$4 sm:$0xff]  }
 0x1f7   :  { %5687 = vmatprep.subr.bf16.mxu1 %v7793_v58  ;;  %v7871_v58 = vld [vmem:[#allocation3 + $0x8cc] ss:$16 sps:$4 sm:$0xff]  }
 0x1f9   :  { %5661 = vmatpush2.bf16.msra.mxu0 %v7788_v59  ;;  %v8298_v59 = vld [vmem:[%s8682_s0 + $0x10] ss:$100 sps:$4 sm:$0xff]  }
 0x1fa   :  { %5688 = vmatpush1.bf16.msra.mxu1 %v7791_v60  ;;  %5662 = vmatprep.subr.bf16.mxu0 %v7796_v61  ;;  %v7866_v60 = vld [vmem:[#allocation3 + $0x7c8] ss:$16 sps:$4 sm:$0xff]  }
 0x1fb   :  { %5689 = vmatprep.subr.bf16.mxu1 %v7799_v62  ;;  %v7869_v61 = vld [vmem:[#allocation3 + $0x8c8] ss:$16 sps:$4 sm:$0xff]   ;;  %v7874_v62 = vld [vmem:[#allocation3 + $0x7ac] ss:$16 sps:$4 sm:$0xff]  }
 0x1fd   :  { %5663 = vmatpush2.bf16.msra.mxu0 %v7794_v63  ;;  %v7877_v63 = vld [vmem:[#allocation3 + $0x8ac] ss:$16 sps:$4 sm:$0xff]  }
 0x1fe   :  { %5690 = vmatpush1.bf16.msra.mxu1 %v7797_v0  ;;  %5664 = vmatprep.subr.bf16.mxu0 %v7802_v1  ;;  %v8299_v0 = vld [vmem:[%s8682_s0 + $0x24] ss:$100 sps:$4 sm:$0xff]  }
 0x1ff   :  { %5691 = vmatprep.subr.bf16.mxu1 %v7805_v2  ;;  %v7872_v1 = vld [vmem:[#allocation3 + $0x7a8] ss:$16 sps:$4 sm:$0xff]  }
 0x200   :  { %v7875_v2 = vld [vmem:[#allocation3 + $0x8a8] ss:$16 sps:$4 sm:$0xff]  }
 0x201   :  { %5665 = vmatpush2.bf16.msra.mxu0 %v7800_v3  ;;  %v7880_v3 = vld [vmem:[#allocation3 + $0x78c] ss:$16 sps:$4 sm:$0xff]  }
 0x202   :  { %5692 = vmatpush1.bf16.msra.mxu1 %v7803_v5  ;;  %5666 = vmatprep.subr.bf16.mxu0 %v7808_v6  ;;  %v7883_v5 = vld [vmem:[#allocation3 + $0x88c] ss:$16 sps:$4 sm:$0xff]   ;;  %v7878_v6 = vld [vmem:[#allocation3 + $0x788] ss:$16 sps:$4 sm:$0xff]  }
 0x203   :  { %5693 = vmatprep.subr.bf16.mxu1 %v7811_v7  ;;  %v7881_v7 = vld [vmem:[#allocation3 + $0x888] ss:$16 sps:$4 sm:$0xff]  }
 0x205   :  { %5667 = vmatpush2.bf16.msra.mxu0 %v7806_v8  ;;  %v7886_v8 = vld [vmem:[#allocation3 + $0x76c] ss:$16 sps:$4 sm:$0xff]  }
 0x206   :  { %5694 = vmatpush1.bf16.msra.mxu1 %v7809_v9  ;;  %5722 = vmatprep.subr.bf16.mxu0 %v7817_v11  ;;  %v7889_v9 = vld [vmem:[#allocation3 + $0x86c] ss:$16 sps:$4 sm:$0xff]   ;;  %v7887_v11 = vld [vmem:[#allocation3 + $0x868] ss:$16 sps:$4 sm:$0xff]  }
 0x207   :  { %5695 = vmatprep.subr.bf16.mxu1 %v7814_v41  ;;  %v7884_v41 = vld [vmem:[#allocation3 + $0x768] ss:$16 sps:$4 sm:$0xff]  }
 0x208   :  { %5669 = vmatmul.mubr.bf16.vlgmr.msra.gmra.mxu0 %v8296_v52  ;;  %v7896_v52 = vld [vmem:[#allocation3 + $0x728] ss:$16 sps:$4 sm:$0xff]  }
 0x209   :  { %5723 = vmatpush1.bf16.msra.mxu0 %v7815_v14  ;;  %5754 = vmatprep.mubr.bf16.mxu0 %v8297_v27  ;;  %v7895_v14 = vld [vmem:[#allocation3 + $0x84c] ss:$16 sps:$4 sm:$0xff]   ;;  %v7905_v27 = vld [vmem:[#allocation3 + $0x808] ss:$16 sps:$4 sm:$0xff]  }
 0x20a   :  { %5696 = vmatpush2.bf16.msra.mxu1 %v7812_v13  ;;  %5724 = vmatprep.subr.bf16.mxu0 %v7823_v16  ;;  %v7892_v13 = vld [vmem:[#allocation3 + $0x74c] ss:$16 sps:$4 sm:$0xff]   ;;  %v7893_v16 = vld [vmem:[#allocation3 + $0x848] ss:$16 sps:$4 sm:$0xff]  }
 0x20b   :  { %5697 = vmatprep.subr.bf16.mxu1 %v7820_v46  ;;  %v7890_v46 = vld [vmem:[#allocation3 + $0x748] ss:$16 sps:$4 sm:$0xff]  }
 0x20d   :  { %5725 = vmatpush1.bf16.msra.mxu0 %v7821_v20  ;;  %v7901_v20 = vld [vmem:[#allocation3 + $0x82c] ss:$16 sps:$4 sm:$0xff]  }
 0x20e   :  { %5698 = vmatpush2.bf16.msra.mxu1 %v7818_v19  ;;  %5726 = vmatprep.subr.bf16.mxu0 %v7829_v22  ;;  %v7898_v19 = vld [vmem:[#allocation3 + $0x72c] ss:$16 sps:$4 sm:$0xff]  }
 0x20f   :  { %5699 = vmatprep.subr.bf16.mxu1 %v7826_v21  ;;  %v7899_v21 = vld [vmem:[#allocation3 + $0x828] ss:$16 sps:$4 sm:$0xff]   ;;  %v7904_v22 = vld [vmem:[#allocation3 + $0x70c] ss:$16 sps:$4 sm:$0xff]  }
 0x211   :  { %5727 = vmatpush1.bf16.msra.mxu0 %v7827_v56  ;;  %v7902_v56 = vld [vmem:[#allocation3 + $0x708] ss:$16 sps:$4 sm:$0xff]  }
 0x212   :  { %5700 = vmatpush2.bf16.msra.mxu1 %v7824_v24  ;;  %5728 = vmatprep.subr.bf16.mxu0 %v7835_v30  ;;  %v7907_v24 = vld [vmem:[#allocation3 + $0x80c] ss:$16 sps:$4 sm:$0xff]  }
 0x213   :  { %5701 = vmatprep.subr.bf16.mxu1 %v7832_v29  ;;  %v7910_v29 = vld [vmem:[#allocation3 + $0x9ec] ss:$16 sps:$4 sm:$0xff]  }
 0x214   :  { %v7913_v30 = vld [vmem:[#allocation3 + $0xaec] ss:$16 sps:$4 sm:$0xff]  }
 0x215   :  { %5729 = vmatpush1.bf16.msra.mxu0 %v7833_v32  ;;  %v7911_v32 = vld [vmem:[#allocation3 + $0xae8] ss:$16 sps:$4 sm:$0xff]  }
 0x216   :  { %5702 = vmatpush2.bf16.msra.mxu1 %v7830_v4  ;;  %5730 = vmatprep.subr.bf16.mxu0 %v7841_v34  ;;  %v7908_v4 = vld [vmem:[#allocation3 + $0x9e8] ss:$16 sps:$4 sm:$0xff]   ;;  %v7919_v34 = vld [vmem:[#allocation3 + $0xacc] ss:$16 sps:$4 sm:$0xff]  }
 0x217   :  { %5703 = vmatprep.subr.bf16.mxu1 %v7838_v33  ;;  %v7916_v33 = vld [vmem:[#allocation3 + $0x9cc] ss:$16 sps:$4 sm:$0xff]  }
 0x219   :  { %5731 = vmatpush1.bf16.msra.mxu0 %v7839_v36  ;;  %v7914_v36 = vld [vmem:[#allocation3 + $0x9c8] ss:$16 sps:$4 sm:$0xff]  }
 0x21a   :  { %5704 = vmatpush2.bf16.msra.mxu1 %v7836_v35  ;;  %5732 = vmatprep.subr.bf16.mxu0 %v7847_v39  ;;  %v8300_v35 = vld [vmem:[%s8682_s0 + $0x18] ss:$100 sps:$4 sm:$0xff]  }
 0x21b   :  { %5705 = vmatprep.subr.bf16.mxu1 %v7844_v38  ;;  %v7917_v38 = vld [vmem:[#allocation3 + $0xac8] ss:$16 sps:$4 sm:$0xff]   ;;  %v7922_v39 = vld [vmem:[#allocation3 + $0x9ac] ss:$16 sps:$4 sm:$0xff]  }
 0x21d   :  { %5733 = vmatpush1.bf16.msra.mxu0 %v7845_v42  ;;  %v8301_v42 = vld [vmem:[%s8682_s0 + $0x2c] ss:$100 sps:$4 sm:$0xff]  }
 0x21e   :  { %5706 = vmatpush2.bf16.msra.mxu1 %v7842_v40  ;;  %5734 = vmatprep.subr.bf16.mxu0 %v7853_v43  ;;  %v7925_v40 = vld [vmem:[#allocation3 + $0xaac] ss:$16 sps:$4 sm:$0xff]   ;;  %v7923_v43 = vld [vmem:[#allocation3 + $0xaa8] ss:$16 sps:$4 sm:$0xff]  }
 0x21f   :  { %5707 = vmatprep.subr.bf16.mxu1 %v7850_v15  ;;  %v7920_v15 = vld [vmem:[#allocation3 + $0x9a8] ss:$16 sps:$4 sm:$0xff]  }
 0x221   :  { %5735 = vmatpush1.bf16.msra.mxu0 %v7851_v45  ;;  %v7931_v45 = vld [vmem:[#allocation3 + $0xa8c] ss:$16 sps:$4 sm:$0xff]  }
 0x222   :  { %5708 = vmatpush2.bf16.msra.mxu1 %v7848_v44  ;;  %5736 = vmatprep.subr.bf16.mxu0 %v7859_v48  ;;  %v7928_v44 = vld [vmem:[#allocation3 + $0x98c] ss:$16 sps:$4 sm:$0xff]   ;;  %v7929_v48 = vld [vmem:[#allocation3 + $0xa88] ss:$16 sps:$4 sm:$0xff]  }
 0x223   :  { %5709 = vmatprep.subr.bf16.mxu1 %v7856_v47  ;;  %v7926_v47 = vld [vmem:[#allocation3 + $0x988] ss:$16 sps:$4 sm:$0xff]  }
 0x225   :  { %5737 = vmatpush1.bf16.msra.mxu0 %v7857_v50  ;;  %v7937_v50 = vld [vmem:[#allocation3 + $0xa6c] ss:$16 sps:$4 sm:$0xff]  }
 0x226   :  { %5710 = vmatpush2.bf16.msra.mxu1 %v7854_v49  ;;  %5738 = vmatprep.subr.bf16.mxu0 %v7862_v51  ;;  %v7934_v49 = vld [vmem:[#allocation3 + $0x96c] ss:$16 sps:$4 sm:$0xff]   ;;  %v7932_v51 = vld [vmem:[#allocation3 + $0x968] ss:$16 sps:$4 sm:$0xff]  }
 0x227   :  { %5765 = vmatprep.subr.bf16.mxu1 %v7865_v53  ;;  %v7935_v53 = vld [vmem:[#allocation3 + $0xa68] ss:$16 sps:$4 sm:$0xff]  }
 0x229   :  { %5712 = vmatmul.mubr.bf16.vlgmr.msra.gmra.mxu1 %v8298_v59  ;;  %5739 = vmatpush2.bf16.msra.mxu0 %v7860_v54  ;;  %v7940_v54 = vld [vmem:[#allocation3 + $0x94c] ss:$16 sps:$4 sm:$0xff]  }
 0x22a   :  { %5766 = vmatpush1.bf16.msra.mxu1 %v7863_v55  ;;  %5740 = vmatprep.subr.bf16.mxu0 %v7868_v57  ;;  %v7943_v55 = vld [vmem:[#allocation3 + $0xa4c] ss:$16 sps:$4 sm:$0xff]   ;;  %v7938_v57 = vld [vmem:[#allocation3 + $0x948] ss:$16 sps:$4 sm:$0xff]  }
 0x22b   :  { %5767 = vmatprep.subr.bf16.mxu1 %v7871_v58  ;;  %5797 = vmatprep.mubr.bf16.mxu1 %v8299_v0  ;;  %v7941_v58 = vld [vmem:[#allocation3 + $0xa48] ss:$16 sps:$4 sm:$0xff]   ;;  %v7946_v59 = vld [vmem:[#allocation3 + $0x92c] ss:$16 sps:$4 sm:$0xff]  }
 0x22d   :  { %5741 = vmatpush2.bf16.msra.mxu0 %v7866_v60  ;;  %v7949_v60 = vld [vmem:[#allocation3 + $0xa2c] ss:$16 sps:$4 sm:$0xff]  }
 0x22e   :  { %5768 = vmatpush1.bf16.msra.mxu1 %v7869_v61  ;;  %5742 = vmatprep.subr.bf16.mxu0 %v7874_v62  ;;  %v8575_v61 = vpop.f32.mrf.mxu0  ;;  %v7944_v62 = vld [vmem:[#allocation3 + $0x928] ss:$16 sps:$4 sm:$0xff]  }
 0x22f   :  { %5769 = vmatprep.subr.bf16.mxu1 %v7877_v63  ;;  %v7947_v63 = vld [vmem:[#allocation3 + $0xa28] ss:$16 sps:$4 sm:$0xff]  }
 0x230   :  { %v8577_v0 = vpop.f32.mrf.mxu0 }
 0x231   :  { %5743 = vmatpush2.bf16.msra.mxu0 %v7872_v1  ;;  %v7952_v1 = vld [vmem:[#allocation3 + $0x90c] ss:$16 sps:$4 sm:$0xff]  }
 0x232   :  { %5770 = vmatpush1.bf16.msra.mxu1 %v7875_v2  ;;  %5744 = vmatprep.subr.bf16.mxu0 %v7880_v3  ;;  %v7955_v2 = vld [vmem:[#allocation3 + $0xa0c] ss:$16 sps:$4 sm:$0xff]   ;;  %v7950_v3 = vld [vmem:[#allocation3 + $0x908] ss:$16 sps:$4 sm:$0xff]  }
 0x233   :  { %5771 = vmatprep.subr.bf16.mxu1 %v7883_v5  ;;  %v7953_v5 = vld [vmem:[#allocation3 + $0xa08] ss:$16 sps:$4 sm:$0xff]  }
 0x235   :  { %5745 = vmatpush2.bf16.msra.mxu0 %v7878_v6  ;;  %v8579_v6 = vpop.f32.mrf.mxu1 }
 0x236   :  { %5772 = vmatpush1.bf16.msra.mxu1 %v7881_v7  ;;  %5746 = vmatprep.subr.bf16.mxu0 %v7886_v8  ;;  %v8581_v7 = vpop.f32.mrf.mxu0  ;;  %v7958_v8 = vld [vmem:[#allocation3 + $0xbec] ss:$16 sps:$4 sm:$0xff]  }
 0x237   :  { %5773 = vmatprep.subr.bf16.mxu1 %v7889_v9  ;;  %v7961_v9 = vld [vmem:[#allocation3 + $0xcec] ss:$16 sps:$4 sm:$0xff]  }
 0x239   :  { %5747 = vmatpush2.bf16.msra.mxu0 %v7884_v41  ;;  %v8583_v41 = vpop.f32.mrf.mxu1 }
 0x23a   :  { %5774 = vmatpush1.bf16.msra.mxu1 %v7887_v11  ;;  %5748 = vmatprep.subr.bf16.mxu0 %v7892_v13  ;;  %v7956_v11 = vld [vmem:[#allocation3 + $0xbe8] ss:$16 sps:$4 sm:$0xff]  }
 0x23b   :  { %5775 = vmatprep.subr.bf16.mxu1 %v7895_v14  ;;  %v7959_v13 = vld [vmem:[#allocation3 + $0xce8] ss:$16 sps:$4 sm:$0xff]   ;;  %v8585_v14 = vpop.f32.mrf.mxu0 }
 0x23d   :  { %5749 = vmatpush2.bf16.msra.mxu0 %v7890_v46  ;;  %v7964_v46 = vld [vmem:[#allocation3 + $0xbcc] ss:$16 sps:$4 sm:$0xff]  }
 0x23e   :  { %5776 = vmatpush1.bf16.msra.mxu1 %v7893_v16  ;;  %5750 = vmatprep.subr.bf16.mxu0 %v7898_v19  ;;  %v7967_v16 = vld [vmem:[#allocation3 + $0xccc] ss:$16 sps:$4 sm:$0xff]   ;;  %v8587_v19 = vpop.f32.mrf.mxu1 }
 0x23f   :  { %5777 = vmatprep.subr.bf16.mxu1 %v7901_v20  ;;  %v8302_v20 = vld [vmem:[%s8682_s0 + $0x20] ss:$100 sps:$4 sm:$0xff]  }
 0x241   :  { %5751 = vmatpush2.bf16.msra.mxu0 %v7896_v52  ;;  %v7962_v52 = vld [vmem:[#allocation3 + $0xbc8] ss:$16 sps:$4 sm:$0xff]  }
 0x242   :  { %5778 = vmatpush1.bf16.msra.mxu1 %v7899_v21  ;;  %5752 = vmatprep.subr.bf16.mxu0 %v7904_v22  ;;  %v7965_v21 = vld [vmem:[#allocation3 + $0xcc8] ss:$16 sps:$4 sm:$0xff]   ;;  %v5332_v22 = vpop.f32.mrf.mxu0 }
 0x243   :  { %5779 = vmatprep.subr.bf16.mxu1 %v7907_v24  ;;  %v7970_v24 = vld [vmem:[#allocation3 + $0xbac] ss:$16 sps:$4 sm:$0xff]  }
 0x245   :  { %5753 = vmatpush2.bf16.msra.mxu0 %v7902_v56  ;;  %v7973_v56 = vld [vmem:[#allocation3 + $0xcac] ss:$16 sps:$4 sm:$0xff]  }
 0x246   :  { %5780 = vmatpush1.bf16.msra.mxu1 %v7905_v27  ;;  %5808 = vmatprep.subr.bf16.mxu0 %v7913_v30  ;;  %v8303_v27 = vld [vmem:[%s8682_s0 + $0x34] ss:$100 sps:$4 sm:$0xff]   ;;  %v5412_v30 = vpop.f32.mrf.mxu0 }
 0x247   :  { %5781 = vmatprep.subr.bf16.mxu1 %v7910_v29  ;;  %v8595_v29 = vpop.f32.mrf.mxu1 }
 0x248   :  { %5755 = vmatmul.mubr.bf16.vlgmr.msra.gmra.mxu0 %v8300_v35 }
 0x249   :  { %5809 = vmatpush1.bf16.msra.mxu0 %v7911_v32  ;;  %5840 = vmatprep.mubr.bf16.mxu0 %v8301_v42  ;;  %v7971_v32 = vld [vmem:[#allocation3 + $0xca8] ss:$16 sps:$4 sm:$0xff]   ;;  %v5375_v35 = vpop.f32.mrf.mxu1  ;;  %v7982_v42 = vld [vmem:[#allocation3 + $0xb6c] ss:$16 sps:$4 sm:$0xff]  }
 0x24a   :  { %5782 = vmatpush2.bf16.msra.mxu1 %v7908_v4  ;;  %5810 = vmatprep.subr.bf16.mxu0 %v7919_v34  ;;  %v7968_v4 = vld [vmem:[#allocation3 + $0xba8] ss:$16 sps:$4 sm:$0xff]   ;;  %v7979_v34 = vld [vmem:[#allocation3 + $0xc8c] ss:$16 sps:$4 sm:$0xff]  }
 0x24b   :  { %5783 = vmatprep.subr.bf16.mxu1 %v7916_v33  ;;  %v7976_v33 = vld [vmem:[#allocation3 + $0xb8c] ss:$16 sps:$4 sm:$0xff]  }
 0x24d   :  { %5811 = vmatpush1.bf16.msra.mxu0 %v7917_v38  ;;  %v7974_v38 = vld [vmem:[#allocation3 + $0xb88] ss:$16 sps:$4 sm:$0xff]  }
 0x24e   :  { %5784 = vmatpush2.bf16.msra.mxu1 %v7914_v36  ;;  %5812 = vmatprep.subr.bf16.mxu0 %v7925_v40  ;;  %v5414_v36 = vpop.f32.mrf.mxu0  ;;  %v5455_v40 = vpop.f32.mrf.mxu1 }
 0x24f   :  { %5785 = vmatprep.subr.bf16.mxu1 %v7922_v39  ;;  %v7977_v39 = vld [vmem:[#allocation3 + $0xc88] ss:$16 sps:$4 sm:$0xff]  }
 0x251   :  { %5813 = vmatpush1.bf16.msra.mxu0 %v7923_v43  ;;  %v5243_v43 = vadd.f32 %v8532_v25, %v8517_v10  ;;  %v7986_v25 = vld [vmem:[#allocation3 + $0xb48] ss:$16 sps:$4 sm:$0xff]  }
 0x252   :  { %5786 = vmatpush2.bf16.msra.mxu1 %v7920_v15  ;;  %5814 = vmatprep.subr.bf16.mxu0 %v7931_v45  ;;  %v7985_v15 = vld [vmem:[#allocation3 + $0xc6c] ss:$16 sps:$4 sm:$0xff]   ;;  %v7980_v45 = vld [vmem:[#allocation3 + $0xb68] ss:$16 sps:$4 sm:$0xff]  }
 0x253   :  { %5787 = vmatprep.subr.bf16.mxu1 %v7928_v44  ;;  %v5416_v44 = vpop.f32.mrf.mxu0 }
 0x255   :  { %5815 = vmatpush1.bf16.msra.mxu0 %v7929_v48  ;;  %v5457_v48 = vpop.f32.mrf.mxu1 }
 0x256   :  { %5788 = vmatpush2.bf16.msra.mxu1 %v7926_v47  ;;  %5816 = vmatprep.subr.bf16.mxu0 %v7937_v50  ;;  %v7983_v47 = vld [vmem:[#allocation3 + $0xc68] ss:$16 sps:$4 sm:$0xff]   ;;  %v7991_v50 = vld [vmem:[#allocation3 + $0xc4c] ss:$16 sps:$4 sm:$0xff]  }
 0x257   :  { %5789 = vmatprep.subr.bf16.mxu1 %v7934_v49  ;;  %v7988_v49 = vld [vmem:[#allocation3 + $0xb4c] ss:$16 sps:$4 sm:$0xff]  }
 0x259   :  { %5817 = vmatpush1.bf16.msra.mxu0 %v7935_v53  ;;  %v5247_v53 = vadd.f32 %v8575_v61, %v8523_v17 }
 0x25a   :  { %5790 = vmatpush2.bf16.msra.mxu1 %v7932_v51  ;;  %5818 = vmatprep.subr.bf16.mxu0 %v7943_v55  ;;  %v5286_v51 = vadd.f32 %v8534_v26, %v5243_v43  ;;  %v5418_v55 = vpop.f32.mrf.mxu0 }
 0x25b   :  { %5791 = vmatprep.subr.bf16.mxu1 %v7940_v54  ;;  %v5327_v54 = vadd.f32 %v8577_v0, %v8536_v28  ;;  %v5290_v26 = vadd.f32 %v8579_v6, %v5247_v53  ;;  %v5331_v28 = vadd.f32 %v8585_v14, %v8543_v37  ;;  %v7998_v14 = vld [vmem:[#allocation3 + $0xb08] ss:$16 sps:$4 sm:$0xff]  }
 0x25c   :  { %v5329_v10 = vadd.f32 %v8581_v7, %v5286_v51  ;;  %v8000_v7 = vld [vmem:[#allocation3 + $0xb0c] ss:$16 sps:$4 sm:$0xff]  }
 0x25d   :  { %5819 = vmatpush1.bf16.msra.mxu0 %v7941_v58  ;;  %v5459_v58 = vpop.f32.mrf.mxu1  ;;  %v5370_v17 = vadd.f32 %v8583_v41, %v5327_v54  ;;  %v5374_v6 = vadd.f32 %v8595_v29, %v5331_v28  ;;  %v8004_v29 = vld [vmem:[#allocation3 + $0xde8] ss:$16 sps:$4 sm:$0xff]   ;;  %v8021_v51 = vld [vmem:[#allocation3 + $0xeac] ss:$16 sps:$4 sm:$0xff]  }
 0x25e   :  { %5792 = vmatpush2.bf16.msra.mxu1 %v7938_v57  ;;  %5820 = vmatprep.subr.bf16.mxu0 %v7949_v60  ;;  %v7989_v57 = vld [vmem:[#allocation3 + $0xc48] ss:$16 sps:$4 sm:$0xff]   ;;  %v7994_v60 = vld [vmem:[#allocation3 + $0xb2c] ss:$16 sps:$4 sm:$0xff]   ;;  %v5372_v61 = vadd.f32 %v8587_v19, %v5329_v10 }
 0x25f   :  { %5793 = vmatprep.subr.bf16.mxu1 %v7946_v59  ;;  %v5413_v0 = vadd.f32 %v5412_v30, %v5370_v17  ;;  %v8006_v19 = vld [vmem:[#allocation3 + $0xdec] ss:$16 sps:$4 sm:$0xff]   ;;  %v8007_v30 = vld [vmem:[#allocation3 + $0xee8] ss:$16 sps:$4 sm:$0xff]  }
 0x260   :  { %v8024_v28 = vld [vmem:[#allocation3 + $0xd8c] ss:$16 sps:$4 sm:$0xff]  }
 0x261   :  { %5821 = vmatpush1.bf16.msra.mxu0 %v7947_v63  ;;  %v5333_v63 = vadd.f32 %v5332_v22, %v5290_v26  ;;  %v5456_v37 = vadd.f32 %v5455_v40, %v5413_v0  ;;  %v8019_v26 = vld [vmem:[#allocation3 + $0xea8] ss:$16 sps:$4 sm:$0xff]  }
 0x262   :  { %5794 = vmatpush2.bf16.msra.mxu1 %v7944_v62  ;;  %5822 = vmatprep.subr.bf16.mxu0 %v7955_v2  ;;  %v7997_v62 = vld [vmem:[#allocation3 + $0xc2c] ss:$16 sps:$4 sm:$0xff]   ;;  %v7995_v2 = vld [vmem:[#allocation3 + $0xc28] ss:$16 sps:$4 sm:$0xff]  }
 0x263   :  { %5795 = vmatprep.subr.bf16.mxu1 %v7952_v1  ;;  %v7992_v1 = vld [vmem:[#allocation3 + $0xb28] ss:$16 sps:$4 sm:$0xff]  }
 0x265   :  { %5823 = vmatpush1.bf16.msra.mxu0 %v7953_v5 }
 0x266   :  { %5796 = vmatpush2.bf16.msra.mxu1 %v7950_v3  ;;  %5824 = vmatprep.subr.bf16.mxu0 %v7958_v8  ;;  %v5461_v3 = vpop.f32.mrf.mxu1  ;;  %v8003_v8 = vld [vmem:[#allocation3 + $0xc0c] ss:$16 sps:$4 sm:$0xff]  }
 0x267   :  { %5851 = vmatprep.subr.bf16.mxu1 %v7961_v9  ;;  %v5415_v9 = vadd.f32 %v5414_v36, %v5372_v61  ;;  %v8027_v61 = vld [vmem:[#allocation3 + $0xe8c] ss:$16 sps:$4 sm:$0xff]  }
 0x268   :  { %v5498_v59 = vpop.f32.mrf.mxu0 }
 0x269   :  { %5798 = vmatmul.mubr.bf16.vlgmr.msra.gmra.mxu1 %v8302_v20  ;;  %5825 = vmatpush2.bf16.msra.mxu0 %v7956_v11  ;;  %v5541_v41 = vpop.f32.mrf.mxu1  ;;  %v5376_v11 = vadd.f32 %v5375_v35, %v5333_v63  ;;  %v8009_v20 = vld [vmem:[#allocation3 + $0xeec] ss:$16 sps:$4 sm:$0xff]   ;;  %v5499_v22 = vadd.f32 %v5498_v59, %v5456_v37  ;;  %v8028_v37 = vld [vmem:[#allocation3 + $0xd68] ss:$16 sps:$4 sm:$0xff]  }
 0x26a   :  { %5852 = vmatpush1.bf16.msra.mxu1 %v7959_v13  ;;  %5826 = vmatprep.subr.bf16.mxu0 %v7964_v46  ;;  %v5500_v5 = vpop.f32.mrf.mxu0  ;;  %v5417_v13 = vadd.f32 %v5416_v44, %v5374_v6  ;;  %v8001_v46 = vld [vmem:[#allocation3 + $0xc08] ss:$16 sps:$4 sm:$0xff]   ;;  %v8033_v6 = vld [vmem:[#allocation3 + $0xe6c] ss:$16 sps:$4 sm:$0xff]  }
 0x26b   :  { %5853 = vmatprep.subr.bf16.mxu1 %v7967_v16  ;;  %5883 = vmatprep.mubr.bf16.mxu1 %v8303_v27  ;;  %v5542_v35 = vadd.f32 %v5541_v41, %v5499_v22  ;;  %v8043_v22 = vld [vmem:[#allocation3 + $0xe28] ss:$16 sps:$4 sm:$0xff]  }
 0x26c   :  { %v5502_v16 = vpop.f32.mrf.mxu0 }
 0x26d   :  { %5827 = vmatpush2.bf16.msra.mxu0 %v7962_v52  ;;  %v5458_v52 = vadd.f32 %v5457_v48, %v5415_v9 }
 0x26e   :  { %5854 = vmatpush1.bf16.msra.mxu1 %v7965_v21  ;;  %5828 = vmatprep.subr.bf16.mxu0 %v7970_v24  ;;  %v5419_v21 = vadd.f32 %v5418_v55, %v5376_v11  ;;  %v5543_v24 = vpop.f32.mrf.mxu1 }
 0x26f   :  { %5855 = vmatprep.subr.bf16.mxu1 %v7973_v56  ;;  %v5460_v56 = vadd.f32 %v5459_v58, %v5417_v13  ;;  %v5501_v27 = vadd.f32 %v5500_v5, %v5458_v52  ;;  %v8025_v5 = vld [vmem:[#allocation3 + $0xe88] ss:$16 sps:$4 sm:$0xff]   ;;  %v8045_v52 = vld [vmem:[#allocation3 + $0xe2c] ss:$16 sps:$4 sm:$0xff]  }
 0x270   :  { %v8031_v13 = vld [vmem:[#allocation3 + $0xe68] ss:$16 sps:$4 sm:$0xff]  }
 0x271   :  { %5829 = vmatpush2.bf16.msra.mxu0 %v7968_v4  ;;  %v5504_v4 = vpop.f32.mrf.mxu0  ;;  %v5503_v36 = vadd.f32 %v5502_v16, %v5460_v56  ;;  %v8034_v16 = vld [vmem:[#allocation3 + $0xd48] ss:$16 sps:$4 sm:$0xff]   ;;  %v8051_v56 = vld [vmem:[#allocation3 + $0xe0c] ss:$16 sps:$4 sm:$0xff]  }
 0x272   :  { %5856 = vmatpush1.bf16.msra.mxu1 %v7971_v32  ;;  %5830 = vmatprep.subr.bf16.mxu0 %v7976_v33  ;;  %v8012_v32 = vld [vmem:[#allocation3 + $0xdcc] ss:$16 sps:$4 sm:$0xff]  }
 0x273   :  { %5857 = vmatprep.subr.bf16.mxu1 %v7979_v34  ;;  %v8015_v33 = vld [vmem:[#allocation3 + $0xecc] ss:$16 sps:$4 sm:$0xff]   ;;  %v5462_v34 = vadd.f32 %v5461_v3, %v5419_v21  ;;  %v8022_v3 = vld [vmem:[#allocation3 + $0xd88] ss:$16 sps:$4 sm:$0xff]  }
 0x274   :  { %v8040_v21 = vld [vmem:[#allocation3 + $0xd28] ss:$16 sps:$4 sm:$0xff]  }
 0x275   :  { %5831 = vmatpush2.bf16.msra.mxu0 %v7974_v38  ;;  %v8611_v38 = vld [vmem:[#allocation7] sm:$0xf]  ;;  %v5505_v43 = vadd.f32 %v5504_v4, %v5462_v34  ;;  %v8057_v4 = vld [vmem:[#allocation3 + $0x10ec] ss:$16 sps:$4 sm:$0xff]  }
 0x276   :  { %5858 = vmatpush1.bf16.msra.mxu1 %v7977_v39  ;;  %5832 = vmatprep.subr.bf16.mxu0 %v7982_v42  ;;  %v5545_v39 = vpop.f32.mrf.mxu1  ;;  %v8304_v42 = vld [vmem:[%s8682_s0 + $0x28] ss:$100 sps:$4 sm:$0xff]   ;;  %v6165_v48 = vrot.slane %v8611_v38, %v890_v18  ;;  %v6169_v10 = vrot.slane %v8611_v38, %v894_v23 }
 0x277   :  { %5859 = vmatprep.subr.bf16.mxu1 %v7985_v15  ;;  %v5544_v15 = vadd.f32 %v5543_v24, %v5501_v27  ;;  %v5546_v53 = vadd.f32 %v5545_v39, %v5503_v36  ;;  %v8048_v24 = vld [vmem:[#allocation3 + $0xd0c] ss:$16 sps:$4 sm:$0xff]   ;;  %v8046_v27 = vld [vmem:[#allocation3 + $0xd08] ss:$16 sps:$4 sm:$0xff]  }
 0x278   :  { %v8060_v34 = vld [vmem:[#allocation3 + $0xfcc] ss:$16 sps:$4 sm:$0xff]   ;;  %v8058_v39 = vld [vmem:[#allocation3 + $0xfc8] ss:$16 sps:$4 sm:$0xff]  }
 0x279   :  { %5833 = vmatpush2.bf16.msra.mxu0 %v7980_v45  ;;  %v8010_v45 = vld [vmem:[#allocation3 + $0xdc8] ss:$16 sps:$4 sm:$0xff]   ;;  %v8306_v36 = vld [vmem:[%s8682_s0 + $0x30] ss:$100 sps:$4 sm:$0xff]  }
 0x27a   :  { %5860 = vmatpush1.bf16.msra.mxu1 %v7983_v47  ;;  %5834 = vmatprep.subr.bf16.mxu0 %v7988_v49  ;;  %v8013_v47 = vld [vmem:[#allocation3 + $0xec8] ss:$16 sps:$4 sm:$0xff]  }
 0x27b   :  { %5861 = vmatprep.subr.bf16.mxu1 %v7991_v50  ;;  %v8018_v50 = vld [vmem:[#allocation3 + $0xdac] ss:$16 sps:$4 sm:$0xff]  }
 0x27d   :  { %5835 = vmatpush2.bf16.msra.mxu0 %v7986_v25  ;;  %v8305_v25 = vld [vmem:[%s8682_s0 + $0x3c] ss:$100 sps:$4 sm:$0xff]  }
 0x27e   :  { %5862 = vmatpush1.bf16.msra.mxu1 %v7989_v57  ;;  %5836 = vmatprep.subr.bf16.mxu0 %v7994_v60  ;;  %v5547_v57 = vpop.f32.mrf.mxu1 }
 0x27f   :  { %5863 = vmatprep.subr.bf16.mxu1 %v7997_v62  ;;  %v5548_v18 = vadd.f32 %v5547_v57, %v5505_v43  ;;  %v8016_v62 = vld [vmem:[#allocation3 + $0xda8] ss:$16 sps:$4 sm:$0xff]  }
 0x280   :  { %v8307_v43 = vld [vmem:[%s8682_s0 + $0x44] ss:$100 sps:$4 sm:$0xff]  }
 0x281   :  { %5837 = vmatpush2.bf16.msra.mxu0 %v7992_v1  ;;  %v8082_v57 = vld [vmem:[#allocation3 + $0xf48] ss:$16 sps:$4 sm:$0xff]  }
 0x282   :  { %5864 = vmatpush1.bf16.msra.mxu1 %v7995_v2  ;;  %5838 = vmatprep.subr.bf16.mxu0 %v8000_v7 }
 0x283   :  { %5865 = vmatprep.subr.bf16.mxu1 %v8003_v8  ;;  %v8030_v8 = vld [vmem:[#allocation3 + $0xd6c] ss:$16 sps:$4 sm:$0xff]  }
 0x285   :  { %5839 = vmatpush2.bf16.msra.mxu0 %v7998_v14  ;;  %v8036_v14 = vld [vmem:[#allocation3 + $0xd4c] ss:$16 sps:$4 sm:$0xff]  }
 0x286   :  { %5866 = vmatpush1.bf16.msra.mxu1 %v8001_v46  ;;  %5894 = vmatprep.subr.bf16.mxu0 %v8009_v20  ;;  %v8039_v46 = vld [vmem:[#allocation3 + $0xe4c] ss:$16 sps:$4 sm:$0xff]  }
 0x287   :  { %5867 = vmatprep.subr.bf16.mxu1 %v8006_v19  ;;  %v8037_v19 = vld [vmem:[#allocation3 + $0xe48] ss:$16 sps:$4 sm:$0xff]   ;;  %v8042_v20 = vld [vmem:[#allocation3 + $0xd2c] ss:$16 sps:$4 sm:$0xff]  }
 0x288   :  { %v5584_v40 = vpop.f32.mrf.mxu0  ;;  %5841 = vmatmul.mubr.bf16.vlgmr.msra.gmra.mxu0 %v8304_v42  ;;  %v8066_v42 = vld [vmem:[#allocation3 + $0xfac] ss:$16 sps:$4 sm:$0xff]  }
 0x289   :  { %v5585_v44 = vadd.f32 %v5584_v40, %v5542_v35  ;;  %5895 = vmatpush1.bf16.msra.mxu0 %v8007_v30  ;;  %5926 = vmatprep.mubr.bf16.mxu0 %v8305_v25  ;;  %v8054_v30 = vld [vmem:[#allocation3 + $0xfec] ss:$16 sps:$4 sm:$0xff]   ;;  %v8061_v40 = vld [vmem:[#allocation3 + $0x10c8] ss:$16 sps:$4 sm:$0xff]  }
 0x28a   :  { %5868 = vmatpush2.bf16.msra.mxu1 %v8004_v29  ;;  %v5586_v49 = vpop.f32.mrf.mxu0  ;;  %5896 = vmatprep.subr.bf16.mxu0 %v8015_v33  ;;  %v8049_v29 = vld [vmem:[#allocation3 + $0xe08] ss:$16 sps:$4 sm:$0xff]   ;;  %v8063_v35 = vld [vmem:[#allocation3 + $0x10cc] ss:$16 sps:$4 sm:$0xff]  }
 0x28b   :  { %5869 = vmatprep.subr.bf16.mxu1 %v8012_v32  ;;  %v6152_v54 = vmax.f32 %v5585_v44, 0.0  ;;  %v5587_v55 = vadd.f32 %v5586_v49, %v5544_v15  ;;  %v8052_v32 = vld [vmem:[#allocation3 + $0xfe8] ss:$16 sps:$4 sm:$0xff]   ;;  %v8069_v15 = vld [vmem:[#allocation3 + $0x10ac] ss:$16 sps:$4 sm:$0xff]  }
 0x28c   :  { %v5588_v58 = vpop.f32.mrf.mxu0  ;;  %v8055_v33 = vld [vmem:[#allocation3 + $0x10e8] ss:$16 sps:$4 sm:$0xff]   ;;  %v8087_v25 = vld [vmem:[#allocation3 + $0x104c] ss:$16 sps:$4 sm:$0xff]  }
 0x28d   :  { %v6153_v59 = vmax.f32 %v5587_v55, 0.0  ;;  %v5589_v60 = vadd.f32 %v5588_v58, %v5546_v53  ;;  %5897 = vmatpush1.bf16.msra.mxu0 %v8013_v47  ;;  %v6182_v23 = vmul.f32 %v6165_v48, %v6152_v54  ;;  %v8064_v44 = vld [vmem:[#allocation3 + $0xfa8] ss:$16 sps:$4 sm:$0xff]   ;;  %v8072_v47 = vld [vmem:[#allocation3 + $0xf8c] ss:$16 sps:$4 sm:$0xff]  }
 0x28e   :  { %5870 = vmatpush2.bf16.msra.mxu1 %v8010_v45  ;;  %v5590_v17 = vpop.f32.mrf.mxu0  ;;  %5898 = vmatprep.subr.bf16.mxu0 %v8021_v51  ;;  %v8067_v45 = vld [vmem:[#allocation3 + $0x10a8] ss:$16 sps:$4 sm:$0xff]   ;;  %v8078_v51 = vld [vmem:[#allocation3 + $0xf6c] ss:$16 sps:$4 sm:$0xff]  }
 0x28f   :  { %5871 = vmatprep.subr.bf16.mxu1 %v8018_v50  ;;  %v6183_v63 = vmul.f32 %v6169_v10, %v6153_v59  ;;  %v6156_v0 = vmax.f32 %v5589_v60, 0.0  ;;  %v5591_v1 = vadd.f32 %v5590_v17, %v5548_v18  ;;  %v8070_v49 = vld [vmem:[#allocation3 + $0xf88] ss:$16 sps:$4 sm:$0xff]   ;;  %v8081_v53 = vld [vmem:[#allocation3 + $0x106c] ss:$16 sps:$4 sm:$0xff]  }
 0x290   :  { %v8073_v50 = vld [vmem:[#allocation3 + $0x1088] ss:$16 sps:$4 sm:$0xff]   ;;  %v8090_v18 = vld [vmem:[#allocation3 + $0xf2c] ss:$16 sps:$4 sm:$0xff]  }
 0x291   :  { %v6157_v2 = vmax.f32 %v5591_v1, 0.0  ;;  %5899 = vmatpush1.bf16.msra.mxu0 %v8019_v26  ;;  %v8625_v7 = vadd.f32 %v6183_v63, %v6182_v23  ;;  %v6186_v9 = vmul.f32 %v6165_v48, %v6156_v0  ;;  %v8075_v48 = vld [vmem:[#allocation3 + $0x108c] ss:$16 sps:$4 sm:$0xff]   ;;  %v8076_v54 = vld [vmem:[#allocation3 + $0xf68] ss:$16 sps:$4 sm:$0xff]  }
 0x292   :  { %5872 = vmatpush2.bf16.msra.mxu1 %v8016_v62  ;;  %5900 = vmatprep.subr.bf16.mxu0 %v8027_v61  ;;  %v8079_v55 = vld [vmem:[#allocation3 + $0x1068] ss:$16 sps:$4 sm:$0xff]   ;;  %v8093_v59 = vld [vmem:[#allocation3 + $0x102c] ss:$16 sps:$4 sm:$0xff]  }
 0x293   :  { %5873 = vmatprep.subr.bf16.mxu1 %v8024_v28  ;;  %v6187_v41 = vmul.f32 %v6169_v10, %v6157_v2  ;;  %v8084_v10 = vld [vmem:[#allocation3 + $0xf4c] ss:$16 sps:$4 sm:$0xff]   ;;  %v8085_v58 = vld [vmem:[#allocation3 + $0x1048] ss:$16 sps:$4 sm:$0xff]  }
 0x294   :  { %v8088_v60 = vld [vmem:[#allocation3 + $0xf28] ss:$16 sps:$4 sm:$0xff]   ;;  %v8096_v26 = vld [vmem:[#allocation3 + $0xf0c] ss:$16 sps:$4 sm:$0xff]  }
 0x295   :  { %v8627_v11 = vadd.f32 %v6187_v41, %v6186_v9  ;;  %5901 = vmatpush1.bf16.msra.mxu0 %v8025_v5  ;;  %v8091_v62 = vld [vmem:[#allocation3 + $0x1028] ss:$16 sps:$4 sm:$0xff]   ;;  %v8099_v17 = vld [vmem:[#allocation3 + $0x100c] ss:$16 sps:$4 sm:$0xff]  }
 0x296   :  { %5874 = vmatpush2.bf16.msra.mxu1 %v8022_v3  ;;  %5902 = vmatprep.subr.bf16.mxu0 %v8033_v6  ;;  %v8094_v28 = vld [vmem:[#allocation3 + $0xf08] ss:$16 sps:$4 sm:$0xff]   ;;  %v8102_v23 = vld [vmem:[#allocation3 + $0x11ec] ss:$16 sps:$4 sm:$0xff]  }
 0x297   :  { %5875 = vmatprep.subr.bf16.mxu1 %v8030_v8  ;;  %v8097_v61 = vld [vmem:[#allocation3 + $0x1008] ss:$16 sps:$4 sm:$0xff]   ;;  %v8105_v63 = vld [vmem:[#allocation3 + $0x12ec] ss:$16 sps:$4 sm:$0xff]  }
 0x298   :  { %v8100_v0 = vld [vmem:[#allocation3 + $0x11e8] ss:$16 sps:$4 sm:$0xff]   ;;  %v8108_v2 = vld [vmem:[#allocation3 + $0x11cc] ss:$16 sps:$4 sm:$0xff]  }
 0x299   :  { %5903 = vmatpush1.bf16.msra.mxu0 %v8031_v13  ;;  %v8103_v1 = vld [vmem:[#allocation3 + $0x12e8] ss:$16 sps:$4 sm:$0xff]   ;;  %v8111_v3 = vld [vmem:[#allocation3 + $0x12cc] ss:$16 sps:$4 sm:$0xff]  }
 0x29a   :  { %5876 = vmatpush2.bf16.msra.mxu1 %v8028_v37  ;;  %5904 = vmatprep.subr.bf16.mxu0 %v8039_v46  ;;  %v8308_v5 = vld [vmem:[%s8682_s0 + $0x38] ss:$100 sps:$4 sm:$0xff]   ;;  %v8309_v37 = vld [vmem:[%s8682_s0 + $0x4c] ss:$100 sps:$4 sm:$0xff]  }
 0x29b   :  { %5877 = vmatprep.subr.bf16.mxu1 %v8036_v14  ;;  %v8106_v8 = vld [vmem:[#allocation3 + $0x11c8] ss:$16 sps:$4 sm:$0xff]   ;;  %v8114_v9 = vld [vmem:[#allocation3 + $0x11ac] ss:$16 sps:$4 sm:$0xff]  }
 0x29c   :  { %v8109_v6 = vld [vmem:[#allocation3 + $0x12c8] ss:$16 sps:$4 sm:$0xff]   ;;  %v8117_v41 = vld [vmem:[#allocation3 + $0x12ac] ss:$16 sps:$4 sm:$0xff]  }
 0x29d   :  { %5905 = vmatpush1.bf16.msra.mxu0 %v8037_v19  ;;  %v8112_v13 = vld [vmem:[#allocation3 + $0x11a8] ss:$16 sps:$4 sm:$0xff]   ;;  %v8120_v46 = vld [vmem:[#allocation3 + $0x118c] ss:$16 sps:$4 sm:$0xff]  }
 0x29e   :  { %5878 = vmatpush2.bf16.msra.mxu1 %v8034_v16  ;;  %5906 = vmatprep.subr.bf16.mxu0 %v8045_v52  ;;  %v8115_v14 = vld [vmem:[#allocation3 + $0x12a8] ss:$16 sps:$4 sm:$0xff]   ;;  %v8123_v16 = vld [vmem:[#allocation3 + $0x128c] ss:$16 sps:$4 sm:$0xff]  }
 0x29f   :  { %5879 = vmatprep.subr.bf16.mxu1 %v8042_v20  ;;  %v8118_v19 = vld [vmem:[#allocation3 + $0x1188] ss:$16 sps:$4 sm:$0xff]   ;;  %v8126_v52 = vld [vmem:[#allocation3 + $0x116c] ss:$16 sps:$4 sm:$0xff]  }
 0x2a0   :  { %v8121_v20 = vld [vmem:[#allocation3 + $0x1288] ss:$16 sps:$4 sm:$0xff]  }
 0x2a1   :  { %5907 = vmatpush1.bf16.msra.mxu0 %v8043_v22  ;;  %v8124_v22 = vld [vmem:[#allocation3 + $0x1168] ss:$16 sps:$4 sm:$0xff]  }
 0x2a2   :  { %5880 = vmatpush2.bf16.msra.mxu1 %v8040_v21  ;;  %5908 = vmatprep.subr.bf16.mxu0 %v8051_v56  ;;  %v8129_v21 = vld [vmem:[#allocation3 + $0x126c] ss:$16 sps:$4 sm:$0xff]  }
 0x2a3   :  { %5881 = vmatprep.subr.bf16.mxu1 %v8048_v24  ;;  %v8127_v24 = vld [vmem:[#allocation3 + $0x1268] ss:$16 sps:$4 sm:$0xff]   ;;  %v8132_v56 = vld [vmem:[#allocation3 + $0x114c] ss:$16 sps:$4 sm:$0xff]  }
 0x2a5   :  { %5909 = vmatpush1.bf16.msra.mxu0 %v8049_v29  ;;  %v8130_v29 = vld [vmem:[#allocation3 + $0x1148] ss:$16 sps:$4 sm:$0xff]  }
 0x2a6   :  { %5882 = vmatpush2.bf16.msra.mxu1 %v8046_v27  ;;  %5910 = vmatprep.subr.bf16.mxu0 %v8054_v30  ;;  %v8135_v27 = vld [vmem:[#allocation3 + $0x124c] ss:$16 sps:$4 sm:$0xff]   ;;  %v8133_v30 = vld [vmem:[#allocation3 + $0x1248] ss:$16 sps:$4 sm:$0xff]  }
 0x2a7   :  { %5937 = vmatprep.subr.bf16.mxu1 %v8057_v4  ;;  %v8138_v4 = vld [vmem:[#allocation3 + $0x112c] ss:$16 sps:$4 sm:$0xff]  }
 0x2a9   :  { %5884 = vmatmul.mubr.bf16.vlgmr.msra.gmra.mxu1 %v8306_v36  ;;  %5911 = vmatpush2.bf16.msra.mxu0 %v8052_v32  ;;  %v8141_v32 = vld [vmem:[#allocation3 + $0x122c] ss:$16 sps:$4 sm:$0xff]  }
 0x2aa   :  { %5938 = vmatpush1.bf16.msra.mxu1 %v8055_v33  ;;  %5912 = vmatprep.subr.bf16.mxu0 %v8060_v34  ;;  %v8136_v33 = vld [vmem:[#allocation3 + $0x1128] ss:$16 sps:$4 sm:$0xff]   ;;  %v8147_v36 = vld [vmem:[#allocation3 + $0x120c] ss:$16 sps:$4 sm:$0xff]  }
 0x2ab   :  { %5939 = vmatprep.subr.bf16.mxu1 %v8063_v35  ;;  %5969 = vmatprep.mubr.bf16.mxu1 %v8307_v43  ;;  %v8139_v34 = vld [vmem:[#allocation3 + $0x1228] ss:$16 sps:$4 sm:$0xff]   ;;  %v8144_v35 = vld [vmem:[#allocation3 + $0x110c] ss:$16 sps:$4 sm:$0xff]  }
 0x2ac   :  { %v8148_v43 = vld [vmem:[#allocation3 + $0x13e8] ss:$16 sps:$4 sm:$0xff]  }
 0x2ad   :  { %5913 = vmatpush2.bf16.msra.mxu0 %v8058_v39  ;;  %v8142_v39 = vld [vmem:[#allocation3 + $0x1108] ss:$16 sps:$4 sm:$0xff]  }
 0x2ae   :  { %5940 = vmatpush1.bf16.msra.mxu1 %v8061_v40  ;;  %5914 = vmatprep.subr.bf16.mxu0 %v8066_v42  ;;  %v8145_v40 = vld [vmem:[#allocation3 + $0x1208] ss:$16 sps:$4 sm:$0xff]   ;;  %v8150_v42 = vld [vmem:[#allocation3 + $0x13ec] ss:$16 sps:$4 sm:$0xff]  }
 0x2af   :  { %5941 = vmatprep.subr.bf16.mxu1 %v8069_v15  ;;  %v8153_v15 = vld [vmem:[#allocation3 + $0x14ec] ss:$16 sps:$4 sm:$0xff]  }
 0x2b1   :  { %5915 = vmatpush2.bf16.msra.mxu0 %v8064_v44  ;;  %v8151_v44 = vld [vmem:[#allocation3 + $0x14e8] ss:$16 sps:$4 sm:$0xff]  }
 0x2b2   :  { %5942 = vmatpush1.bf16.msra.mxu1 %v8067_v45  ;;  %5916 = vmatprep.subr.bf16.mxu0 %v8072_v47  ;;  %v8156_v45 = vld [vmem:[#allocation3 + $0x13cc] ss:$16 sps:$4 sm:$0xff]  }
 0x2b3   :  { %5943 = vmatprep.subr.bf16.mxu1 %v8075_v48  ;;  %v8159_v47 = vld [vmem:[#allocation3 + $0x14cc] ss:$16 sps:$4 sm:$0xff]  }
 0x2b4   :  { %v8310_v48 = vld [vmem:[%s8682_s0 + $0x40] ss:$100 sps:$4 sm:$0xff]  }
 0x2b5   :  { %5917 = vmatpush2.bf16.msra.mxu0 %v8070_v49  ;;  %v8154_v49 = vld [vmem:[#allocation3 + $0x13c8] ss:$16 sps:$4 sm:$0xff]  }
 0x2b6   :  { %5944 = vmatpush1.bf16.msra.mxu1 %v8073_v50  ;;  %5918 = vmatprep.subr.bf16.mxu0 %v8078_v51  ;;  %v8157_v50 = vld [vmem:[#allocation3 + $0x14c8] ss:$16 sps:$4 sm:$0xff]   ;;  %v8162_v51 = vld [vmem:[#allocation3 + $0x13ac] ss:$16 sps:$4 sm:$0xff]  }
 0x2b7   :  { %5945 = vmatprep.subr.bf16.mxu1 %v8081_v53  ;;  %v8165_v53 = vld [vmem:[#allocation3 + $0x14ac] ss:$16 sps:$4 sm:$0xff]  }
 0x2b9   :  { %5919 = vmatpush2.bf16.msra.mxu0 %v8076_v54  ;;  %v8311_v54 = vld [vmem:[%s8682_s0 + $0x54] ss:$100 sps:$4 sm:$0xff]  }
 0x2ba   :  { %5946 = vmatpush1.bf16.msra.mxu1 %v8079_v55  ;;  %5920 = vmatprep.subr.bf16.mxu0 %v8084_v10  ;;  %v8160_v55 = vld [vmem:[#allocation3 + $0x13a8] ss:$16 sps:$4 sm:$0xff]  }
 0x2bb   :  { %5947 = vmatprep.subr.bf16.mxu1 %v8087_v25  ;;  %v8163_v10 = vld [vmem:[#allocation3 + $0x14a8] ss:$16 sps:$4 sm:$0xff]   ;;  %v8168_v25 = vld [vmem:[#allocation3 + $0x138c] ss:$16 sps:$4 sm:$0xff]  }
 0x2bd   :  { %5921 = vmatpush2.bf16.msra.mxu0 %v8082_v57  ;;  %v8171_v57 = vld [vmem:[#allocation3 + $0x148c] ss:$16 sps:$4 sm:$0xff]  }
 0x2be   :  { %5948 = vmatpush1.bf16.msra.mxu1 %v8085_v58  ;;  %5922 = vmatprep.subr.bf16.mxu0 %v8090_v18  ;;  %v8166_v58 = vld [vmem:[#allocation3 + $0x1388] ss:$16 sps:$4 sm:$0xff]  }
 0x2bf   :  { %5949 = vmatprep.subr.bf16.mxu1 %v8093_v59  ;;  %v8169_v18 = vld [vmem:[#allocation3 + $0x1488] ss:$16 sps:$4 sm:$0xff]   ;;  %v8174_v59 = vld [vmem:[#allocation3 + $0x136c] ss:$16 sps:$4 sm:$0xff]  }
 0x2c1   :  { %5923 = vmatpush2.bf16.msra.mxu0 %v8088_v60  ;;  %v8177_v60 = vld [vmem:[#allocation3 + $0x146c] ss:$16 sps:$4 sm:$0xff]  }
 0x2c2   :  { %5950 = vmatpush1.bf16.msra.mxu1 %v8091_v62  ;;  %5924 = vmatprep.subr.bf16.mxu0 %v8096_v26  ;;  %v8172_v62 = vld [vmem:[#allocation3 + $0x1368] ss:$16 sps:$4 sm:$0xff]  }
 0x2c3   :  { %5951 = vmatprep.subr.bf16.mxu1 %v8099_v17  ;;  %v8175_v26 = vld [vmem:[#allocation3 + $0x1468] ss:$16 sps:$4 sm:$0xff]   ;;  %v8180_v17 = vld [vmem:[#allocation3 + $0x134c] ss:$16 sps:$4 sm:$0xff]  }
 0x2c5   :  { %5925 = vmatpush2.bf16.msra.mxu0 %v8094_v28  ;;  %v8183_v28 = vld [vmem:[#allocation3 + $0x144c] ss:$16 sps:$4 sm:$0xff]  }
 0x2c6   :  { %5952 = vmatpush1.bf16.msra.mxu1 %v8097_v61  ;;  %5980 = vmatprep.subr.bf16.mxu0 %v8105_v63  ;;  %v8178_v61 = vld [vmem:[#allocation3 + $0x1348] ss:$16 sps:$4 sm:$0xff]   ;;  %v8186_v63 = vld [vmem:[#allocation3 + $0x132c] ss:$16 sps:$4 sm:$0xff]  }
 0x2c7   :  { %5953 = vmatprep.subr.bf16.mxu1 %v8102_v23  ;;  %v8181_v23 = vld [vmem:[#allocation3 + $0x1448] ss:$16 sps:$4 sm:$0xff]  }
 0x2c8   :  { %5927 = vmatmul.mubr.bf16.vlgmr.msra.gmra.mxu0 %v8308_v5  ;;  %v8195_v5 = vld [vmem:[#allocation3 + $0x140c] ss:$16 sps:$4 sm:$0xff]  }
 0x2c9   :  { %5981 = vmatpush1.bf16.msra.mxu0 %v8103_v1  ;;  %6012 = vmatprep.mubr.bf16.mxu0 %v8309_v37  ;;  %v8184_v1 = vld [vmem:[#allocation3 + $0x1328] ss:$16 sps:$4 sm:$0xff]  }
 0x2ca   :  { %5954 = vmatpush2.bf16.msra.mxu1 %v8100_v0  ;;  %5982 = vmatprep.subr.bf16.mxu0 %v8111_v3  ;;  %v8189_v0 = vld [vmem:[#allocation3 + $0x142c] ss:$16 sps:$4 sm:$0xff]   ;;  %v8196_v37 = vld [vmem:[#allocation3 + $0x15e8] ss:$16 sps:$4 sm:$0xff]  }
 0x2cb   :  { %5955 = vmatprep.subr.bf16.mxu1 %v8108_v2  ;;  %v8187_v2 = vld [vmem:[#allocation3 + $0x1428] ss:$16 sps:$4 sm:$0xff]   ;;  %v8192_v3 = vld [vmem:[#allocation3 + $0x130c] ss:$16 sps:$4 sm:$0xff]  }
 0x2cd   :  { %5983 = vmatpush1.bf16.msra.mxu0 %v8109_v6  ;;  %v8193_v6 = vld [vmem:[#allocation3 + $0x1408] ss:$16 sps:$4 sm:$0xff]  }
 0x2ce   :  { %5956 = vmatpush2.bf16.msra.mxu1 %v8106_v8  ;;  %5984 = vmatprep.subr.bf16.mxu0 %v8117_v41  ;;  %v8190_v8 = vld [vmem:[#allocation3 + $0x1308] ss:$16 sps:$4 sm:$0xff]   ;;  %v8201_v41 = vld [vmem:[#allocation3 + $0x16ec] ss:$16 sps:$4 sm:$0xff]  }
 0x2cf   :  { %5957 = vmatprep.subr.bf16.mxu1 %v8114_v9  ;;  %v8198_v9 = vld [vmem:[#allocation3 + $0x15ec] ss:$16 sps:$4 sm:$0xff]  }
 0x2d1   :  { %5985 = vmatpush1.bf16.msra.mxu0 %v8115_v14  ;;  %v8204_v14 = vld [vmem:[#allocation3 + $0x15cc] ss:$16 sps:$4 sm:$0xff]  }
 0x2d2   :  { %5958 = vmatpush2.bf16.msra.mxu1 %v8112_v13  ;;  %5986 = vmatprep.subr.bf16.mxu0 %v8123_v16  ;;  %v8199_v13 = vld [vmem:[#allocation3 + $0x16e8] ss:$16 sps:$4 sm:$0xff]  }
 0x2d3   :  { %5959 = vmatprep.subr.bf16.mxu1 %v8120_v46  ;;  %v8207_v46 = vld [vmem:[#allocation3 + $0x16cc] ss:$16 sps:$4 sm:$0xff]  }
 0x2d4   :  { %v8312_v16 = vld [vmem:[%s8682_s0 + $0x48] ss:$100 sps:$4 sm:$0xff]  }
 0x2d5   :  { %5987 = vmatpush1.bf16.msra.mxu0 %v8121_v20  ;;  %v8205_v20 = vld [vmem:[#allocation3 + $0x16c8] ss:$16 sps:$4 sm:$0xff]  }
 0x2d6   :  { %5960 = vmatpush2.bf16.msra.mxu1 %v8118_v19  ;;  %5988 = vmatprep.subr.bf16.mxu0 %v8129_v21  ;;  %v8202_v19 = vld [vmem:[#allocation3 + $0x15c8] ss:$16 sps:$4 sm:$0xff]   ;;  %v8213_v21 = vld [vmem:[#allocation3 + $0x16ac] ss:$16 sps:$4 sm:$0xff]  }
 0x2d7   :  { %5961 = vmatprep.subr.bf16.mxu1 %v8126_v52  ;;  %v8210_v52 = vld [vmem:[#allocation3 + $0x15ac] ss:$16 sps:$4 sm:$0xff]  }
 0x2d9   :  { %5989 = vmatpush1.bf16.msra.mxu0 %v8127_v24  ;;  %v8208_v24 = vld [vmem:[#allocation3 + $0x15a8] ss:$16 sps:$4 sm:$0xff]  }
 0x2da   :  { %5962 = vmatpush2.bf16.msra.mxu1 %v8124_v22  ;;  %5990 = vmatprep.subr.bf16.mxu0 %v8135_v27  ;;  %v8313_v22 = vld [vmem:[%s8682_s0 + $0x5c] ss:$100 sps:$4 sm:$0xff]  }
 0x2db   :  { %5963 = vmatprep.subr.bf16.mxu1 %v8132_v56  ;;  %v8211_v56 = vld [vmem:[#allocation3 + $0x16a8] ss:$16 sps:$4 sm:$0xff]   ;;  %v8216_v27 = vld [vmem:[#allocation3 + $0x158c] ss:$16 sps:$4 sm:$0xff]  }
 0x2dd   :  { %5991 = vmatpush1.bf16.msra.mxu0 %v8133_v30  ;;  %v8214_v30 = vld [vmem:[#allocation3 + $0x1588] ss:$16 sps:$4 sm:$0xff]  }
 0x2de   :  { %5964 = vmatpush2.bf16.msra.mxu1 %v8130_v29  ;;  %5992 = vmatprep.subr.bf16.mxu0 %v8141_v32  ;;  %v8219_v29 = vld [vmem:[#allocation3 + $0x168c] ss:$16 sps:$4 sm:$0xff]  }
 0x2df   :  { %5965 = vmatprep.subr.bf16.mxu1 %v8138_v4  ;;  %v8217_v4 = vld [vmem:[#allocation3 + $0x1688] ss:$16 sps:$4 sm:$0xff]   ;;  %v8222_v32 = vld [vmem:[#allocation3 + $0x156c] ss:$16 sps:$4 sm:$0xff]  }
 0x2e1   :  { %5993 = vmatpush1.bf16.msra.mxu0 %v8139_v34  ;;  %v8220_v34 = vld [vmem:[#allocation3 + $0x1568] ss:$16 sps:$4 sm:$0xff]  }
 0x2e2   :  { %5966 = vmatpush2.bf16.msra.mxu1 %v8136_v33  ;;  %5994 = vmatprep.subr.bf16.mxu0 %v8147_v36  ;;  %v8225_v33 = vld [vmem:[#allocation3 + $0x166c] ss:$16 sps:$4 sm:$0xff]  }
 0x2e3   :  { %5967 = vmatprep.subr.bf16.mxu1 %v8144_v35  ;;  %v8223_v35 = vld [vmem:[#allocation3 + $0x1668] ss:$16 sps:$4 sm:$0xff]   ;;  %v8228_v36 = vld [vmem:[#allocation3 + $0x154c] ss:$16 sps:$4 sm:$0xff]  }
 0x2e5   :  { %5995 = vmatpush1.bf16.msra.mxu0 %v8145_v40  ;;  %v8226_v40 = vld [vmem:[#allocation3 + $0x1548] ss:$16 sps:$4 sm:$0xff]  }
 0x2e6   :  { %5968 = vmatpush2.bf16.msra.mxu1 %v8142_v39  ;;  %5996 = vmatprep.subr.bf16.mxu0 %v8150_v42  ;;  %v8231_v39 = vld [vmem:[#allocation3 + $0x164c] ss:$16 sps:$4 sm:$0xff]   ;;  %v8229_v42 = vld [vmem:[#allocation3 + $0x1648] ss:$16 sps:$4 sm:$0xff]  }
 0x2e7   :  { %6023 = vmatprep.subr.bf16.mxu1 %v8153_v15  ;;  %v8234_v15 = vld [vmem:[#allocation3 + $0x152c] ss:$16 sps:$4 sm:$0xff]  }
 0x2e9   :  { %5970 = vmatmul.mubr.bf16.vlgmr.msra.gmra.mxu1 %v8310_v48  ;;  %5997 = vmatpush2.bf16.msra.mxu0 %v8148_v43  ;;  %v8237_v43 = vld [vmem:[#allocation3 + $0x162c] ss:$16 sps:$4 sm:$0xff]  }
 0x2ea   :  { %6024 = vmatpush1.bf16.msra.mxu1 %v8151_v44  ;;  %5998 = vmatprep.subr.bf16.mxu0 %v8156_v45  ;;  %v8232_v44 = vld [vmem:[#allocation3 + $0x1528] ss:$16 sps:$4 sm:$0xff]   ;;  %v8243_v48 = vld [vmem:[#allocation3 + $0x160c] ss:$16 sps:$4 sm:$0xff]  }
 0x2eb   :  { %6025 = vmatprep.subr.bf16.mxu1 %v8159_v47  ;;  %6055 = vmatprep.mubr.bf16.mxu1 %v8311_v54  ;;  %v8235_v45 = vld [vmem:[#allocation3 + $0x1628] ss:$16 sps:$4 sm:$0xff]   ;;  %v8240_v47 = vld [vmem:[#allocation3 + $0x150c] ss:$16 sps:$4 sm:$0xff]  }
 0x2ec   :  { %v8244_v54 = vld [vmem:[#allocation3 + $0x17e8] ss:$16 sps:$4 sm:$0xff]  }
 0x2ed   :  { %5999 = vmatpush2.bf16.msra.mxu0 %v8154_v49  ;;  %v8238_v49 = vld [vmem:[#allocation3 + $0x1508] ss:$16 sps:$4 sm:$0xff]  }
 0x2ee   :  { %6026 = vmatpush1.bf16.msra.mxu1 %v8157_v50  ;;  %6000 = vmatprep.subr.bf16.mxu0 %v8162_v51  ;;  %v8241_v50 = vld [vmem:[#allocation3 + $0x1608] ss:$16 sps:$4 sm:$0xff]   ;;  %v8246_v51 = vld [vmem:[#allocation3 + $0x17ec] ss:$16 sps:$4 sm:$0xff]  }
 0x2ef   :  { %6027 = vmatprep.subr.bf16.mxu1 %v8165_v53  ;;  %v8249_v53 = vld [vmem:[#allocation3 + $0x18ec] ss:$16 sps:$4 sm:$0xff]  }
 0x2f1   :  { %6001 = vmatpush2.bf16.msra.mxu0 %v8160_v55  ;;  %v8247_v55 = vld [vmem:[#allocation3 + $0x18e8] ss:$16 sps:$4 sm:$0xff]  }
 0x2f2   :  { %6028 = vmatpush1.bf16.msra.mxu1 %v8163_v10  ;;  %6002 = vmatprep.subr.bf16.mxu0 %v8168_v25  ;;  %v8252_v10 = vld [vmem:[#allocation3 + $0x17cc] ss:$16 sps:$4 sm:$0xff]  }
 0x2f3   :  { %6029 = vmatprep.subr.bf16.mxu1 %v8171_v57  ;;  %v8255_v25 = vld [vmem:[#allocation3 + $0x18cc] ss:$16 sps:$4 sm:$0xff]  }
 0x2f4   :  { %v8314_v57 = vld [vmem:[%s8682_s0 + $0x50] ss:$100 sps:$4 sm:$0xff]  }
 0x2f5   :  { %6003 = vmatpush2.bf16.msra.mxu0 %v8166_v58  ;;  %v8250_v58 = vld [vmem:[#allocation3 + $0x17c8] ss:$16 sps:$4 sm:$0xff]  }
 0x2f6   :  { %6030 = vmatpush1.bf16.msra.mxu1 %v8169_v18  ;;  %6004 = vmatprep.subr.bf16.mxu0 %v8174_v59  ;;  %v8253_v18 = vld [vmem:[#allocation3 + $0x18c8] ss:$16 sps:$4 sm:$0xff]   ;;  %v8258_v59 = vld [vmem:[#allocation3 + $0x17ac] ss:$16 sps:$4 sm:$0xff]  }
 0x2f7   :  { %6031 = vmatprep.subr.bf16.mxu1 %v8177_v60  ;;  %v8261_v60 = vld [vmem:[#allocation3 + $0x18ac] ss:$16 sps:$4 sm:$0xff]  }
 0x2f9   :  { %6005 = vmatpush2.bf16.msra.mxu0 %v8172_v62  ;;  %v8256_v62 = vld [vmem:[#allocation3 + $0x17a8] ss:$16 sps:$4 sm:$0xff]  }
 0x2fa   :  { %6032 = vmatpush1.bf16.msra.mxu1 %v8175_v26  ;;  %6006 = vmatprep.subr.bf16.mxu0 %v8180_v17  ;;  %v8259_v26 = vld [vmem:[#allocation3 + $0x18a8] ss:$16 sps:$4 sm:$0xff]   ;;  %v8264_v17 = vld [vmem:[#allocation3 + $0x178c] ss:$16 sps:$4 sm:$0xff]  }
 0x2fb   :  { %6033 = vmatprep.subr.bf16.mxu1 %v8183_v28  ;;  %v8267_v28 = vld [vmem:[#allocation3 + $0x188c] ss:$16 sps:$4 sm:$0xff]  }
 0x2fd   :  { %6007 = vmatpush2.bf16.msra.mxu0 %v8178_v61  ;;  %v8262_v61 = vld [vmem:[#allocation3 + $0x1788] ss:$16 sps:$4 sm:$0xff]  }
 0x2fe   :  { %6034 = vmatpush1.bf16.msra.mxu1 %v8181_v23  ;;  %6008 = vmatprep.subr.bf16.mxu0 %v8186_v63  ;;  %v8265_v23 = vld [vmem:[#allocation3 + $0x1888] ss:$16 sps:$4 sm:$0xff]   ;;  %v8270_v63 = vld [vmem:[#allocation3 + $0x176c] ss:$16 sps:$4 sm:$0xff]  }
 0x2ff   :  { %6035 = vmatprep.subr.bf16.mxu1 %v8189_v0  ;;  %v8273_v0 = vld [vmem:[#allocation3 + $0x186c] ss:$16 sps:$4 sm:$0xff]  }
 0x301   :  { %6009 = vmatpush2.bf16.msra.mxu0 %v8184_v1  ;;  %v8268_v1 = vld [vmem:[#allocation3 + $0x1768] ss:$16 sps:$4 sm:$0xff]  }
 0x302   :  { %6036 = vmatpush1.bf16.msra.mxu1 %v8187_v2  ;;  %6010 = vmatprep.subr.bf16.mxu0 %v8192_v3  ;;  %v8276_v2 = vld [vmem:[#allocation3 + $0x174c] ss:$16 sps:$4 sm:$0xff]  }
 0x303   :  { %6037 = vmatprep.subr.bf16.mxu1 %v8195_v5  ;;  %v8279_v3 = vld [vmem:[#allocation3 + $0x184c] ss:$16 sps:$4 sm:$0xff]   ;;  %v8274_v5 = vld [vmem:[#allocation3 + $0x1748] ss:$16 sps:$4 sm:$0xff]  }
 0x305   :  { %6011 = vmatpush2.bf16.msra.mxu0 %v8190_v8  ;;  %v8277_v8 = vld [vmem:[#allocation3 + $0x1848] ss:$16 sps:$4 sm:$0xff]  }
 0x306   :  { %6038 = vmatpush1.bf16.msra.mxu1 %v8193_v6  ;;  %6066 = vmatprep.subr.bf16.mxu0 %v8201_v41  ;;  %v8282_v6 = vld [vmem:[#allocation3 + $0x172c] ss:$16 sps:$4 sm:$0xff]   ;;  %v8280_v41 = vld [vmem:[#allocation3 + $0x1728] ss:$16 sps:$4 sm:$0xff]  }
 0x307   :  { %6039 = vmatprep.subr.bf16.mxu1 %v8198_v9  ;;  %v8285_v9 = vld [vmem:[#allocation3 + $0x182c] ss:$16 sps:$4 sm:$0xff]  }
 0x308   :  { %6013 = vmatmul.mubr.bf16.vlgmr.msra.gmra.mxu0 %v8312_v16  ;;  %v8289_v16 = vld [vmem:[#allocation3 + $0x1808] ss:$16 sps:$4 sm:$0xff]  }
 0x309   :  { %6067 = vmatpush1.bf16.msra.mxu0 %v8199_v13  ;;  %6098 = vmatprep.mubr.bf16.mxu0 %v8313_v22  ;;  %v8288_v13 = vld [vmem:[#allocation3 + $0x170c] ss:$16 sps:$4 sm:$0xff]  }
 0x30a   :  { %6040 = vmatpush2.bf16.msra.mxu1 %v8196_v37  ;;  %6068 = vmatprep.subr.bf16.mxu0 %v8207_v46  ;;  %v8283_v37 = vld [vmem:[#allocation3 + $0x1828] ss:$16 sps:$4 sm:$0xff]  }
 0x30b   :  { %6041 = vmatprep.subr.bf16.mxu1 %v8204_v14  ;;  %v8291_v14 = vld [vmem:[#allocation3 + $0x180c] ss:$16 sps:$4 sm:$0xff]   ;;  %v8286_v46 = vld [vmem:[#allocation3 + $0x1708] ss:$16 sps:$4 sm:$0xff]  }
 0x30d   :  { %6069 = vmatpush1.bf16.msra.mxu0 %v8205_v20  ;;  %v8316_v20 = vld [vmem:[%s8682_s0 + $0x60] ss:$100 sps:$4 sm:$0xff]  }
 0x30e   :  { %6042 = vmatpush2.bf16.msra.mxu1 %v8202_v19  ;;  %6070 = vmatprep.subr.bf16.mxu0 %v8213_v21  ;;  %v8315_v19 = vld [vmem:[%s8682_s0 + $0x58] ss:$100 sps:$4 sm:$0xff]  }
 0x30f   :  { %6043 = vmatprep.subr.bf16.mxu1 %v8210_v52  ;;  %v5627_v52 = vpop.f32.mrf.mxu1 }
 0x311   :  { %6071 = vmatpush1.bf16.msra.mxu0 %v8211_v56  ;;  %v5629_v21 = vpop.f32.mrf.mxu1  ;;  %v5670_v56 = vpop.f32.mrf.mxu0 }
 0x312   :  { %6044 = vmatpush2.bf16.msra.mxu1 %v8208_v24  ;;  %6072 = vmatprep.subr.bf16.mxu0 %v8219_v29 }
 0x313   :  { %6045 = vmatprep.subr.bf16.mxu1 %v8216_v27  ;;  %v5631_v22 = vpop.f32.mrf.mxu1  ;;  %v5672_v29 = vpop.f32.mrf.mxu0 }
 0x315   :  { %6073 = vmatpush1.bf16.msra.mxu0 %v8217_v4  ;;  %v5633_v24 = vpop.f32.mrf.mxu1  ;;  %v5674_v4 = vpop.f32.mrf.mxu0 }
 0x316   :  { %6046 = vmatpush2.bf16.msra.mxu1 %v8214_v30  ;;  %6074 = vmatprep.subr.bf16.mxu0 %v8225_v33 }
 0x317   :  { %6047 = vmatprep.subr.bf16.mxu1 %v8222_v32  ;;  %v5713_v27 = vpop.f32.mrf.mxu1  ;;  %v5676_v33 = vpop.f32.mrf.mxu0 }
 0x319   :  { %6075 = vmatpush1.bf16.msra.mxu0 %v8223_v35  ;;  %v5715_v30 = vpop.f32.mrf.mxu1  ;;  %v5756_v35 = vpop.f32.mrf.mxu0 }
 0x31a   :  { %6048 = vmatpush2.bf16.msra.mxu1 %v8220_v34  ;;  %6076 = vmatprep.subr.bf16.mxu0 %v8231_v39 }
 0x31b   :  { %6049 = vmatprep.subr.bf16.mxu1 %v8228_v36  ;;  %v5717_v32 = vpop.f32.mrf.mxu1  ;;  %v5758_v39 = vpop.f32.mrf.mxu0 }
 0x31d   :  { %6077 = vmatpush1.bf16.msra.mxu0 %v8229_v42  ;;  %v5719_v34 = vpop.f32.mrf.mxu1  ;;  %v5760_v42 = vpop.f32.mrf.mxu0 }
 0x31e   :  { %6050 = vmatpush2.bf16.msra.mxu1 %v8226_v40  ;;  %6078 = vmatprep.subr.bf16.mxu0 %v8237_v43 }
 0x31f   :  { %6051 = vmatprep.subr.bf16.mxu1 %v8234_v15  ;;  %v5762_v43 = vpop.f32.mrf.mxu0 }
 0x321   :  { %6079 = vmatpush1.bf16.msra.mxu0 %v8235_v45 }
 0x322   :  { %6052 = vmatpush2.bf16.msra.mxu1 %v8232_v44  ;;  %6080 = vmatprep.subr.bf16.mxu0 %v8243_v48 }
 0x323   :  { %6053 = vmatprep.subr.bf16.mxu1 %v8240_v47 }
 0x325   :  { %6081 = vmatpush1.bf16.msra.mxu0 %v8241_v50 }
 0x326   :  { %6054 = vmatpush2.bf16.msra.mxu1 %v8238_v49  ;;  %6082 = vmatprep.subr.bf16.mxu0 %v8246_v51 }
 0x327   :  { %6109 = vmatprep.subr.bf16.mxu1 %v8249_v53 }
 0x329   :  { %6056 = vmatmul.mubr.bf16.vlgmr.msra.gmra.mxu1 %v8314_v57  ;;  %6083 = vmatpush2.bf16.msra.mxu0 %v8244_v54  ;;  %v5799_v36 = vpop.f32.mrf.mxu1  ;;  %v902_v57 = vsub.s32 3, %v8473_v12 }
 0x32a   :  { %6110 = vmatpush1.bf16.msra.mxu1 %v8247_v55  ;;  %6084 = vmatprep.subr.bf16.mxu0 %v8252_v10  ;;  %v898_v55 = vsub.s32 2, %v8473_v12 }
 0x32b   :  { %6111 = vmatprep.subr.bf16.mxu1 %v8255_v25  ;;  %6141 = vmatprep.mubr.bf16.mxu1 %v8388_v31  ;;  %v8271_v31 = vld [vmem:[#allocation3 + $0x1868] ss:$16 sps:$4 sm:$0xff]   ;;  %v5801_v40 = vpop.f32.mrf.mxu1 }
 0x32d   :  { %6085 = vmatpush2.bf16.msra.mxu0 %v8250_v58  ;;  %v5803_v15 = vpop.f32.mrf.mxu1  ;;  %v8317_v58 = vld [vmem:[#allocation5] sm:$0xf] }
 0x32e   :  { %6112 = vmatpush1.bf16.msra.mxu1 %v8253_v18  ;;  %6086 = vmatprep.subr.bf16.mxu0 %v8258_v59  ;;  %v899_v18 = vrot.slane %v8317_v58, %v898_v55 }
 0x32f   :  { %6113 = vmatprep.subr.bf16.mxu1 %v8261_v60  ;;  %v5805_v44 = vpop.f32.mrf.mxu1 }
 0x331   :  { %6087 = vmatpush2.bf16.msra.mxu0 %v8256_v62  ;;  %v903_v62 = vrot.slane %v8317_v58, %v902_v57 }
 0x332   :  { %6114 = vmatpush1.bf16.msra.mxu1 %v8259_v26  ;;  %6088 = vmatprep.subr.bf16.mxu0 %v8264_v17  ;;  %v5628_v26 = vadd.f32 %v5627_v52, %v899_v18 }
 0x333   :  { %6115 = vmatprep.subr.bf16.mxu1 %v8267_v28 }
 0x335   :  { %6089 = vmatpush2.bf16.msra.mxu0 %v8262_v61  ;;  %v5630_v61 = vadd.f32 %v5629_v21, %v903_v62 }
 0x336   :  { %6116 = vmatpush1.bf16.msra.mxu1 %v8265_v23  ;;  %6090 = vmatprep.subr.bf16.mxu0 %v8270_v63  ;;  %v5671_v23 = vadd.f32 %v5670_v56, %v5628_v26  ;;  %v5632_v63 = vadd.f32 %v5631_v22, %v899_v18 }
 0x337   :  { %6117 = vmatprep.subr.bf16.mxu1 %v8273_v0  ;;  %v5673_v0 = vadd.f32 %v5672_v29, %v5630_v61 }
 0x339   :  { %6091 = vmatpush2.bf16.msra.mxu0 %v8268_v1  ;;  %v5714_v1 = vadd.f32 %v5713_v27, %v5671_v23 }
 0x33a   :  { %6118 = vmatpush1.bf16.msra.mxu1 %v8271_v31  ;;  %6092 = vmatprep.subr.bf16.mxu0 %v8276_v2 }
 0x33b   :  { %6119 = vmatprep.subr.bf16.mxu1 %v8279_v3  ;;  %v5634_v3 = vadd.f32 %v5633_v24, %v903_v62 }
 0x33d   :  { %6093 = vmatpush2.bf16.msra.mxu0 %v8274_v5  ;;  %v5675_v5 = vadd.f32 %v5674_v4, %v5632_v63 }
 0x33e   :  { %6120 = vmatpush1.bf16.msra.mxu1 %v8277_v8  ;;  %6094 = vmatprep.subr.bf16.mxu0 %v8282_v6  ;;  %v5716_v8 = vadd.f32 %v5715_v30, %v5673_v0  ;;  %v5757_v6 = vadd.f32 %v5756_v35, %v5714_v1  ;;  %v8318_v1 = vld [vmem:[#allocation7] sm:$0xf] }
 0x33f   :  { %6121 = vmatprep.subr.bf16.mxu1 %v8285_v9 }
 0x341   :  { %6095 = vmatpush2.bf16.msra.mxu0 %v8280_v41 }
 0x342   :  { %6122 = vmatpush1.bf16.msra.mxu1 %v8283_v37  ;;  %6096 = vmatprep.subr.bf16.mxu0 %v8288_v13  ;;  %v5677_v37 = vadd.f32 %v5676_v33, %v5634_v3  ;;  %v5718_v13 = vadd.f32 %v5717_v32, %v5675_v5 }
 0x343   :  { %6123 = vmatprep.subr.bf16.mxu1 %v8291_v14  ;;  %v5759_v14 = vadd.f32 %v5758_v39, %v5716_v8 }
 0x345   :  { %6097 = vmatpush2.bf16.msra.mxu0 %v8286_v46  ;;  %v5800_v46 = vadd.f32 %v5799_v36, %v5757_v6 }
 0x346   :  { %6124 = vmatpush1.bf16.msra.mxu1 %v8289_v16  ;;  %v5720_v16 = vadd.f32 %v5719_v34, %v5677_v37 }
 0x348   :  { %6099 = vmatmul.mubr.bf16.vlgmr.msra.gmra.mxu0 %v8315_v19  ;;  %v5842_v45 = vpop.f32.mrf.mxu0  ;;  %v5761_v19 = vadd.f32 %v5760_v42, %v5718_v13  ;;  %v5763_v56 = vadd.f32 %v5762_v43, %v5720_v16 }
 0x349   :  { %6142 = vmatmul.mubr.bf16.vlgmr.msra.gmra.mxu1 %v8316_v20  ;;  %v5802_v20 = vadd.f32 %v5801_v40, %v5759_v14  ;;  %v5843_v52 = vadd.f32 %v5842_v45, %v5800_v46 }
 0x34a   :  { %v5844_v48 = vpop.f32.mrf.mxu0  ;;  %v5804_v27 = vadd.f32 %v5803_v15, %v5761_v19  ;;  %v5806_v24 = vadd.f32 %v5805_v44, %v5763_v56 }
 0x34b   :  { %v5845_v29 = vadd.f32 %v5844_v48, %v5802_v20 }
 0x34c   :  { %v5846_v50 = vpop.f32.mrf.mxu0 }
 0x34d   :  { %v5847_v4 = vadd.f32 %v5846_v50, %v5804_v27 }
 0x34e   :  { %v5848_v53 = vpop.f32.mrf.mxu0 }
 0x34f   :  { %v5849_v33 = vadd.f32 %v5848_v53, %v5806_v24 }
 0x369   :  { %v5885_v47 = vpop.f32.mrf.mxu1 }
 0x36a   :  { %v5886_v58 = vadd.f32 %v5885_v47, %v5843_v52 }
 0x36b   :  { %v5887_v49 = vpop.f32.mrf.mxu1 }
 0x36c   :  { %v5888_v30 = vadd.f32 %v5887_v49, %v5845_v29 }
 0x36d   :  { %v5889_v51 = vpop.f32.mrf.mxu1 }
 0x36e   :  { %v5890_v32 = vadd.f32 %v5889_v51, %v5847_v4  ;;  %v6173_v51 = vrot.slane %v8611_v38, %v898_v55 }
 0x36f   :  { %v5891_v54 = vpop.f32.mrf.mxu1 }
 0x370   :  { %v5892_v34 = vadd.f32 %v5891_v54, %v5849_v33 }
 0x388   :  { %v5928_v10 = vpop.f32.mrf.mxu0 }
 0x389   :  { %v5929_v35 = vadd.f32 %v5928_v10, %v5886_v58 }
 0x38a   :  { %v5930_v59 = vpop.f32.mrf.mxu0 }
 0x38b   :  { %v5931_v39 = vadd.f32 %v5930_v59, %v5888_v30 }
 0x38c   :  { %v5932_v17 = vpop.f32.mrf.mxu0 }
 0x38d   :  { %v5933_v42 = vadd.f32 %v5932_v17, %v5890_v32 }
 0x38e   :  { %v5934_v31 = vpop.f32.mrf.mxu0 }
 0x38f   :  { %v5935_v43 = vadd.f32 %v5934_v31, %v5892_v34  ;;  %v6177_v31 = vrot.slane %v8318_v1, %v902_v57 }
 0x3a9   :  { %v5971_v25 = vpop.f32.mrf.mxu1 }
 0x3aa   :  { %v5972_v36 = vadd.f32 %v5971_v25, %v5929_v35 }
 0x3ab   :  { %v5973_v60 = vpop.f32.mrf.mxu1 }
 0x3ac   :  { %v5974_v40 = vadd.f32 %v5973_v60, %v5931_v39 }
 0x3ad   :  { %v5975_v28 = vpop.f32.mrf.mxu1 }
 0x3ae   :  { %v5976_v15 = vadd.f32 %v5975_v28, %v5933_v42 }
 0x3af   :  { %v5977_v2 = vpop.f32.mrf.mxu1 }
 0x3b0   :  { %v5978_v49 = vadd.f32 %v5977_v2, %v5935_v43 }
 0x3c8   :  { %v6014_v9 = vpop.f32.mrf.mxu0 }
 0x3c9   :  { %v6015_v45 = vadd.f32 %v6014_v9, %v5972_v36 }
 0x3ca   :  { %v6016_v21 = vpop.f32.mrf.mxu0 }
 0x3cb   :  { %v6017_v48 = vadd.f32 %v6016_v21, %v5974_v40 }
 0x3cc   :  { %v6018_v18 = vpop.f32.mrf.mxu0 }
 0x3cd   :  { %v6019_v10 = vadd.f32 %v6018_v18, %v5976_v15 }
 0x3ce   :  { %v6020_v26 = vpop.f32.mrf.mxu0 }
 0x3cf   :  { %v6021_v25 = vadd.f32 %v6020_v26, %v5978_v49 }
 0x3e9   :  { %v6057_v41 = vpop.f32.mrf.mxu1 }
 0x3ea   :  { %v6058_v47 = vadd.f32 %v6057_v41, %v6015_v45 }
 0x3eb   :  { %v6059_v22 = vpop.f32.mrf.mxu1 }
 0x3ec   :  { %v6060_v23 = vadd.f32 %v6059_v22, %v6017_v48  ;;  %v7048_v22 = vld [vmem:[#allocation2] ss:$0 sm:$0xff] }
 0x3ed   :  { %v6061_v62 = vpop.f32.mrf.mxu1 }
 0x3ee   :  { %v6062_v59 = vadd.f32 %v6061_v62, %v6019_v10 }
 0x3ef   :  { %v6063_v61 = vpop.f32.mrf.mxu1 }
 0x3f0   :  { %v6064_v2 = vadd.f32 %v6063_v61, %v6021_v25 }
 0x408   :  { %v6100_v44 = vpop.f32.mrf.mxu0 }
 0x409   :  { %v6143_v50 = vpop.f32.mrf.mxu1  ;;  %v6101_v63 = vadd.f32 %v6100_v44, %v6058_v47 }
 0x40a   :  { %v6102_v53 = vpop.f32.mrf.mxu0 }
 0x40b   :  { %v6145_v54 = vpop.f32.mrf.mxu1  ;;  %v6144_v60 = vadd.f32 %v6143_v50, %v6101_v63  ;;  %v6103_v17 = vadd.f32 %v6102_v53, %v6060_v23 }
 0x40c   :  { %v6104_v0 = vpop.f32.mrf.mxu0 }
 0x40d   :  { %v6147_v28 = vpop.f32.mrf.mxu1  ;;  %v6154_v3 = vmax.f32 %v6144_v60, 0.0  ;;  %v6146_v5 = vadd.f32 %v6145_v54, %v6103_v17  ;;  %v6105_v8 = vadd.f32 %v6104_v0, %v6062_v59 }
 0x40e   :  { %v6106_v6 = vpop.f32.mrf.mxu0 }
 0x40f   :  { %v6184_v9 = vmul.f32 %v6173_v51, %v6154_v3  ;;  %v6155_v41 = vmax.f32 %v6146_v5, 0.0  ;;  %v6148_v38 = vadd.f32 %v6147_v28, %v6105_v8  ;;  %v6107_v55 = vadd.f32 %v6106_v6, %v6064_v2  ;;  %v6149_v37 = vpop.f32.mrf.mxu1 }
 0x411   :  { %v6158_v13 = vmax.f32 %v6148_v38, 0.0  ;;  %v6150_v14 = vadd.f32 %v6149_v37, %v6107_v55  ;;  %v6185_v46 = vmul.f32 %v6177_v31, %v6155_v41  ;;  %v6191_v16 = vadd.f32 %v8625_v7, %v6184_v9 }
 0x413   :  { %v6188_v19 = vmul.f32 %v6173_v51, %v6158_v13  ;;  %v6159_v20 = vmax.f32 %v6150_v14, 0.0  ;;  %v6192_v52 = vadd.f32 %v6191_v16, %v6185_v46 }
 0x415   :  { %v6189_v12 = vmul.f32 %v6177_v31, %v6159_v20  ;;  %6193 = vadd.xlane.f32.xlu0 %v6192_v52  ;;  %v6196_v57 = vadd.f32 %v8627_v11, %v6188_v19 }
 0x417   :  { %v6197_v21 = vadd.f32 %v6196_v57, %v6189_v12 }
 0x419   :  { %6198 = vadd.xlane.f32.xlu0 %v6197_v21 }
 0x49e   :  { %v6194_v56 = vpop.xlane.xlu0 %6193 }
 0x49f   :  { %v6212_v27 = vadd.f32 %v7048_v22, %v6194_v56 }
 0x4a1   :  { %6215 = vst.msk [vmem:[%s8687_s5] sm:$0xff] %vm6214_vm0, %v6212_v27 }
 0x4a2   :  { %v6199_v29 = vpop.xlane.xlu0 %6198 }
 0x4a3   :  { %v6213_v58 = vadd.f32 %v7048_v22, %v6199_v29 }
 0x4a5   :  { %6216 = vst.msk [vmem:[%s8687_s5 + $0x8] sm:$0xff] %vm6214_vm0, %v6213_v58 }
 0x4a6   :  { %6221 = vsyncpa [#allocation4], 1 }
 0x4a7   :  { %6222 = vsyncpa [#allocation6], 1 }

</bundles_post_ra>
